<compile_context>
chip_gen: v5e
topology: v5e:2x2
jax: 0.10.0
libtpu: 0.0.40
codegen_flags: <defaults>
</compile_context>

<pallas_src>
import functools
import math

import jax
import jax.numpy as jnp
from jax.experimental import pallas as pl
from jax.experimental.pallas import tpu as pltpu

# ---------------- synthetic "bert-base"-style small config ----------------
VOCAB      = 100
HIDDEN     = 32
N_HEADS    = 4
HEAD_DIM   = HIDDEN // N_HEADS
INTER      = 64
N_LAYERS   = 2
MAX_LEN    = 8
N_SCHOOLS  = 2
N_SENT     = 3
LN_EPS     = 1e-12

# MXU operand dtype (f32 accumulate). bf16 is native on v6e/v7x MXU and halves
# operand bytes; elementwise math below stays f32.
MXU_DTYPE = jnp.bfloat16


# ---------------- in-kernel helpers (f32 elementwise) ----------------
def _layernorm(x, g, b):
    mu = jnp.mean(x, axis=-1, keepdims=True)
    var = jnp.mean((x - mu) ** 2, axis=-1, keepdims=True)
    return (x - mu) * jax.lax.rsqrt(var + LN_EPS) * g + b


def _gelu(x):
    # TODO(synk): HF BERT uses exact erf GELU; tanh approximation used for safe lowering.
    return 0.5 * x * (1.0 + jnp.tanh(0.7978845608028654 * (x + 0.044715 * x * x * x)))


# ---------------- fused encoder kernel ----------------
def encoder_kernel(*refs, use_mask, n_schools, n_sent, n_heads):
    if use_mask:
        (mask_ref, emb_ref, emb_ln_ref, wqkv_ref, bqkv_ref, wo_ref,
         vec_ref, w1_ref, b1_ref, w2_ref, o_ref) = refs
    else:
        (emb_ref, emb_ln_ref, wqkv_ref, bqkv_ref, wo_ref,
         vec_ref, w1_ref, b1_ref, w2_ref, o_ref) = refs
        mask_ref = None

    BS, H = emb_ref.shape                 # (B*S, H)
    B = n_schools * n_sent
    S = BS // B
    dH = H // n_heads
    n_layers = wqkv_ref.shape[0]
    scale = 1.0 / math.sqrt(dH)

    # ---- embedding LayerNorm ----
    eln = emb_ln_ref[...]                 # (2, H): row 0 gamma, row 1 beta
    x = _layernorm(emb_ref[...], eln[0:1, :], eln[1:2, :])   # (BS, H) f32

    # ---- additive attention mask, broadcast over heads (head-major batch) ----
    if use_mask:
        am = mask_ref[...]                                    # (B, S), 0 / -1e9
        am_h = jnp.broadcast_to(am[None, :, None, :],
                                (n_heads, B, 1, S)).reshape(n_heads * B, 1, S)

    def split_heads(t2d):
        # (BS, H) -> (n_heads*B, S, dH), head-major along the batch axis.
        return jnp.concatenate(
            [t2d[:, h * dH:(h + 1) * dH].reshape(B, S, dH) for h in range(n_heads)],
            axis=0)

    # ---- transformer layers (weights stay VMEM-resident, static unrolled loop) ----
    for l in range(n_layers):
        wqkv = wqkv_ref[l]                # (H, 3H)
        bqkv = bqkv_ref[l]                # (1, 3H)
        wo = wo_ref[l]                    # (H, H)
        w1 = w1_ref[l]                    # (H, INTER)
        b1 = b1_ref[l]                    # (1, INTER)
        w2 = w2_ref[l]                    # (INTER, H)
        vl = vec_ref[l]                   # (6, H): bo, ln1_g, ln1_b, b2, ln2_g, ln2_b
        bo, ln1_g, ln1_b = vl[0:1, :], vl[1:2, :], vl[2:3, :]
        b2, ln2_g, ln2_b = vl[3:4, :], vl[4:5, :], vl[5:6, :]

        # fused QKV projection: one (BS,H) @ (H,3H) MXU matmul
        qkv = jnp.dot(x.astype(MXU_DTYPE), wqkv.astype(MXU_DTYPE),
                      preferred_element_type=jnp.float32) + bqkv      # (BS, 3H)

        qh = split_heads(qkv[:, 0:H])            # (nH*B, S, dH)
        kh = split_heads(qkv[:, H:2 * H])
        vh = split_heads(qkv[:, 2 * H:3 * H])

        # head-batched attention over all B*n_heads at once
        scores = jnp.einsum('bqd,bkd->bqk',
                            qh.astype(MXU_DTYPE), kh.astype(MXU_DTYPE),
                            preferred_element_type=jnp.float32) * scale   # (nH*B, S, S)
        if use_mask:
            scores = scores + am_h
        m = jnp.max(scores, axis=-1, keepdims=True)
        p = jnp.exp(scores - m)
        attn = p * pl.reciprocal(jnp.sum(p, axis=-1, keepdims=True), approx=True)

        ctx = jnp.einsum('bqk,bkd->bqd',
                         attn.astype(MXU_DTYPE), vh.astype(MXU_DTYPE),
                         preferred_element_type=jnp.float32)              # (nH*B, S, dH)

        # re-pack heads along lanes -> (BS, H), then ONE output-projection matmul
        ctx2d = jnp.concatenate(
            [ctx[h * B:(h + 1) * B].reshape(BS, dH) for h in range(n_heads)],
            axis=-1)                                                      # (BS, H)
        attn_out = jnp.dot(ctx2d.astype(MXU_DTYPE), wo.astype(MXU_DTYPE),
                           preferred_element_type=jnp.float32) + bo
        h1 = _layernorm(x + attn_out, ln1_g, ln1_b)

        # feed-forward
        f = _gelu(jnp.dot(h1.astype(MXU_DTYPE), w1.astype(MXU_DTYPE),
                          preferred_element_type=jnp.float32) + b1)
        f2 = jnp.dot(f.astype(MXU_DTYPE), w2.astype(MXU_DTYPE),
                     preferred_element_type=jnp.float32) + b2
        x = _layernorm(h1 + f2, ln2_g, ln2_b)

    # ---- epilogue: mean over seq then over sentences (equal lengths -> one mean) ----
    pooled = jnp.mean(x.reshape(n_schools, n_sent * S, H), axis=1)        # (n_schools, H)
    o_ref[...] = pooled


# ---------------- pallas_call wrapper (single fused call, no grid) ----------------
def bert_encoder_pallas(emb2d, params, n_schools, n_sent, add_mask=None):
    BS, H = emb2d.shape
    use_mask = add_mask is not None
    kernel = functools.partial(encoder_kernel, use_mask=use_mask,
                               n_schools=n_schools, n_sent=n_sent,
                               n_heads=N_HEADS)
    args = []
    if use_mask:
        args.append(add_mask)
    args += [emb2d, params["emb_ln"], params["wqkv"], params["bqkv"],
             params["wo"], params["vecs"], params["w1"], params["b1"], params["w2"]]

    # No grid: single invocation, all operands fully VMEM-resident (tiny shapes).
    # TODO(synk): for a scaled-up BERT-base on v7x, split the batch over a
    # "parallel" grid axis (2 TCs) and budget the 64 MiB VMEM instead of fusing all.
    return pl.pallas_call(
        kernel,
        out_shape=jax.ShapeDtypeStruct((n_schools, H), jnp.float32),
    )(*args)


# ---------------- parameter init (deterministic, synthetic) ----------------
def init_params(key):
    # TODO(synk): BertModel.from_pretrained('bert-base-uncased') weights are not loadable
    # here; parameters are initialized deterministically with matching shapes instead.
    def nrm(k, shape):
        return (0.02 * jax.random.normal(k, shape)).astype(jnp.float32)

    keys = jax.random.split(key, 3 + N_LAYERS)
    ones = jnp.ones((HIDDEN,), jnp.float32)
    zeros = jnp.zeros((HIDDEN,), jnp.float32)
    params = {
        "word_emb": nrm(keys[0], (VOCAB, HIDDEN)),
        "pos_emb":  nrm(keys[1], (MAX_LEN, HIDDEN)),
        "type_emb": nrm(keys[2], (2, HIDDEN)),
        "emb_ln":   jnp.stack([ones, zeros], axis=0),          # (2, H): gamma, beta
    }
    wqkv, bqkv, wo, vecs, w1, b1, w2 = [], [], [], [], [], [], []
    for l in range(N_LAYERS):
        lk = jax.random.split(keys[3 + l], 6)
        # head h occupies columns h*HEAD_DIM:(h+1)*HEAD_DIM of each H-wide block
        wqkv.append(jnp.concatenate([nrm(lk[0], (HIDDEN, HIDDEN)),
                                     nrm(lk[1], (HIDDEN, HIDDEN)),
                                     nrm(lk[2], (HIDDEN, HIDDEN))], axis=1))  # (H, 3H)
        bqkv.append(jnp.zeros((1, 3 * HIDDEN), jnp.float32))
        wo.append(nrm(lk[3], (HIDDEN, HIDDEN)))
        w1.append(nrm(lk[4], (HIDDEN, INTER)))
        b1.append(jnp.zeros((1, INTER), jnp.float32))
        w2.append(nrm(lk[5], (INTER, HIDDEN)))
        # rows: bo, ln1_g, ln1_b, b2, ln2_g, ln2_b
        vecs.append(jnp.stack([zeros, ones, zeros, zeros, ones, zeros], axis=0))  # (6, H)
    params.update({
        "wqkv": jnp.stack(wqkv), "bqkv": jnp.stack(bqkv), "wo": jnp.stack(wo),
        "vecs": jnp.stack(vecs), "w1": jnp.stack(w1), "b1": jnp.stack(b1),
        "w2": jnp.stack(w2),
    })
    return params


# ---------------- forward (mirrors BertEncoder.forward) ----------------
def bert_encoder_forward(params, input_ids, attention_mask=None):
    n_schools, n_sent, max_len = input_ids.shape
    ids = input_ids.reshape(-1, max_len)                      # (B, S)
    B = ids.shape[0]

    # embeddings (gather = glue in plain JAX); token_type_ids assumed all-zero
    pos = jnp.arange(max_len)
    emb = (params["word_emb"][ids]
           + params["pos_emb"][pos][None, :, :]
           + params["type_emb"][0][None, None, :]).astype(jnp.float32)
    emb2d = emb.reshape(B * max_len, HIDDEN)

    if attention_mask is None:
        add_mask = None                                       # specialized: no mask DMA
    else:
        add_mask = ((1.0 - attention_mask.reshape(B, max_len).astype(jnp.float32))
                    * -1e9)                                   # (B, S) additive

    return bert_encoder_pallas(emb2d, params, n_schools, n_sent, add_mask)


if __name__ == "__main__":
    key = jax.random.PRNGKey(0)
    pkey, ikey = jax.random.split(key)
    params = init_params(pkey)

    input_ids = jax.random.randint(ikey, (N_SCHOOLS, N_SENT, MAX_LEN), 0, VOCAB,
                                   dtype=jnp.int32)

    out = bert_encoder_forward(params, input_ids, attention_mask=None)
    out = jax.block_until_ready(out)
    assert out.shape == (N_SCHOOLS, HIDDEN)
    print("KERNEL_OK")
</pallas_src>

<mosaic_0001>
module attributes {stable_mosaic.version = 11 : i64} {
  func.func @encoder_kernel(%arg0: memref<48x32xf32, #tpu.memory_space<vmem>>, %arg1: memref<2x32xf32, #tpu.memory_space<vmem>>, %arg2: memref<2x32x96xf32, #tpu.memory_space<vmem>>, %arg3: memref<2x1x96xf32, #tpu.memory_space<vmem>>, %arg4: memref<2x32x32xf32, #tpu.memory_space<vmem>>, %arg5: memref<2x6x32xf32, #tpu.memory_space<vmem>>, %arg6: memref<2x32x64xf32, #tpu.memory_space<vmem>>, %arg7: memref<2x1x64xf32, #tpu.memory_space<vmem>>, %arg8: memref<2x64x32xf32, #tpu.memory_space<vmem>>, %arg9: memref<2x32xf32, #tpu.memory_space<vmem>>) attributes {dimension_semantics = [], scalar_prefetch = 0 : i64, scratch_operands = 0 : i64, tpu.core_type = #tpu.core_type<tc>} {
    %c0 = arith.constant 0 : index
    %c0_0 = arith.constant 0 : index
    %0 = vector.load %arg1[%c0, %c0_0] : memref<2x32xf32, #tpu.memory_space<vmem>>, vector<2x32xf32>
    %c0_1 = arith.constant 0 : index
    %c0_2 = arith.constant 0 : index
    %1 = vector.load %arg0[%c0_1, %c0_2] : memref<48x32xf32, #tpu.memory_space<vmem>>, vector<48x32xf32>
    %2 = vector.extract_strided_slice %0 {offsets = [0, 0], sizes = [1, 32], strides = [1, 1]} : vector<2x32xf32> to vector<1x32xf32>
    %3 = vector.extract_strided_slice %0 {offsets = [1, 0], sizes = [1, 32], strides = [1, 1]} : vector<2x32xf32> to vector<1x32xf32>
    %cst = arith.constant dense<0.000000e+00> : vector<48xf32>
    %4 = vector.multi_reduction <add>, %1, %cst [1] : vector<48x32xf32> to vector<48xf32>
    %5 = vector.shape_cast %4 : vector<48xf32> to vector<48x1xf32>
    %cst_3 = arith.constant 3.200000e+01 : f32
    %6 = vector.broadcast %cst_3 : f32 to vector<48x1xf32>
    %7 = arith.divf %5, %6 : vector<48x1xf32>
    %8 = vector.broadcast %7 : vector<48x1xf32> to vector<48x32xf32>
    %9 = arith.subf %1, %8 : vector<48x32xf32>
    %10 = arith.mulf %9, %9 : vector<48x32xf32>
    %cst_4 = arith.constant dense<0.000000e+00> : vector<48xf32>
    %11 = vector.multi_reduction <add>, %10, %cst_4 [1] : vector<48x32xf32> to vector<48xf32>
    %12 = vector.shape_cast %11 : vector<48xf32> to vector<48x1xf32>
    %cst_5 = arith.constant 3.200000e+01 : f32
    %13 = vector.broadcast %cst_5 : f32 to vector<48x1xf32>
    %14 = arith.divf %12, %13 : vector<48x1xf32>
    %15 = vector.broadcast %7 : vector<48x1xf32> to vector<48x32xf32>
    %16 = arith.subf %1, %15 : vector<48x32xf32>
    %cst_6 = arith.constant 9.99999996E-13 : f32
    %17 = vector.broadcast %cst_6 : f32 to vector<48x1xf32>
    %18 = arith.addf %14, %17 : vector<48x1xf32>
    %19 = math.rsqrt %18 : vector<48x1xf32>
    %20 = vector.broadcast %19 : vector<48x1xf32> to vector<48x32xf32>
    %21 = arith.mulf %16, %20 : vector<48x32xf32>
    %22 = vector.broadcast %2 : vector<1x32xf32> to vector<48x32xf32>
    %23 = arith.mulf %21, %22 : vector<48x32xf32>
    %24 = vector.broadcast %3 : vector<1x32xf32> to vector<48x32xf32>
    %25 = arith.addf %23, %24 : vector<48x32xf32>
    %c0_7 = arith.constant 0 : index
    %c0_8 = arith.constant 0 : index
    %c0_9 = arith.constant 0 : index
    %26 = vector.load %arg2[%c0_7, %c0_8, %c0_9] : memref<2x32x96xf32, #tpu.memory_space<vmem>>, vector<1x32x96xf32>
    %27 = vector.shape_cast %26 : vector<1x32x96xf32> to vector<32x96xf32>
    %c0_10 = arith.constant 0 : index
    %c0_11 = arith.constant 0 : index
    %c0_12 = arith.constant 0 : index
    %28 = vector.load %arg3[%c0_10, %c0_11, %c0_12] : memref<2x1x96xf32, #tpu.memory_space<vmem>>, vector<1x1x96xf32>
    %29 = vector.shape_cast %28 : vector<1x1x96xf32> to vector<1x96xf32>
    %c0_13 = arith.constant 0 : index
    %c0_14 = arith.constant 0 : index
    %c0_15 = arith.constant 0 : index
    %30 = vector.load %arg4[%c0_13, %c0_14, %c0_15] : memref<2x32x32xf32, #tpu.memory_space<vmem>>, vector<1x32x32xf32>
    %31 = vector.shape_cast %30 : vector<1x32x32xf32> to vector<32x32xf32>
    %c0_16 = arith.constant 0 : index
    %c0_17 = arith.constant 0 : index
    %c0_18 = arith.constant 0 : index
    %32 = vector.load %arg6[%c0_16, %c0_17, %c0_18] : memref<2x32x64xf32, #tpu.memory_space<vmem>>, vector<1x32x64xf32>
    %33 = vector.shape_cast %32 : vector<1x32x64xf32> to vector<32x64xf32>
    %c0_19 = arith.constant 0 : index
    %c0_20 = arith.constant 0 : index
    %c0_21 = arith.constant 0 : index
    %34 = vector.load %arg7[%c0_19, %c0_20, %c0_21] : memref<2x1x64xf32, #tpu.memory_space<vmem>>, vector<1x1x64xf32>
    %35 = vector.shape_cast %34 : vector<1x1x64xf32> to vector<1x64xf32>
    %c0_22 = arith.constant 0 : index
    %c0_23 = arith.constant 0 : index
    %c0_24 = arith.constant 0 : index
    %36 = vector.load %arg8[%c0_22, %c0_23, %c0_24] : memref<2x64x32xf32, #tpu.memory_space<vmem>>, vector<1x64x32xf32>
    %37 = vector.shape_cast %36 : vector<1x64x32xf32> to vector<64x32xf32>
    %c0_25 = arith.constant 0 : index
    %c0_26 = arith.constant 0 : index
    %c0_27 = arith.constant 0 : index
    %38 = vector.load %arg5[%c0_25, %c0_26, %c0_27] : memref<2x6x32xf32, #tpu.memory_space<vmem>>, vector<1x6x32xf32>
    %39 = vector.shape_cast %38 : vector<1x6x32xf32> to vector<6x32xf32>
    %40 = vector.extract_strided_slice %39 {offsets = [0, 0], sizes = [1, 32], strides = [1, 1]} : vector<6x32xf32> to vector<1x32xf32>
    %41 = vector.extract_strided_slice %39 {offsets = [1, 0], sizes = [1, 32], strides = [1, 1]} : vector<6x32xf32> to vector<1x32xf32>
    %42 = vector.extract_strided_slice %39 {offsets = [2, 0], sizes = [1, 32], strides = [1, 1]} : vector<6x32xf32> to vector<1x32xf32>
    %43 = vector.extract_strided_slice %39 {offsets = [3, 0], sizes = [1, 32], strides = [1, 1]} : vector<6x32xf32> to vector<1x32xf32>
    %44 = vector.extract_strided_slice %39 {offsets = [4, 0], sizes = [1, 32], strides = [1, 1]} : vector<6x32xf32> to vector<1x32xf32>
    %45 = vector.extract_strided_slice %39 {offsets = [5, 0], sizes = [1, 32], strides = [1, 1]} : vector<6x32xf32> to vector<1x32xf32>
    %46 = arith.truncf %25 : vector<48x32xf32> to vector<48x32xbf16>
    %47 = arith.truncf %27 : vector<32x96xf32> to vector<32x96xbf16>
    %cst_28 = arith.constant dense<0.000000e+00> : vector<48x96xf32>
    %48 = tpu.matmul %46, %47, %cst_28 {dimension_numbers = #tpu.dot_dimension_numbers<[1], [0], [0], [1], [0, 0, 1, 1], [], []>} : vector<48x32xbf16>, vector<32x96xbf16>, vector<48x96xf32> -> vector<48x96xf32>
    %49 = vector.broadcast %29 : vector<1x96xf32> to vector<48x96xf32>
    %50 = arith.addf %48, %49 : vector<48x96xf32>
    %51 = vector.extract_strided_slice %50 {offsets = [0, 0], sizes = [48, 32], strides = [1, 1]} : vector<48x96xf32> to vector<48x32xf32>
    %52 = vector.extract_strided_slice %51 {offsets = [0, 0], sizes = [48, 8], strides = [1, 1]} : vector<48x32xf32> to vector<48x8xf32>
    %53 = vector.shape_cast %52 : vector<48x8xf32> to vector<6x8x8xf32>
    %54 = vector.extract_strided_slice %51 {offsets = [0, 8], sizes = [48, 8], strides = [1, 1]} : vector<48x32xf32> to vector<48x8xf32>
    %55 = vector.shape_cast %54 : vector<48x8xf32> to vector<6x8x8xf32>
    %56 = vector.extract_strided_slice %51 {offsets = [0, 16], sizes = [48, 8], strides = [1, 1]} : vector<48x32xf32> to vector<48x8xf32>
    %57 = vector.shape_cast %56 : vector<48x8xf32> to vector<6x8x8xf32>
    %58 = vector.extract_strided_slice %51 {offsets = [0, 24], sizes = [48, 8], strides = [1, 1]} : vector<48x32xf32> to vector<48x8xf32>
    %59 = vector.shape_cast %58 : vector<48x8xf32> to vector<6x8x8xf32>
    %60 = tpu.concatenate %53, %55, %57, %59 in 0 : vector<6x8x8xf32>, vector<6x8x8xf32>, vector<6x8x8xf32>, vector<6x8x8xf32> -> vector<24x8x8xf32>
    %61 = vector.extract_strided_slice %50 {offsets = [0, 32], sizes = [48, 32], strides = [1, 1]} : vector<48x96xf32> to vector<48x32xf32>
    %62 = vector.extract_strided_slice %61 {offsets = [0, 0], sizes = [48, 8], strides = [1, 1]} : vector<48x32xf32> to vector<48x8xf32>
    %63 = vector.shape_cast %62 : vector<48x8xf32> to vector<6x8x8xf32>
    %64 = vector.extract_strided_slice %61 {offsets = [0, 8], sizes = [48, 8], strides = [1, 1]} : vector<48x32xf32> to vector<48x8xf32>
    %65 = vector.shape_cast %64 : vector<48x8xf32> to vector<6x8x8xf32>
    %66 = vector.extract_strided_slice %61 {offsets = [0, 16], sizes = [48, 8], strides = [1, 1]} : vector<48x32xf32> to vector<48x8xf32>
    %67 = vector.shape_cast %66 : vector<48x8xf32> to vector<6x8x8xf32>
    %68 = vector.extract_strided_slice %61 {offsets = [0, 24], sizes = [48, 8], strides = [1, 1]} : vector<48x32xf32> to vector<48x8xf32>
    %69 = vector.shape_cast %68 : vector<48x8xf32> to vector<6x8x8xf32>
    %70 = tpu.concatenate %63, %65, %67, %69 in 0 : vector<6x8x8xf32>, vector<6x8x8xf32>, vector<6x8x8xf32>, vector<6x8x8xf32> -> vector<24x8x8xf32>
    %71 = vector.extract_strided_slice %50 {offsets = [0, 64], sizes = [48, 32], strides = [1, 1]} : vector<48x96xf32> to vector<48x32xf32>
    %72 = vector.extract_strided_slice %71 {offsets = [0, 0], sizes = [48, 8], strides = [1, 1]} : vector<48x32xf32> to vector<48x8xf32>
    %73 = vector.shape_cast %72 : vector<48x8xf32> to vector<6x8x8xf32>
    %74 = vector.extract_strided_slice %71 {offsets = [0, 8], sizes = [48, 8], strides = [1, 1]} : vector<48x32xf32> to vector<48x8xf32>
    %75 = vector.shape_cast %74 : vector<48x8xf32> to vector<6x8x8xf32>
    %76 = vector.extract_strided_slice %71 {offsets = [0, 16], sizes = [48, 8], strides = [1, 1]} : vector<48x32xf32> to vector<48x8xf32>
    %77 = vector.shape_cast %76 : vector<48x8xf32> to vector<6x8x8xf32>
    %78 = vector.extract_strided_slice %71 {offsets = [0, 24], sizes = [48, 8], strides = [1, 1]} : vector<48x32xf32> to vector<48x8xf32>
    %79 = vector.shape_cast %78 : vector<48x8xf32> to vector<6x8x8xf32>
    %80 = tpu.concatenate %73, %75, %77, %79 in 0 : vector<6x8x8xf32>, vector<6x8x8xf32>, vector<6x8x8xf32>, vector<6x8x8xf32> -> vector<24x8x8xf32>
    %81 = arith.truncf %60 : vector<24x8x8xf32> to vector<24x8x8xbf16>
    %82 = arith.truncf %70 : vector<24x8x8xf32> to vector<24x8x8xbf16>
    "tpu.trace_start"() <{level = 10 : i32, message = "bqd,bkd->bqk"}> : () -> ()
    %cst_29 = arith.constant dense<0.000000e+00> : vector<24x8x8xf32>
    %83 = tpu.matmul %81, %82, %cst_29 {dimension_numbers = #tpu.dot_dimension_numbers<[2], [2], [1], [1], [0, 0, 0, 1, 1, 1], [0], [0]>} : vector<24x8x8xbf16>, vector<24x8x8xbf16>, vector<24x8x8xf32> -> vector<24x8x8xf32>
    "tpu.trace_stop"() : () -> ()
    %cst_30 = arith.constant 0.353553385 : f32
    %84 = vector.broadcast %cst_30 : f32 to vector<24x8x8xf32>
    %85 = arith.mulf %83, %84 : vector<24x8x8xf32>
    %cst_31 = arith.constant dense<0xFF800000> : vector<24x8xf32>
    %86 = vector.multi_reduction <maximumf>, %85, %cst_31 [2] : vector<24x8x8xf32> to vector<24x8xf32>
    %87 = vector.shape_cast %86 : vector<24x8xf32> to vector<24x8x1xf32>
    %88 = vector.broadcast %87 : vector<24x8x1xf32> to vector<24x8x8xf32>
    %89 = arith.subf %85, %88 : vector<24x8x8xf32>
    %90 = math.exp %89 : vector<24x8x8xf32>
    %cst_32 = arith.constant dense<0.000000e+00> : vector<24x8xf32>
    %91 = vector.multi_reduction <add>, %90, %cst_32 [2] : vector<24x8x8xf32> to vector<24x8xf32>
    %92 = vector.shape_cast %91 : vector<24x8xf32> to vector<24x8x1xf32>
    %93 = tpu.reciprocal %92 {approx = true} : vector<24x8x1xf32> -> vector<24x8x1xf32>
    %94 = vector.broadcast %93 : vector<24x8x1xf32> to vector<24x8x8xf32>
    %95 = arith.mulf %90, %94 : vector<24x8x8xf32>
    %96 = arith.truncf %95 : vector<24x8x8xf32> to vector<24x8x8xbf16>
    %97 = arith.truncf %80 : vector<24x8x8xf32> to vector<24x8x8xbf16>
    "tpu.trace_start"() <{level = 10 : i32, message = "bqk,bkd->bqd"}> : () -> ()
    %cst_33 = arith.constant dense<0.000000e+00> : vector<24x8x8xf32>
    %98 = tpu.matmul %96, %97, %cst_33 {dimension_numbers = #tpu.dot_dimension_numbers<[2], [1], [1], [2], [0, 0, 0, 1, 1, 2], [0], [0]>} : vector<24x8x8xbf16>, vector<24x8x8xbf16>, vector<24x8x8xf32> -> vector<24x8x8xf32>
    "tpu.trace_stop"() : () -> ()
    %99 = vector.extract_strided_slice %98 {offsets = [0, 0, 0], sizes = [6, 8, 8], strides = [1, 1, 1]} : vector<24x8x8xf32> to vector<6x8x8xf32>
    %100 = vector.shape_cast %99 : vector<6x8x8xf32> to vector<48x8xf32>
    %101 = vector.extract_strided_slice %98 {offsets = [6, 0, 0], sizes = [6, 8, 8], strides = [1, 1, 1]} : vector<24x8x8xf32> to vector<6x8x8xf32>
    %102 = vector.shape_cast %101 : vector<6x8x8xf32> to vector<48x8xf32>
    %103 = vector.extract_strided_slice %98 {offsets = [12, 0, 0], sizes = [6, 8, 8], strides = [1, 1, 1]} : vector<24x8x8xf32> to vector<6x8x8xf32>
    %104 = vector.shape_cast %103 : vector<6x8x8xf32> to vector<48x8xf32>
    %105 = vector.extract_strided_slice %98 {offsets = [18, 0, 0], sizes = [6, 8, 8], strides = [1, 1, 1]} : vector<24x8x8xf32> to vector<6x8x8xf32>
    %106 = vector.shape_cast %105 : vector<6x8x8xf32> to vector<48x8xf32>
    %107 = tpu.concatenate %100, %102, %104, %106 in 1 : vector<48x8xf32>, vector<48x8xf32>, vector<48x8xf32>, vector<48x8xf32> -> vector<48x32xf32>
    %108 = arith.truncf %107 : vector<48x32xf32> to vector<48x32xbf16>
    %109 = arith.truncf %31 : vector<32x32xf32> to vector<32x32xbf16>
    %cst_34 = arith.constant dense<0.000000e+00> : vector<48x32xf32>
    %110 = tpu.matmul %108, %109, %cst_34 {dimension_numbers = #tpu.dot_dimension_numbers<[1], [0], [0], [1], [0, 0, 1, 1], [], []>} : vector<48x32xbf16>, vector<32x32xbf16>, vector<48x32xf32> -> vector<48x32xf32>
    %111 = vector.broadcast %40 : vector<1x32xf32> to vector<48x32xf32>
    %112 = arith.addf %110, %111 : vector<48x32xf32>
    %113 = arith.addf %25, %112 : vector<48x32xf32>
    %cst_35 = arith.constant dense<0.000000e+00> : vector<48xf32>
    %114 = vector.multi_reduction <add>, %113, %cst_35 [1] : vector<48x32xf32> to vector<48xf32>
    %115 = vector.shape_cast %114 : vector<48xf32> to vector<48x1xf32>
    %cst_36 = arith.constant 3.200000e+01 : f32
    %116 = vector.broadcast %cst_36 : f32 to vector<48x1xf32>
    %117 = arith.divf %115, %116 : vector<48x1xf32>
    %118 = vector.broadcast %117 : vector<48x1xf32> to vector<48x32xf32>
    %119 = arith.subf %113, %118 : vector<48x32xf32>
    %120 = arith.mulf %119, %119 : vector<48x32xf32>
    %cst_37 = arith.constant dense<0.000000e+00> : vector<48xf32>
    %121 = vector.multi_reduction <add>, %120, %cst_37 [1] : vector<48x32xf32> to vector<48xf32>
    %122 = vector.shape_cast %121 : vector<48xf32> to vector<48x1xf32>
    %cst_38 = arith.constant 3.200000e+01 : f32
    %123 = vector.broadcast %cst_38 : f32 to vector<48x1xf32>
    %124 = arith.divf %122, %123 : vector<48x1xf32>
    %125 = vector.broadcast %117 : vector<48x1xf32> to vector<48x32xf32>
    %126 = arith.subf %113, %125 : vector<48x32xf32>
    %cst_39 = arith.constant 9.99999996E-13 : f32
    %127 = vector.broadcast %cst_39 : f32 to vector<48x1xf32>
    %128 = arith.addf %124, %127 : vector<48x1xf32>
    %129 = math.rsqrt %128 : vector<48x1xf32>
    %130 = vector.broadcast %129 : vector<48x1xf32> to vector<48x32xf32>
    %131 = arith.mulf %126, %130 : vector<48x32xf32>
    %132 = vector.broadcast %41 : vector<1x32xf32> to vector<48x32xf32>
    %133 = arith.mulf %131, %132 : vector<48x32xf32>
    %134 = vector.broadcast %42 : vector<1x32xf32> to vector<48x32xf32>
    %135 = arith.addf %133, %134 : vector<48x32xf32>
    %136 = arith.truncf %135 : vector<48x32xf32> to vector<48x32xbf16>
    %137 = arith.truncf %33 : vector<32x64xf32> to vector<32x64xbf16>
    %cst_40 = arith.constant dense<0.000000e+00> : vector<48x64xf32>
    %138 = tpu.matmul %136, %137, %cst_40 {dimension_numbers = #tpu.dot_dimension_numbers<[1], [0], [0], [1], [0, 0, 1, 1], [], []>} : vector<48x32xbf16>, vector<32x64xbf16>, vector<48x64xf32> -> vector<48x64xf32>
    %139 = vector.broadcast %35 : vector<1x64xf32> to vector<48x64xf32>
    %140 = arith.addf %138, %139 : vector<48x64xf32>
    %cst_41 = arith.constant 5.000000e-01 : f32
    %141 = vector.broadcast %cst_41 : f32 to vector<48x64xf32>
    %142 = arith.mulf %141, %140 : vector<48x64xf32>
    %cst_42 = arith.constant 4.471500e-02 : f32
    %143 = vector.broadcast %cst_42 : f32 to vector<48x64xf32>
    %144 = arith.mulf %143, %140 : vector<48x64xf32>
    %145 = arith.mulf %144, %140 : vector<48x64xf32>
    %146 = arith.mulf %145, %140 : vector<48x64xf32>
    %147 = arith.addf %140, %146 : vector<48x64xf32>
    %cst_43 = arith.constant 0.797884583 : f32
    %148 = vector.broadcast %cst_43 : f32 to vector<48x64xf32>
    %149 = arith.mulf %148, %147 : vector<48x64xf32>
    %150 = math.tanh %149 : vector<48x64xf32>
    %cst_44 = arith.constant 1.000000e+00 : f32
    %151 = vector.broadcast %cst_44 : f32 to vector<48x64xf32>
    %152 = arith.addf %151, %150 : vector<48x64xf32>
    %153 = arith.mulf %142, %152 : vector<48x64xf32>
    %154 = arith.truncf %153 : vector<48x64xf32> to vector<48x64xbf16>
    %155 = arith.truncf %37 : vector<64x32xf32> to vector<64x32xbf16>
    %cst_45 = arith.constant dense<0.000000e+00> : vector<48x32xf32>
    %156 = tpu.matmul %154, %155, %cst_45 {dimension_numbers = #tpu.dot_dimension_numbers<[1], [0], [0], [1], [0, 0, 1, 1], [], []>} : vector<48x64xbf16>, vector<64x32xbf16>, vector<48x32xf32> -> vector<48x32xf32>
    %157 = vector.broadcast %43 : vector<1x32xf32> to vector<48x32xf32>
    %158 = arith.addf %156, %157 : vector<48x32xf32>
    %159 = arith.addf %135, %158 : vector<48x32xf32>
    %cst_46 = arith.constant dense<0.000000e+00> : vector<48xf32>
    %160 = vector.multi_reduction <add>, %159, %cst_46 [1] : vector<48x32xf32> to vector<48xf32>
    %161 = vector.shape_cast %160 : vector<48xf32> to vector<48x1xf32>
    %cst_47 = arith.constant 3.200000e+01 : f32
    %162 = vector.broadcast %cst_47 : f32 to vector<48x1xf32>
    %163 = arith.divf %161, %162 : vector<48x1xf32>
    %164 = vector.broadcast %163 : vector<48x1xf32> to vector<48x32xf32>
    %165 = arith.subf %159, %164 : vector<48x32xf32>
    %166 = arith.mulf %165, %165 : vector<48x32xf32>
    %cst_48 = arith.constant dense<0.000000e+00> : vector<48xf32>
    %167 = vector.multi_reduction <add>, %166, %cst_48 [1] : vector<48x32xf32> to vector<48xf32>
    %168 = vector.shape_cast %167 : vector<48xf32> to vector<48x1xf32>
    %cst_49 = arith.constant 3.200000e+01 : f32
    %169 = vector.broadcast %cst_49 : f32 to vector<48x1xf32>
    %170 = arith.divf %168, %169 : vector<48x1xf32>
    %171 = vector.broadcast %163 : vector<48x1xf32> to vector<48x32xf32>
    %172 = arith.subf %159, %171 : vector<48x32xf32>
    %cst_50 = arith.constant 9.99999996E-13 : f32
    %173 = vector.broadcast %cst_50 : f32 to vector<48x1xf32>
    %174 = arith.addf %170, %173 : vector<48x1xf32>
    %175 = math.rsqrt %174 : vector<48x1xf32>
    %176 = vector.broadcast %175 : vector<48x1xf32> to vector<48x32xf32>
    %177 = arith.mulf %172, %176 : vector<48x32xf32>
    %178 = vector.broadcast %44 : vector<1x32xf32> to vector<48x32xf32>
    %179 = arith.mulf %177, %178 : vector<48x32xf32>
    %180 = vector.broadcast %45 : vector<1x32xf32> to vector<48x32xf32>
    %181 = arith.addf %179, %180 : vector<48x32xf32>
    %c1 = arith.constant 1 : index
    %c0_51 = arith.constant 0 : index
    %c0_52 = arith.constant 0 : index
    %182 = vector.load %arg2[%c1, %c0_51, %c0_52] : memref<2x32x96xf32, #tpu.memory_space<vmem>>, vector<1x32x96xf32>
    %183 = vector.shape_cast %182 : vector<1x32x96xf32> to vector<32x96xf32>
    %c1_53 = arith.constant 1 : index
    %c0_54 = arith.constant 0 : index
    %c0_55 = arith.constant 0 : index
    %184 = vector.load %arg3[%c1_53, %c0_54, %c0_55] : memref<2x1x96xf32, #tpu.memory_space<vmem>>, vector<1x1x96xf32>
    %185 = vector.shape_cast %184 : vector<1x1x96xf32> to vector<1x96xf32>
    %c1_56 = arith.constant 1 : index
    %c0_57 = arith.constant 0 : index
    %c0_58 = arith.constant 0 : index
    %186 = vector.load %arg4[%c1_56, %c0_57, %c0_58] : memref<2x32x32xf32, #tpu.memory_space<vmem>>, vector<1x32x32xf32>
    %187 = vector.shape_cast %186 : vector<1x32x32xf32> to vector<32x32xf32>
    %c1_59 = arith.constant 1 : index
    %c0_60 = arith.constant 0 : index
    %c0_61 = arith.constant 0 : index
    %188 = vector.load %arg6[%c1_59, %c0_60, %c0_61] : memref<2x32x64xf32, #tpu.memory_space<vmem>>, vector<1x32x64xf32>
    %189 = vector.shape_cast %188 : vector<1x32x64xf32> to vector<32x64xf32>
    %c1_62 = arith.constant 1 : index
    %c0_63 = arith.constant 0 : index
    %c0_64 = arith.constant 0 : index
    %190 = vector.load %arg7[%c1_62, %c0_63, %c0_64] : memref<2x1x64xf32, #tpu.memory_space<vmem>>, vector<1x1x64xf32>
    %191 = vector.shape_cast %190 : vector<1x1x64xf32> to vector<1x64xf32>
    %c1_65 = arith.constant 1 : index
    %c0_66 = arith.constant 0 : index
    %c0_67 = arith.constant 0 : index
    %192 = vector.load %arg8[%c1_65, %c0_66, %c0_67] : memref<2x64x32xf32, #tpu.memory_space<vmem>>, vector<1x64x32xf32>
    %193 = vector.shape_cast %192 : vector<1x64x32xf32> to vector<64x32xf32>
    %c1_68 = arith.constant 1 : index
    %c0_69 = arith.constant 0 : index
    %c0_70 = arith.constant 0 : index
    %194 = vector.load %arg5[%c1_68, %c0_69, %c0_70] : memref<2x6x32xf32, #tpu.memory_space<vmem>>, vector<1x6x32xf32>
    %195 = vector.shape_cast %194 : vector<1x6x32xf32> to vector<6x32xf32>
    %196 = vector.extract_strided_slice %195 {offsets = [0, 0], sizes = [1, 32], strides = [1, 1]} : vector<6x32xf32> to vector<1x32xf32>
    %197 = vector.extract_strided_slice %195 {offsets = [1, 0], sizes = [1, 32], strides = [1, 1]} : vector<6x32xf32> to vector<1x32xf32>
    %198 = vector.extract_strided_slice %195 {offsets = [2, 0], sizes = [1, 32], strides = [1, 1]} : vector<6x32xf32> to vector<1x32xf32>
    %199 = vector.extract_strided_slice %195 {offsets = [3, 0], sizes = [1, 32], strides = [1, 1]} : vector<6x32xf32> to vector<1x32xf32>
    %200 = vector.extract_strided_slice %195 {offsets = [4, 0], sizes = [1, 32], strides = [1, 1]} : vector<6x32xf32> to vector<1x32xf32>
    %201 = vector.extract_strided_slice %195 {offsets = [5, 0], sizes = [1, 32], strides = [1, 1]} : vector<6x32xf32> to vector<1x32xf32>
    %202 = arith.truncf %181 : vector<48x32xf32> to vector<48x32xbf16>
    %203 = arith.truncf %183 : vector<32x96xf32> to vector<32x96xbf16>
    %cst_71 = arith.constant dense<0.000000e+00> : vector<48x96xf32>
    %204 = tpu.matmul %202, %203, %cst_71 {dimension_numbers = #tpu.dot_dimension_numbers<[1], [0], [0], [1], [0, 0, 1, 1], [], []>} : vector<48x32xbf16>, vector<32x96xbf16>, vector<48x96xf32> -> vector<48x96xf32>
    %205 = vector.broadcast %185 : vector<1x96xf32> to vector<48x96xf32>
    %206 = arith.addf %204, %205 : vector<48x96xf32>
    %207 = vector.extract_strided_slice %206 {offsets = [0, 0], sizes = [48, 32], strides = [1, 1]} : vector<48x96xf32> to vector<48x32xf32>
    %208 = vector.extract_strided_slice %207 {offsets = [0, 0], sizes = [48, 8], strides = [1, 1]} : vector<48x32xf32> to vector<48x8xf32>
    %209 = vector.shape_cast %208 : vector<48x8xf32> to vector<6x8x8xf32>
    %210 = vector.extract_strided_slice %207 {offsets = [0, 8], sizes = [48, 8], strides = [1, 1]} : vector<48x32xf32> to vector<48x8xf32>
    %211 = vector.shape_cast %210 : vector<48x8xf32> to vector<6x8x8xf32>
    %212 = vector.extract_strided_slice %207 {offsets = [0, 16], sizes = [48, 8], strides = [1, 1]} : vector<48x32xf32> to vector<48x8xf32>
    %213 = vector.shape_cast %212 : vector<48x8xf32> to vector<6x8x8xf32>
    %214 = vector.extract_strided_slice %207 {offsets = [0, 24], sizes = [48, 8], strides = [1, 1]} : vector<48x32xf32> to vector<48x8xf32>
    %215 = vector.shape_cast %214 : vector<48x8xf32> to vector<6x8x8xf32>
    %216 = tpu.concatenate %209, %211, %213, %215 in 0 : vector<6x8x8xf32>, vector<6x8x8xf32>, vector<6x8x8xf32>, vector<6x8x8xf32> -> vector<24x8x8xf32>
    %217 = vector.extract_strided_slice %206 {offsets = [0, 32], sizes = [48, 32], strides = [1, 1]} : vector<48x96xf32> to vector<48x32xf32>
    %218 = vector.extract_strided_slice %217 {offsets = [0, 0], sizes = [48, 8], strides = [1, 1]} : vector<48x32xf32> to vector<48x8xf32>
    %219 = vector.shape_cast %218 : vector<48x8xf32> to vector<6x8x8xf32>
    %220 = vector.extract_strided_slice %217 {offsets = [0, 8], sizes = [48, 8], strides = [1, 1]} : vector<48x32xf32> to vector<48x8xf32>
    %221 = vector.shape_cast %220 : vector<48x8xf32> to vector<6x8x8xf32>
    %222 = vector.extract_strided_slice %217 {offsets = [0, 16], sizes = [48, 8], strides = [1, 1]} : vector<48x32xf32> to vector<48x8xf32>
    %223 = vector.shape_cast %222 : vector<48x8xf32> to vector<6x8x8xf32>
    %224 = vector.extract_strided_slice %217 {offsets = [0, 24], sizes = [48, 8], strides = [1, 1]} : vector<48x32xf32> to vector<48x8xf32>
    %225 = vector.shape_cast %224 : vector<48x8xf32> to vector<6x8x8xf32>
    %226 = tpu.concatenate %219, %221, %223, %225 in 0 : vector<6x8x8xf32>, vector<6x8x8xf32>, vector<6x8x8xf32>, vector<6x8x8xf32> -> vector<24x8x8xf32>
    %227 = vector.extract_strided_slice %206 {offsets = [0, 64], sizes = [48, 32], strides = [1, 1]} : vector<48x96xf32> to vector<48x32xf32>
    %228 = vector.extract_strided_slice %227 {offsets = [0, 0], sizes = [48, 8], strides = [1, 1]} : vector<48x32xf32> to vector<48x8xf32>
    %229 = vector.shape_cast %228 : vector<48x8xf32> to vector<6x8x8xf32>
    %230 = vector.extract_strided_slice %227 {offsets = [0, 8], sizes = [48, 8], strides = [1, 1]} : vector<48x32xf32> to vector<48x8xf32>
    %231 = vector.shape_cast %230 : vector<48x8xf32> to vector<6x8x8xf32>
    %232 = vector.extract_strided_slice %227 {offsets = [0, 16], sizes = [48, 8], strides = [1, 1]} : vector<48x32xf32> to vector<48x8xf32>
    %233 = vector.shape_cast %232 : vector<48x8xf32> to vector<6x8x8xf32>
    %234 = vector.extract_strided_slice %227 {offsets = [0, 24], sizes = [48, 8], strides = [1, 1]} : vector<48x32xf32> to vector<48x8xf32>
    %235 = vector.shape_cast %234 : vector<48x8xf32> to vector<6x8x8xf32>
    %236 = tpu.concatenate %229, %231, %233, %235 in 0 : vector<6x8x8xf32>, vector<6x8x8xf32>, vector<6x8x8xf32>, vector<6x8x8xf32> -> vector<24x8x8xf32>
    %237 = arith.truncf %216 : vector<24x8x8xf32> to vector<24x8x8xbf16>
    %238 = arith.truncf %226 : vector<24x8x8xf32> to vector<24x8x8xbf16>
    "tpu.trace_start"() <{level = 10 : i32, message = "bqd,bkd->bqk"}> : () -> ()
    %cst_72 = arith.constant dense<0.000000e+00> : vector<24x8x8xf32>
    %239 = tpu.matmul %237, %238, %cst_72 {dimension_numbers = #tpu.dot_dimension_numbers<[2], [2], [1], [1], [0, 0, 0, 1, 1, 1], [0], [0]>} : vector<24x8x8xbf16>, vector<24x8x8xbf16>, vector<24x8x8xf32> -> vector<24x8x8xf32>
    "tpu.trace_stop"() : () -> ()
    %cst_73 = arith.constant 0.353553385 : f32
    %240 = vector.broadcast %cst_73 : f32 to vector<24x8x8xf32>
    %241 = arith.mulf %239, %240 : vector<24x8x8xf32>
    %cst_74 = arith.constant dense<0xFF800000> : vector<24x8xf32>
    %242 = vector.multi_reduction <maximumf>, %241, %cst_74 [2] : vector<24x8x8xf32> to vector<24x8xf32>
    %243 = vector.shape_cast %242 : vector<24x8xf32> to vector<24x8x1xf32>
    %244 = vector.broadcast %243 : vector<24x8x1xf32> to vector<24x8x8xf32>
    %245 = arith.subf %241, %244 : vector<24x8x8xf32>
    %246 = math.exp %245 : vector<24x8x8xf32>
    %cst_75 = arith.constant dense<0.000000e+00> : vector<24x8xf32>
    %247 = vector.multi_reduction <add>, %246, %cst_75 [2] : vector<24x8x8xf32> to vector<24x8xf32>
    %248 = vector.shape_cast %247 : vector<24x8xf32> to vector<24x8x1xf32>
    %249 = tpu.reciprocal %248 {approx = true} : vector<24x8x1xf32> -> vector<24x8x1xf32>
    %250 = vector.broadcast %249 : vector<24x8x1xf32> to vector<24x8x8xf32>
    %251 = arith.mulf %246, %250 : vector<24x8x8xf32>
    %252 = arith.truncf %251 : vector<24x8x8xf32> to vector<24x8x8xbf16>
    %253 = arith.truncf %236 : vector<24x8x8xf32> to vector<24x8x8xbf16>
    "tpu.trace_start"() <{level = 10 : i32, message = "bqk,bkd->bqd"}> : () -> ()
    %cst_76 = arith.constant dense<0.000000e+00> : vector<24x8x8xf32>
    %254 = tpu.matmul %252, %253, %cst_76 {dimension_numbers = #tpu.dot_dimension_numbers<[2], [1], [1], [2], [0, 0, 0, 1, 1, 2], [0], [0]>} : vector<24x8x8xbf16>, vector<24x8x8xbf16>, vector<24x8x8xf32> -> vector<24x8x8xf32>
    "tpu.trace_stop"() : () -> ()
    %255 = vector.extract_strided_slice %254 {offsets = [0, 0, 0], sizes = [6, 8, 8], strides = [1, 1, 1]} : vector<24x8x8xf32> to vector<6x8x8xf32>
    %256 = vector.shape_cast %255 : vector<6x8x8xf32> to vector<48x8xf32>
    %257 = vector.extract_strided_slice %254 {offsets = [6, 0, 0], sizes = [6, 8, 8], strides = [1, 1, 1]} : vector<24x8x8xf32> to vector<6x8x8xf32>
    %258 = vector.shape_cast %257 : vector<6x8x8xf32> to vector<48x8xf32>
    %259 = vector.extract_strided_slice %254 {offsets = [12, 0, 0], sizes = [6, 8, 8], strides = [1, 1, 1]} : vector<24x8x8xf32> to vector<6x8x8xf32>
    %260 = vector.shape_cast %259 : vector<6x8x8xf32> to vector<48x8xf32>
    %261 = vector.extract_strided_slice %254 {offsets = [18, 0, 0], sizes = [6, 8, 8], strides = [1, 1, 1]} : vector<24x8x8xf32> to vector<6x8x8xf32>
    %262 = vector.shape_cast %261 : vector<6x8x8xf32> to vector<48x8xf32>
    %263 = tpu.concatenate %256, %258, %260, %262 in 1 : vector<48x8xf32>, vector<48x8xf32>, vector<48x8xf32>, vector<48x8xf32> -> vector<48x32xf32>
    %264 = arith.truncf %263 : vector<48x32xf32> to vector<48x32xbf16>
    %265 = arith.truncf %187 : vector<32x32xf32> to vector<32x32xbf16>
    %cst_77 = arith.constant dense<0.000000e+00> : vector<48x32xf32>
    %266 = tpu.matmul %264, %265, %cst_77 {dimension_numbers = #tpu.dot_dimension_numbers<[1], [0], [0], [1], [0, 0, 1, 1], [], []>} : vector<48x32xbf16>, vector<32x32xbf16>, vector<48x32xf32> -> vector<48x32xf32>
    %267 = vector.broadcast %196 : vector<1x32xf32> to vector<48x32xf32>
    %268 = arith.addf %266, %267 : vector<48x32xf32>
    %269 = arith.addf %181, %268 : vector<48x32xf32>
    %cst_78 = arith.constant dense<0.000000e+00> : vector<48xf32>
    %270 = vector.multi_reduction <add>, %269, %cst_78 [1] : vector<48x32xf32> to vector<48xf32>
    %271 = vector.shape_cast %270 : vector<48xf32> to vector<48x1xf32>
    %cst_79 = arith.constant 3.200000e+01 : f32
    %272 = vector.broadcast %cst_79 : f32 to vector<48x1xf32>
    %273 = arith.divf %271, %272 : vector<48x1xf32>
    %274 = vector.broadcast %273 : vector<48x1xf32> to vector<48x32xf32>
    %275 = arith.subf %269, %274 : vector<48x32xf32>
    %276 = arith.mulf %275, %275 : vector<48x32xf32>
    %cst_80 = arith.constant dense<0.000000e+00> : vector<48xf32>
    %277 = vector.multi_reduction <add>, %276, %cst_80 [1] : vector<48x32xf32> to vector<48xf32>
    %278 = vector.shape_cast %277 : vector<48xf32> to vector<48x1xf32>
    %cst_81 = arith.constant 3.200000e+01 : f32
    %279 = vector.broadcast %cst_81 : f32 to vector<48x1xf32>
    %280 = arith.divf %278, %279 : vector<48x1xf32>
    %281 = vector.broadcast %273 : vector<48x1xf32> to vector<48x32xf32>
    %282 = arith.subf %269, %281 : vector<48x32xf32>
    %cst_82 = arith.constant 9.99999996E-13 : f32
    %283 = vector.broadcast %cst_82 : f32 to vector<48x1xf32>
    %284 = arith.addf %280, %283 : vector<48x1xf32>
    %285 = math.rsqrt %284 : vector<48x1xf32>
    %286 = vector.broadcast %285 : vector<48x1xf32> to vector<48x32xf32>
    %287 = arith.mulf %282, %286 : vector<48x32xf32>
    %288 = vector.broadcast %197 : vector<1x32xf32> to vector<48x32xf32>
    %289 = arith.mulf %287, %288 : vector<48x32xf32>
    %290 = vector.broadcast %198 : vector<1x32xf32> to vector<48x32xf32>
    %291 = arith.addf %289, %290 : vector<48x32xf32>
    %292 = arith.truncf %291 : vector<48x32xf32> to vector<48x32xbf16>
    %293 = arith.truncf %189 : vector<32x64xf32> to vector<32x64xbf16>
    %cst_83 = arith.constant dense<0.000000e+00> : vector<48x64xf32>
    %294 = tpu.matmul %292, %293, %cst_83 {dimension_numbers = #tpu.dot_dimension_numbers<[1], [0], [0], [1], [0, 0, 1, 1], [], []>} : vector<48x32xbf16>, vector<32x64xbf16>, vector<48x64xf32> -> vector<48x64xf32>
    %295 = vector.broadcast %191 : vector<1x64xf32> to vector<48x64xf32>
    %296 = arith.addf %294, %295 : vector<48x64xf32>
    %cst_84 = arith.constant 5.000000e-01 : f32
    %297 = vector.broadcast %cst_84 : f32 to vector<48x64xf32>
    %298 = arith.mulf %297, %296 : vector<48x64xf32>
    %cst_85 = arith.constant 4.471500e-02 : f32
    %299 = vector.broadcast %cst_85 : f32 to vector<48x64xf32>
    %300 = arith.mulf %299, %296 : vector<48x64xf32>
    %301 = arith.mulf %300, %296 : vector<48x64xf32>
    %302 = arith.mulf %301, %296 : vector<48x64xf32>
    %303 = arith.addf %296, %302 : vector<48x64xf32>
    %cst_86 = arith.constant 0.797884583 : f32
    %304 = vector.broadcast %cst_86 : f32 to vector<48x64xf32>
    %305 = arith.mulf %304, %303 : vector<48x64xf32>
    %306 = math.tanh %305 : vector<48x64xf32>
    %cst_87 = arith.constant 1.000000e+00 : f32
    %307 = vector.broadcast %cst_87 : f32 to vector<48x64xf32>
    %308 = arith.addf %307, %306 : vector<48x64xf32>
    %309 = arith.mulf %298, %308 : vector<48x64xf32>
    %310 = arith.truncf %309 : vector<48x64xf32> to vector<48x64xbf16>
    %311 = arith.truncf %193 : vector<64x32xf32> to vector<64x32xbf16>
    %cst_88 = arith.constant dense<0.000000e+00> : vector<48x32xf32>
    %312 = tpu.matmul %310, %311, %cst_88 {dimension_numbers = #tpu.dot_dimension_numbers<[1], [0], [0], [1], [0, 0, 1, 1], [], []>} : vector<48x64xbf16>, vector<64x32xbf16>, vector<48x32xf32> -> vector<48x32xf32>
    %313 = vector.broadcast %199 : vector<1x32xf32> to vector<48x32xf32>
    %314 = arith.addf %312, %313 : vector<48x32xf32>
    %315 = arith.addf %291, %314 : vector<48x32xf32>
    %cst_89 = arith.constant dense<0.000000e+00> : vector<48xf32>
    %316 = vector.multi_reduction <add>, %315, %cst_89 [1] : vector<48x32xf32> to vector<48xf32>
    %317 = vector.shape_cast %316 : vector<48xf32> to vector<48x1xf32>
    %cst_90 = arith.constant 3.200000e+01 : f32
    %318 = vector.broadcast %cst_90 : f32 to vector<48x1xf32>
    %319 = arith.divf %317, %318 : vector<48x1xf32>
    %320 = vector.broadcast %319 : vector<48x1xf32> to vector<48x32xf32>
    %321 = arith.subf %315, %320 : vector<48x32xf32>
    %322 = arith.mulf %321, %321 : vector<48x32xf32>
    %cst_91 = arith.constant dense<0.000000e+00> : vector<48xf32>
    %323 = vector.multi_reduction <add>, %322, %cst_91 [1] : vector<48x32xf32> to vector<48xf32>
    %324 = vector.shape_cast %323 : vector<48xf32> to vector<48x1xf32>
    %cst_92 = arith.constant 3.200000e+01 : f32
    %325 = vector.broadcast %cst_92 : f32 to vector<48x1xf32>
    %326 = arith.divf %324, %325 : vector<48x1xf32>
    %327 = vector.broadcast %319 : vector<48x1xf32> to vector<48x32xf32>
    %328 = arith.subf %315, %327 : vector<48x32xf32>
    %cst_93 = arith.constant 9.99999996E-13 : f32
    %329 = vector.broadcast %cst_93 : f32 to vector<48x1xf32>
    %330 = arith.addf %326, %329 : vector<48x1xf32>
    %331 = math.rsqrt %330 : vector<48x1xf32>
    %332 = vector.broadcast %331 : vector<48x1xf32> to vector<48x32xf32>
    %333 = arith.mulf %328, %332 : vector<48x32xf32>
    %334 = vector.broadcast %200 : vector<1x32xf32> to vector<48x32xf32>
    %335 = arith.mulf %333, %334 : vector<48x32xf32>
    %336 = vector.broadcast %201 : vector<1x32xf32> to vector<48x32xf32>
    %337 = arith.addf %335, %336 : vector<48x32xf32>
    %338 = vector.shape_cast %337 : vector<48x32xf32> to vector<2x24x32xf32>
    %cst_94 = arith.constant dense<0.000000e+00> : vector<2x32xf32>
    %339 = vector.multi_reduction <add>, %338, %cst_94 [1] : vector<2x24x32xf32> to vector<2x32xf32>
    %cst_95 = arith.constant 2.400000e+01 : f32
    %340 = vector.broadcast %cst_95 : f32 to vector<2x32xf32>
    %341 = arith.divf %339, %340 : vector<2x32xf32>
    %c0_96 = arith.constant 0 : index
    %c0_97 = arith.constant 0 : index
    %342 = vector.load %arg9[%c0_96, %c0_97] : memref<2x32xf32, #tpu.memory_space<vmem>>, vector<2x32xf32>
    tpu.vector_store %arg9[%c0_96, %c0_97], %341 {strides = array<i32>} : memref<2x32xf32, #tpu.memory_space<vmem>>, vector<2x32xf32>,
    return
  }
}

</mosaic_0001>

<bundles_post_ra>
// kernel: tpu_custom_call.1
= control target key start
LH: loop header
LB: loop body
LE: loop exit
PB: predicated region body
PF: predicated region fallthrough
CT: control target
= control target key end

     0   :  { %vm41_vm0 = vcmask 261120   ;;  %s7173_s0 = inlined_call_operand.vmem [shape: f32[48,32], index: 0, kind: input, shape index: {}]   ;;  %s7174_s1 = inlined_call_operand.vmem [shape: f32[2,32], index: 1, kind: input, shape index: {}]   ;;  %s7175_s2 = inlined_call_operand.vmem [shape: f32[2,32,96], index: 2, kind: input, shape index: {}]   ;;  %s7176_s3 = inlined_call_operand.vmem [shape: f32[2,1,96], index: 3, kind: input, shape index: {}]   ;;  %s7177_s4 = inlined_call_operand.vmem [shape: f32[2,32,32], index: 4, kind: input, shape index: {}]   ;;  %s7178_s5 = inlined_call_operand.vmem [shape: f32[2,6,32], index: 5, kind: input, shape index: {}]   ;;  %s7179_s6 = inlined_call_operand.vmem [shape: f32[2,32,64], index: 6, kind: input, shape index: {}]   ;;  %s7180_s7 = inlined_call_operand.vmem [shape: f32[2,1,64], index: 7, kind: input, shape index: {}]   ;;  %s7181_s8 = inlined_call_operand.vmem [shape: f32[2,64,32], index: 8, kind: input, shape index: {}]   ;;  %s7182_s9 = inlined_call_operand.hbm [shape: f32[2,32], index: 9, kind: output, shape index: {}]  }
   0x1   :  { %v39_v0 = vld [vmem:[%s7173_s0 + $0x20] sm:$0xff]  ;;  %v37_v1 = vld [vmem:[%s7173_s0 + $0x10] sm:$0xff]  ;;  %v40_v6 = vld [vmem:[%s7173_s0 + $0x28] sm:$0xff] }
   0x2   :  { %v35_v2 = vld [vmem:[%s7173_s0] sm:$0xff]  ;;  %v54_v3 = vsel %vm41_vm0, %v39_v0, 0.0  ;;  %v48_v4 = vsel %vm41_vm0, %v37_v1, 0.0  ;;  %v38_v7 = vld [vmem:[%s7173_s0 + $0x18] sm:$0xff] }
   0x3   :  { %v42_v5 = vsel %vm41_vm0, %v35_v2, 0.0  ;;  %55 = vadd.xlane.f32.xlu2 %v54_v3  ;;  %49 = vadd.xlane.f32.xlu0 %v48_v4 }
   0x4   :  { %43 = vadd.xlane.f32.xlu1 %v42_v5 }
   0x5   :  { %14 = vsyncpa [#allocation3], 0  ;;  %v36_v8 = vld [vmem:[%s7173_s0 + $0x8] sm:$0xff]  ;;  %v57_v9 = vsel %vm41_vm0, %v40_v6, 0.0  ;;  %v51_v10 = vsel %vm41_vm0, %v38_v7, 0.0  ;;  %v5125_v12 = vmov 32.0  }
   0x6   :  { %v45_v11 = vsel %vm41_vm0, %v36_v8, 0.0  ;;  %4819 = vrcp.f32 %v5125_v12  ;;  %v197_v49 = vld [vmem:[%s7175_s2 + $0x10] sm:$0xff]  ;;  %v198_v50 = vld [vmem:[%s7175_s2 + $0x18] sm:$0xff]  ;;  %v195_v57 = vld [vmem:[%s7175_s2] sm:$0xff]  ;;  %s5126_s10 = smov 120   ;;  %s5127_s11 = smov 96  }
   0x7   :  { %v222_v52 = vpack.c.bf16 %v198_v50, %v197_v49  ;;  %v196_v58 = vld [vmem:[%s7175_s2 + $0x8] sm:$0xff]  ;;  %s5128_s12 = smov 112   ;;  %s5129_s13 = smov 104  }
   0x8   :  { %v221_v60 = vpack.c.bf16 %v196_v58, %v195_v57  ;;  %s5130_s14 = smov 64   ;;  %s5131_s15 = smov 8  }
   0x9   :  { %241 = vmatpush.bf16.msra.mxu0 %v222_v52  ;;  %4622 = vmatpush.bf16.msra.mxu2 %v222_v52  ;;  %s5132_s16 = smov 16   ;;  %s5133_s17 = smov 24  }
   0xb   :  { %58 = vadd.xlane.f32.xlu2 %v57_v9  ;;  %52 = vadd.xlane.f32.xlu0 %v51_v10 }
   0xc   :  { %46 = vadd.xlane.f32.xlu1 %v45_v11  ;;  %v4820_v13 = vpop.eup %4819 }
   0xd   :  { %v61_v14 = vmul.f32 32.0, %v4820_v13  ;;  %vm65_vm1 = vweird.f32 %v4820_v13  ;;  %242 = vmatpush.bf16.msra.mxu0 %v221_v60  ;;  %4623 = vmatpush.bf16.msra.mxu2 %v221_v60 }
   0xf   :  { %v62_v15 = vsub.f32 1.0, %v61_v14 }
  0x11   :  { %v63_v16 = vmul.f32 %v4820_v13, %v62_v15 }
  0x13   :  { %v64_v17 = vadd.f32 %v4820_v13, %v63_v16 }
  0x15   :  { %v5210_v18 = vsel %vm65_vm1, %v4820_v13, %v64_v17 }
  0x76   :  { %v56_v19 = vpop.xlane.xlu2 %55  ;;  %v50_v20 = vpop.xlane.xlu0 %49 }
  0x77   :  { %v69_v21 = vmul.f32 %v5210_v18, %v50_v20  ;;  %v44_v22 = vpop.xlane.xlu1 %43  ;;  %v71_v32 = vmul.f32 %v5210_v18, %v56_v19 }
  0x78   :  { %v67_v23 = vmul.f32 %v5210_v18, %v44_v22 }
  0x79   :  { %v5214_v24 = vsub.f32 %v37_v1, %v69_v21  ;;  %v5234_v40 = vsub.f32 %v39_v0, %v71_v32 }
  0x7a   :  { %v5216_v25 = vsub.f32 %v35_v2, %v67_v23 }
  0x7b   :  { %v81_v26 = vmul.f32 %v5214_v24, %v5214_v24  ;;  %v83_v47 = vmul.f32 %v5234_v40, %v5234_v40 }
  0x7c   :  { %v79_v27 = vmul.f32 %v5216_v25, %v5216_v25 }
  0x7d   :  { %v91_v28 = vsel %vm41_vm0, %v81_v26, 0.0  ;;  %v97_v48 = vsel %vm41_vm0, %v83_v47, 0.0 }
  0x7e   :  { %v59_v29 = vpop.xlane.xlu2 %58  ;;  %92 = vadd.xlane.f32.xlu0 %v91_v28  ;;  %v53_v30 = vpop.xlane.xlu0 %52  ;;  %v85_v31 = vsel %vm41_vm0, %v79_v27, 0.0 }
  0x7f   :  { %v72_v33 = vmul.f32 %v5210_v18, %v59_v29  ;;  %v70_v34 = vmul.f32 %v5210_v18, %v53_v30  ;;  %86 = vadd.xlane.f32.xlu2 %v85_v31  ;;  %v47_v35 = vpop.xlane.xlu1 %46 }
  0x80   :  { %v68_v36 = vmul.f32 %v5210_v18, %v47_v35 }
  0x81   :  { %v5228_v37 = vsub.f32 %v40_v6, %v72_v33  ;;  %v5230_v38 = vsub.f32 %v38_v7, %v70_v34 }
  0x82   :  { %v5232_v39 = vsub.f32 %v36_v8, %v68_v36  ;;  %v34_v36 = vld [vmem:[%s7174_s1] sm:$0x3] }
  0x83   :  { %v82_v41 = vmul.f32 %v5230_v38, %v5230_v38  ;;  %v84_v42 = vmul.f32 %v5228_v37, %v5228_v37 }
  0x84   :  { %v80_v43 = vmul.f32 %v5232_v39, %v5232_v39 }
  0x85   :  { %v94_v44 = vsel %vm41_vm0, %v82_v41, 0.0  ;;  %v100_v45 = vsel %vm41_vm0, %v84_v42, 0.0 }
  0x86   :  { %95 = vadd.xlane.f32.xlu1 %v94_v44  ;;  %v88_v46 = vsel %vm41_vm0, %v80_v43, 0.0 }
  0x87   :  { %101 = vadd.xlane.f32.xlu2 %v100_v45  ;;  %89 = vadd.xlane.f32.xlu0 %v88_v46  ;;  %v181_v46 = vperm.slane %v34_v36, 0 }
  0x8e   :  { %98 = vadd.xlane.f32.xlu1 %v97_v48 }
  0xf1   :  { %v93_v51 = vpop.xlane.xlu0 %92 }
  0xf2   :  { %v105_v53 = vmul.f32 %v93_v51, %v5210_v18  ;;  %v87_v54 = vpop.xlane.xlu2 %86 }
  0xf3   :  { %v103_v55 = vmul.f32 %v87_v54, %v5210_v18 }
  0xf4   :  { %v111_v56 = vadd.f32 1e-12, %v105_v53 }
  0xf5   :  { %v109_v59 = vadd.f32 1e-12, %v103_v55 }
  0xf6   :  { %4821 = vrsqrt.f32 %v111_v56  ;;  %vm141_vm3 = vweird.f32 %v111_v56 }
  0xf7   :  { %4823 = vrsqrt.f32 %v109_v59  ;;  %vm121_vm6 = vweird.f32 %v109_v59 }
  0xf9   :  { %v96_v61 = vpop.xlane.xlu1 %95 }
  0xfa   :  { %v102_v62 = vpop.xlane.xlu2 %101  ;;  %v90_v63 = vpop.xlane.xlu0 %89  ;;  %v106_v0 = vmul.f32 %v96_v61, %v5210_v18 }
  0xfb   :  { %v108_v1 = vmul.f32 %v102_v62, %v5210_v18  ;;  %v104_v2 = vmul.f32 %v90_v63, %v5210_v18 }
  0xfc   :  { %v4822_v3 = vpop.eup %4821  ;;  %v112_v4 = vadd.f32 1e-12, %v106_v0 }
  0xfd   :  { %v4824_v5 = vpop.eup %4823  ;;  %v136_v6 = vmul.f32 %v4822_v3, %v111_v56  ;;  %v5265_v7 = vadd.f32 1e-12, %v108_v1  ;;  %v110_v8 = vadd.f32 1e-12, %v104_v2  ;;  %vm142_vm2 = vweird.f32 %v4822_v3 }
  0xfe   :  { %v116_v9 = vmul.f32 %v4824_v5, %v109_v59  ;;  %4825 = vrsqrt.f32 %v112_v4  ;;  %vm122_vm4 = vweird.f32 %v4824_v5  ;;  %vm5273_vm5 = vmor %vm141_vm3, %vm142_vm2  ;;  %vm151_vm10 = vweird.f32 %v112_v4 }
  0xff   :  { %v137_v10 = vmul.f32 %v4822_v3, %v136_v6  ;;  %4827 = vrsqrt.f32 %v5265_v7  ;;  %vm5283_vm7 = vmor %vm121_vm6, %vm122_vm4  ;;  %vm131_vm12 = vweird.f32 %v110_v8  ;;  %v188_v56 = vperm.slane %v34_v36, 1 }
 0x100   :  { %v117_v11 = vmul.f32 %v4824_v5, %v116_v9  ;;  %4829 = vrsqrt.f32 %v110_v8  ;;  %vm171_vm14 = vweird.f32 %v5265_v7  ;;  %vm1237_vm6 = vcmask 1043456  }
 0x101   :  { %v138_v12 = vmul.f32 0.5, %v137_v10  ;;  %v99_v13 = vpop.xlane.xlu1 %98 }
 0x102   :  { %v118_v14 = vmul.f32 0.5, %v117_v11  ;;  %v107_v15 = vmul.f32 %v99_v13, %v5210_v18 }
 0x103   :  { %v139_v16 = vsub.f32 1.5, %v138_v12 }
 0x104   :  { %v4826_v17 = vpop.eup %4825  ;;  %v119_v19 = vsub.f32 1.5, %v118_v14  ;;  %v113_v20 = vadd.f32 1e-12, %v107_v15 }
 0x105   :  { %v5269_v21 = vpop.eup %4827  ;;  %v140_v22 = vmul.f32 %v4822_v3, %v139_v16  ;;  %v146_v23 = vmul.f32 %v4826_v17, %v112_v4  ;;  %vm152_vm8 = vweird.f32 %v4826_v17 }
 0x106   :  { %v4830_v26 = vpop.eup %4829  ;;  %v166_v27 = vmul.f32 %v5269_v21, %v5265_v7  ;;  %4831 = vrsqrt.f32 %v113_v20  ;;  %v120_v28 = vmul.f32 %v4824_v5, %v119_v19  ;;  %vm153_vm11 = vmor %vm151_vm10, %vm152_vm8  ;;  %vm172_vm15 = vweird.f32 %v5269_v21 }
 0x107   :  { %v126_v29 = vmul.f32 %v4830_v26, %v110_v8  ;;  %v147_v30 = vmul.f32 %v4826_v17, %v146_v23  ;;  %v144_v32 = vsel %vm5273_vm5, %v4822_v3, %v140_v22  ;;  %vm132_vm9 = vweird.f32 %v4830_v26  ;;  %vm173_vm2 = vmor %vm171_vm14, %vm172_vm15 }
 0x108   :  { %v167_v33 = vmul.f32 %v5269_v21, %v166_v27  ;;  %v124_v42 = vsel %vm5283_vm7, %v4824_v5, %v120_v28  ;;  %v177_v47 = vmul.f32 %v144_v32, %v5214_v24  ;;  %vm133_vm13 = vmor %vm131_vm12, %vm132_vm9  ;;  %vm161_vm3 = vweird.f32 %v113_v20 }
 0x109   :  { %v127_v34 = vmul.f32 %v4830_v26, %v126_v29  ;;  %v148_v35 = vmul.f32 0.5, %v147_v30  ;;  %v175_v52 = vmul.f32 %v124_v42, %v5216_v25  ;;  %vm348_vm5 = vcmask 64512  }
 0x10a   :  { %v168_v48 = vmul.f32 0.5, %v167_v33  ;;  %v184_v58 = vmul.f32 %v181_v46, %v177_v47  ;;  %vm1815_vm7 = vcmask 130048   ;;  %vm1822_vm8 = vcmask 195584  }
 0x10b   :  { %v128_v43 = vmul.f32 0.5, %v127_v34  ;;  %v149_v44 = vsub.f32 1.5, %v148_v35  ;;  %v182_v62 = vmul.f32 %v181_v46, %v175_v52 }
 0x10c   :  { %v4832_v45 = vpop.eup %4831  ;;  %v169_v59 = vsub.f32 1.5, %v168_v48  ;;  %v5295_v1 = vadd.f32 %v188_v56, %v184_v58 }
 0x10d   :  { %v129_v49 = vsub.f32 1.5, %v128_v43  ;;  %v150_v50 = vmul.f32 %v4826_v17, %v149_v44  ;;  %v156_v51 = vmul.f32 %v4832_v45, %v113_v20  ;;  %vm162_vm1 = vweird.f32 %v4832_v45 }
 0x10e   :  { %vm163_vm4 = vmor %vm161_vm3, %vm162_vm1  ;;  %v5300_v4 = vadd.f32 %v188_v56, %v182_v62 }
 0x10f   :  { %v130_v53 = vmul.f32 %v4830_v26, %v129_v49  ;;  %v154_v54 = vsel %vm153_vm11, %v4826_v17, %v150_v50  ;;  %v157_v55 = vmul.f32 %v4832_v45, %v156_v51  ;;  %v4815_v17 = vld [vmem:[%s7176_s3] ss:$0 sm:$0xff] }
 0x110   :  { %v178_v57 = vmul.f32 %v154_v54, %v5230_v38  ;;  %v170_v38 = vmul.f32 %v5269_v21, %v169_v59 }
 0x111   :  { %v134_v24 = vsel %vm133_vm13, %v4830_v26, %v130_v53  ;;  %v158_v60 = vmul.f32 0.5, %v157_v55 }
 0x112   :  { %v176_v61 = vmul.f32 %v134_v24, %v5232_v39  ;;  %v185_v25 = vmul.f32 %v181_v46, %v178_v57  ;;  %v174_v8 = vsel %vm173_vm2, %v5269_v21, %v170_v38 }
 0x113   :  { %v159_v63 = vsub.f32 1.5, %v158_v60  ;;  %v180_v10 = vmul.f32 %v174_v8, %v5228_v37 }
 0x114   :  { %v183_v0 = vmul.f32 %v181_v46, %v176_v61  ;;  %v5297_v2 = vadd.f32 %v188_v56, %v185_v25 }
 0x115   :  { %v160_v3 = vmul.f32 %v4832_v45, %v159_v63  ;;  %v187_v12 = vmul.f32 %v181_v46, %v180_v10 }
 0x116   :  { %v5302_v5 = vadd.f32 %v188_v56, %v183_v0  ;;  %v219_v39 = vpack.c.bf16 %v5297_v2, %v5295_v1 }
 0x117   :  { %v164_v6 = vsel %vm163_vm4, %v4832_v45, %v160_v3  ;;  %v5315_v14 = vadd.f32 %v188_v56, %v187_v12 }
 0x118   :  { %v218_v7 = vpack.c.bf16 %v5302_v5, %v5300_v4  ;;  %4480 = vmatmul.msk.bf16.vlgmr.msra.gmra.mxu2 %vm41_vm0, %v219_v39  ;;  %v179_v9 = vmul.f32 %v164_v6, %v5234_v40 }
 0x11a   :  { %4479 = vmatmul.msk.bf16.vlgmr.msra.gmra.mxu0 %vm41_vm0, %v218_v7  ;;  %v186_v11 = vmul.f32 %v181_v46, %v179_v9 }
 0x11c   :  { %v5313_v13 = vadd.f32 %v188_v56, %v186_v11 }
 0x11e   :  { %v220_v15 = vpack.c.bf16 %v5315_v14, %v5313_v13 }
 0x128   :  { %4481 = vmatmul.msk.bf16.gmra.mxu2 %vm41_vm0, %v220_v15 }
 0x197   :  { %v244_v16 = vpop.f32.mrf.mxu0 }
 0x198   :  { %v245_v21 = vadd.f32 %v4815_v17, %v244_v16 }
 0x19a   :  { %v319_v49 = vpack.c.bf16 %v245_v21, %v245_v21 }
 0x19b   :  { %v249_v19 = vpop.f32.mrf.mxu2 }
 0x19c   :  { %v250_v40 = vadd.f32 %v4815_v17, %v249_v19  ;;  %v344_v52 = vunpack.c.l.b16 %v319_v49 }
 0x19e   :  { %v321_v20 = vpack.c.bf16 %v250_v40, %v250_v40  ;;  %v5353_v53 = vpack.c.b16 %v344_v52, %v344_v52 }
 0x19f   :  { %v246_v37 = vpop.f32.mrf.mxu0 }
 0x1a0   :  { %v247_v22 = vadd.f32 %v4815_v17, %v246_v37  ;;  %v393_v23 = vunpack.c.l.b16 %v321_v20 }
 0x1a2   :  { %v4635_v26 = vpack.i.bf16 %v245_v21, %v247_v22  ;;  %v5323_v27 = vpack.c.b16 %v393_v23, %v393_v23  ;;  %v5325_v28 = vpack.c.bf16 %v247_v22, %v247_v22  ;;  %v4655_v50 = vpack.i.bf16 %v250_v40, %v247_v22 }
 0x1a3   :  { %v251_v29 = vpop.f32.mrf.mxu2 }
 0x1a4   :  { %4636 = vrot.lane.b32.xlu0 %v4635_v26, %s5126_s10  ;;  %395 = vrot.lane.b32.xlu2 %v5323_v27, %s5127_s11  ;;  %v369_v30 = vunpack.c.l.b16 %v5325_v28  ;;  %v252_v31 = vadd.f32 %v4815_v17, %v251_v29 }
 0x1a6   :  { %v5331_v32 = vpack.c.b16 %v369_v30, %v369_v30  ;;  %v4640_v33 = vpack.i.bf16 %v252_v31, %v245_v21  ;;  %v5341_v44 = vpack.c.bf16 %v252_v31, %v252_v31  ;;  %v4665_v55 = vpack.i.bf16 %v252_v31, %v250_v40 }
 0x1a8   :  { %371 = vrot.lane.b32.xlu1 %v5331_v32, %s5127_s11  ;;  %v417_v48 = vunpack.c.l.b16 %v5341_v44 }
 0x1aa   :  { %v5348_v51 = vpack.c.b16 %v417_v48, %v417_v48 }
 0x1ab   :  { %v254_v34 = vpop.f32.mrf.mxu2 }
 0x1ac   :  { %4641 = vrot.lane.b32.xlu0 %v4640_v33, %s5128_s12  ;;  %v255_v35 = vadd.f32 %v4815_v17, %v254_v34 }
 0x1ae   :  { %v5336_v36 = vpack.c.bf16 %v255_v35, %v255_v35  ;;  %v4645_v42 = vpack.i.bf16 %v255_v35, %v252_v31 }
 0x1b0   :  { %v441_v41 = vunpack.c.l.b16 %v5336_v36 }
 0x1b2   :  { %v5339_v43 = vpack.c.b16 %v441_v41, %v441_v41 }
 0x1b3   :  { %v256_v45 = vpop.f32.mrf.mxu2 }
 0x1b4   :  { %4646 = vrot.lane.b32.xlu0 %v4645_v42, %s5126_s10  ;;  %v257_v46 = vadd.f32 %v4815_v17, %v256_v45  ;;  %443 = vrot.lane.b32.xlu1 %v5339_v43, %s5127_s11 }
 0x1b6   :  { %v4650_v47 = vpack.i.bf16 %v257_v46, %v250_v40  ;;  %v4670_v54 = vpack.i.bf16 %v257_v46, %v255_v35  ;;  %v4675_v56 = vpack.i.bf16 %v255_v35, %v257_v46  ;;  %v5360_v57 = vpack.c.bf16 %v257_v46, %v257_v46 }
 0x1b8   :  { %4651 = vrot.lane.b32.xlu2 %v4650_v47, %s5126_s10  ;;  %v465_v58 = vunpack.c.l.b16 %v5360_v57 }
 0x1ba   :  { %v5364_v59 = vpack.c.b16 %v465_v58, %v465_v58 }
 0x1bc   :  { %4656 = vrot.lane.b32.xlu0 %v4655_v50, %s5128_s12  ;;  %419 = vrot.lane.b32.xlu1 %v5348_v51, %s5127_s11 }
 0x1c0   :  { %346 = vrot.lane.b32.xlu2 %v5353_v53, %s5127_s11 }
 0x1c4   :  { %4671 = vrot.lane.b32.xlu0 %v4670_v54, %s5128_s12  ;;  %4666 = vrot.lane.b32.xlu1 %v4665_v55, %s5129_s13 }
 0x1c8   :  { %4661 = vrot.lane.b32.xlu2 %v4635_v26, %s5129_s13 }
 0x1d0   :  { %4676 = vrot.lane.b32.xlu2 %v4675_v56, %s5129_s13 }
 0x1d8   :  { %467 = vrot.lane.b32.xlu2 %v5364_v59, %s5127_s11 }
 0x1fe   :  { %v396_v24 = vpop.permute.xlu2 %395 }
 0x1ff   :  { %v401_v60 = vsel %vm348_vm5, %v396_v24, 0 }
 0x200   :  { %410 = vmatpush.bf16.xpose.msra.mxu3 %v401_v60 }
 0x207   :  { %4484 = vmatmul.msk.bf16.vlgmr.msra.gmra.mxu3 %vm348_vm5, %v321_v20 }
 0x212   :  { %v4652_v61 = vpop.permute.xlu2 %4651 }
 0x213   :  { %v4653_v62 = vunpack.i.l.bf16 %v4652_v61  ;;  %v4654_v30 = vunpack.i.h.bf16 %v4652_v61 }
 0x215   :  { %v5370_v25 = vpack.c.bf16 %v4653_v62, %v4653_v62  ;;  %v5414_v41 = vpack.c.bf16 %v4654_v30, %v4654_v30 }
 0x216   :  { %v4637_v63 = vpop.permute.xlu0 %4636 }
 0x217   :  { %v4639_v0 = vunpack.i.h.bf16 %v4637_v63  ;;  %v537_v38 = vunpack.c.l.b16 %v5370_v25  ;;  %v4638_v16 = vunpack.i.l.bf16 %v4637_v63  ;;  %v609_v56 = vunpack.c.l.b16 %v5414_v41 }
 0x219   :  { %v5373_v3 = vpack.c.bf16 %v4639_v0, %v4639_v0  ;;  %v5375_v39 = vpack.c.b16 %v537_v38, %v537_v38  ;;  %v5397_v20 = vpack.c.bf16 %v4638_v16, %v4638_v16 }
 0x21a   :  { %v372_v6 = vpop.permute.xlu1 %371  ;;  %v347_v7 = vpop.permute.xlu2 %346 }
 0x21b   :  { %v377_v8 = vsel %vm348_vm5, %v372_v6, 0  ;;  %539 = vrot.lane.b32.xlu0 %v5375_v39, %s5127_s11  ;;  %v353_v9 = vsel %vm348_vm5, %v347_v7, 0  ;;  %v489_v10 = vunpack.c.l.b16 %v5373_v3  ;;  %v5440_v6 = vpack.c.b16 %v609_v56, %v609_v56 }
 0x21c   :  { %386 = vmatpush.bf16.xpose.msrb.mxu2 %v377_v8  ;;  %362 = vmatpush.bf16.xpose.msrb.mxu0 %v353_v9 }
 0x21d   :  { %v5382_v11 = vpack.c.b16 %v489_v10, %v489_v10 }
 0x21e   :  { %v5384_v12 = vpop.permute.xlu0 %4641 }
 0x21f   :  { %v4643_v15 = vunpack.i.l.bf16 %v5384_v12  ;;  %491 = vrot.lane.b32.xlu1 %v5382_v11, %s5127_s11  ;;  %v4644_v8 = vunpack.i.h.bf16 %v5384_v12 }
 0x221   :  { %v5389_v17 = vpack.c.bf16 %v4643_v15, %v4643_v15 }
 0x222   :  { %v5391_v19 = vpop.permute.xlu2 %4661 }
 0x223   :  { %4483 = vmatmul.msk.bf16.vlgmr.msrb.gmra.mxu2 %vm348_vm5, %v5325_v28  ;;  %4482 = vmatmul.msk.bf16.vlgmr.msrb.gmra.mxu0 %vm348_vm5, %v319_v49  ;;  %v633_v40 = vunpack.c.l.b16 %v5389_v17  ;;  %v513_v28 = vunpack.c.l.b16 %v5397_v20  ;;  %v4663_v49 = vunpack.i.l.bf16 %v5391_v19 }
 0x225   :  { %v5399_v37 = vpack.c.b16 %v633_v40, %v633_v40  ;;  %v5410_v34 = vpack.c.b16 %v513_v28, %v513_v28  ;;  %v5432_v61 = vpack.c.bf16 %v4663_v49, %v4663_v49  ;;  %v4664_v40 = vunpack.i.h.bf16 %v5391_v19 }
 0x226   :  { %v4647_v21 = vpop.permute.xlu0 %4646  ;;  %v444_v22 = vpop.permute.xlu1 %443 }
 0x227   :  { %v4649_v23 = vunpack.i.h.bf16 %v4647_v21  ;;  %635 = vrot.lane.b32.xlu1 %v5399_v37, %s5127_s11  ;;  %v449_v26 = vsel %vm348_vm5, %v444_v22, 0  ;;  %v4648_v50 = vunpack.i.l.bf16 %v4647_v21  ;;  %v801_v16 = vunpack.c.l.b16 %v5432_v61 }
 0x228   :  { %458 = vmatpush.bf16.xpose.msra.mxu2 %v449_v26  ;;  %v5459_v21 = vpack.c.bf16 %v4644_v8, %v4644_v8  ;;  %v5465_v28 = vpack.c.bf16 %v4664_v40, %v4664_v40 }
 0x229   :  { %v5404_v29 = vpack.c.bf16 %v4649_v23, %v4649_v23  ;;  %v5434_v62 = vpack.c.bf16 %v4648_v50, %v4648_v50  ;;  %v5463_v26 = vpack.c.b16 %v801_v16, %v801_v16 }
 0x22a   :  { %v5407_v31 = vpop.permute.xlu2 %4676  ;;  %v705_v30 = vunpack.c.l.b16 %v5459_v21 }
 0x22b   :  { %v585_v33 = vunpack.c.l.b16 %v5404_v29  ;;  %v561_v15 = vunpack.c.l.b16 %v5434_v62 }
 0x22d   :  { %v5412_v35 = vpack.c.b16 %v585_v33, %v585_v33  ;;  %v562_v23 = vpack.c.b16 %v561_v15, %v561_v15 }
 0x22e   :  { %v4657_v42 = vpop.permute.xlu0 %4656  ;;  %v420_v45 = vpop.permute.xlu1 %419 }
 0x22f   :  { %v4659_v46 = vunpack.i.h.bf16 %v4657_v42  ;;  %v4658_v47 = vunpack.i.l.bf16 %v4657_v42  ;;  %515 = vrot.lane.b32.xlu1 %v5410_v34, %s5127_s11  ;;  %587 = vrot.lane.b32.xlu2 %v5412_v35, %s5127_s11  ;;  %v425_v48 = vsel %vm348_vm5, %v420_v45, 0  ;;  %v777_v42 = vunpack.c.l.b16 %v5465_v28 }
 0x230   :  { %434 = vmatpush.bf16.xpose.msra.mxu1 %v425_v48 }
 0x231   :  { %v5422_v52 = vpack.c.bf16 %v4659_v46, %v4659_v46  ;;  %v5424_v54 = vpack.c.bf16 %v4658_v47, %v4658_v47  ;;  %v706_v47 = vpack.c.b16 %v705_v30, %v705_v30  ;;  %v5481_v49 = vpack.c.b16 %v777_v42, %v777_v42 }
 0x232   :  { %v468_v55 = vpop.permute.xlu2 %467 }
 0x233   :  { %4486 = vmatmul.msk.bf16.vlgmr.msra.gmra.mxu2 %vm348_vm5, %v5336_v36  ;;  %v473_v58 = vsel %vm348_vm5, %v468_v55, 0  ;;  %v681_v24 = vunpack.c.l.b16 %v5422_v52  ;;  %v657_v60 = vunpack.c.l.b16 %v5424_v54 }
 0x234   :  { %482 = vmatpush.bf16.xpose.msrb.mxu3 %v473_v58 }
 0x235   :  { %v5436_v63 = vpack.c.b16 %v681_v24, %v681_v24  ;;  %v5438_v0 = vpack.c.b16 %v657_v60, %v657_v60  ;;  %v4678_v24 = vunpack.i.l.bf16 %v5407_v31 }
 0x236   :  { %v4672_v38 = vpop.permute.xlu0 %4671  ;;  %v4667_v7 = vpop.permute.xlu1 %4666 }
 0x237   :  { %v4673_v36 = vunpack.i.l.bf16 %v4672_v38  ;;  %683 = vrot.lane.b32.xlu0 %v5436_v63, %s5127_s11  ;;  %659 = vrot.lane.b32.xlu1 %v5438_v0, %s5127_s11  ;;  %v4668_v10 = vunpack.i.l.bf16 %v4667_v7  ;;  %v4669_v19 = vunpack.i.h.bf16 %v4667_v7 }
 0x238   :  { %611 = vrot.lane.b32.xlu2 %v5440_v6, %s5127_s11  ;;  %4485 = vmatmul.msk.bf16.vlgmr.msra.gmra.mxu1 %vm348_vm5, %v5341_v44 }
 0x239   :  { %v5451_v9 = vpack.c.bf16 %v4673_v36, %v4673_v36  ;;  %v5461_v22 = vpack.c.bf16 %v4668_v10, %v4668_v10  ;;  %v5477_v46 = vpack.c.bf16 %v4669_v19, %v4669_v19 }
 0x23b   :  { %4487 = vmatmul.msk.bf16.vlgmr.msrb.gmra.mxu3 %vm348_vm5, %v5360_v57  ;;  %v729_v12 = vunpack.c.l.b16 %v5451_v9  ;;  %v4679_v57 = vunpack.i.h.bf16 %v5407_v31  ;;  %v825_v33 = vunpack.c.l.b16 %v5461_v22  ;;  %v849_v50 = vunpack.c.l.b16 %v5477_v46 }
 0x23d   :  { %v730_v44 = vpack.c.b16 %v729_v12, %v729_v12  ;;  %v5475_v45 = vpack.c.bf16 %v4679_v57, %v4679_v57  ;;  %v5479_v48 = vpack.c.b16 %v825_v33, %v825_v33  ;;  %v5490_v56 = vpack.c.b16 %v849_v50, %v849_v50 }
 0x23f   :  { %563 = vrot.lane.b32.xlu0 %v562_v23, %s5127_s11  ;;  %803 = vrot.lane.b32.xlu1 %v5463_v26, %s5127_s11  ;;  %v873_v55 = vunpack.c.l.b16 %v5475_v45 }
 0x240   :  { %731 = vrot.lane.b32.xlu2 %v730_v44, %s5127_s11 }
 0x241   :  { %v5492_v58 = vpack.c.b16 %v873_v55, %v873_v55 }
 0x247   :  { %707 = vrot.lane.b32.xlu0 %v706_v47, %s5127_s11  ;;  %827 = vrot.lane.b32.xlu1 %v5479_v48, %s5127_s11 }
 0x248   :  { %779 = vrot.lane.b32.xlu2 %v5481_v49, %s5127_s11 }
 0x24f   :  { %851 = vrot.lane.b32.xlu0 %v5490_v56, %s5127_s11  ;;  %875 = vrot.lane.b32.xlu1 %v5492_v58, %s5127_s11 }
 0x250   :  { %1254 = vrot.lane.b32.xlu2 %v5331_v32, %s5130_s14  ;;  %v5512_v32 = vpack.c.bf16 %v4678_v24, %v4678_v24 }
 0x257   :  { %1296 = vrot.lane.b32.xlu0 %v5348_v51, %s5130_s14  ;;  %1232 = vrot.lane.b32.xlu1 %v5353_v53, %s5130_s14  ;;  %v4674_v51 = vunpack.i.h.bf16 %v4672_v38 }
 0x258   :  { %1338 = vrot.lane.b32.xlu2 %v5364_v59, %s5130_s14 }
 0x259   :  { %v5520_v53 = vpack.c.bf16 %v4674_v51, %v4674_v51 }
 0x25f   :  { %1275 = vrot.lane.b32.xlu0 %v5323_v27, %s5130_s14  ;;  %1380 = vrot.lane.b32.xlu1 %v5410_v34, %s5130_s14  ;;  %v897_v27 = vunpack.c.l.b16 %v5512_v32 }
 0x260   :  { %1422 = vrot.lane.b32.xlu2 %v562_v23, %s5130_s14 }
 0x261   :  { %v5522_v59 = vpack.c.b16 %v897_v27, %v897_v27 }
 0x267   :  { %1317 = vrot.lane.b32.xlu0 %v5339_v43, %s5130_s14  ;;  %1401 = vrot.lane.b32.xlu1 %v5375_v39, %s5130_s14  ;;  %v753_v43 = vunpack.c.l.b16 %v5520_v53 }
 0x268   :  { %1548 = vrot.lane.b32.xlu2 %v706_v47, %s5130_s14 }
 0x269   :  { %v5531_v39 = vpack.c.b16 %v753_v43, %v753_v43 }
 0x26f   :  { %1359 = vrot.lane.b32.xlu0 %v5382_v11, %s5130_s14  ;;  %1485 = vrot.lane.b32.xlu1 %v5399_v37, %s5130_s14 }
 0x270   :  { %899 = vrot.lane.b32.xlu2 %v5522_v59, %s5127_s11 }
 0x277   :  { %755 = vrot.lane.b32.xlu0 %v5531_v39, %s5127_s11  ;;  %1569 = vrot.lane.b32.xlu1 %v730_v44, %s5130_s14 }
 0x27f   :  { %1443 = vrot.lane.b32.xlu0 %v5412_v35, %s5130_s14 }
 0x287   :  { %1506 = vrot.lane.b32.xlu0 %v5438_v0, %s5130_s14 }
 0x289   :  { %v588_v11 = vpop.permute.xlu2 %587 }
 0x28a   :  { %v5540_v37 = vpop.f32.mrf.mxu3  ;;  %v593_v35 = vsel %vm348_vm5, %v588_v11, 0 }
 0x28d   :  { %v540_v31 = vpop.permute.xlu0 %539 }
 0x28e   :  { %v545_v34 = vsel %vm348_vm5, %v540_v31, 0 }
 0x28f   :  { %1527 = vrot.lane.b32.xlu0 %v5436_v63, %s5130_s14  ;;  %554 = vmatpush.bf16.xpose.msra.mxu3 %v545_v34 }
 0x291   :  { %v492_v60 = vpop.permute.xlu1 %491 }
 0x292   :  { %v612_v38 = vpop.permute.xlu2 %611  ;;  %v497_v7 = vsel %vm348_vm5, %v492_v60, 0  ;;  %v414_v36 = vpop.f32.mrf.mxu3 }
 0x293   :  { %506 = vmatpush.bf16.xpose.msrb.mxu1 %v497_v7 }
 0x296   :  { %4490 = vmatmul.msk.bf16.vlgmr.msra.gmra.mxu3 %vm348_vm5, %v5370_v25  ;;  %v617_v25 = vsel %vm348_vm5, %v612_v38, 0 }
 0x297   :  { %1464 = vrot.lane.b32.xlu0 %v5440_v6, %s5130_s14 }
 0x299   :  { %v636_v0 = vpop.permute.xlu1 %635 }
 0x29a   :  { %v641_v8 = vsel %vm348_vm5, %v636_v0, 0  ;;  %v732_v63 = vpop.permute.xlu2 %731  ;;  %4488 = vmatmul.msk.bf16.vlgmr.msrb.gmra.mxu1 %vm348_vm5, %v5373_v3 }
 0x29b   :  { %602 = vmatpush.bf16.xpose.msra.mxu1 %v593_v35  ;;  %v737_v10 = vsel %vm348_vm5, %v732_v63, 0  ;;  %650 = vmatpush.bf16.xpose.msrb.mxu3 %v641_v8 }
 0x2a0   :  { %v364_v15 = vpop.f32.mrf.mxu0 }
 0x2a1   :  { %v516_v16 = vpop.permute.xlu1 %515  ;;  %v5592_v7 = vmul.f32 0.35355338, %v364_v15 }
 0x2a2   :  { %v521_v40 = vsel %vm348_vm5, %v516_v16, 0  ;;  %v780_v12 = vpop.permute.xlu2 %779  ;;  %v5604_v16 = vmul.f32 0.35355338, %v5540_v37 }
 0x2a3   :  { %746 = vmatpush.bf16.xpose.msra.mxu3 %v737_v10  ;;  %530 = vmatpush.bf16.xpose.msrb.mxu2 %v521_v40 }
 0x2a6   :  { %v388_v6 = vpop.f32.mrf.mxu2  ;;  %4494 = vmatmul.msk.bf16.vlgmr.msrb.gmra.mxu3 %vm348_vm5, %v5389_v17  ;;  %v785_v17 = vsel %vm348_vm5, %v780_v12, 0  ;;  %v950_v12 = vsel %vm348_vm5, %v5604_v16, -inf }
 0x2a7   :  { %v5559_v23 = vmul.f32 0.35355338, %v388_v6 }
 0x2a8   :  { %v366_v3 = vpop.f32.mrf.mxu0 }
 0x2a9   :  { %v684_v44 = vpop.permute.xlu0 %683  ;;  %v660_v57 = vpop.permute.xlu1 %659  ;;  %v947_v19 = vsel %vm348_vm5, %v5559_v23, -inf }
 0x2aa   :  { %v689_v30 = vsel %vm348_vm5, %v684_v44, 0  ;;  %v5564_v33 = vpop.permute.xlu2 %1254  ;;  %4489 = vmatmul.msk.bf16.vlgmr.msrb.gmra.mxu2 %vm348_vm5, %v5397_v20  ;;  %4492 = vmatmul.msk.bf16.vlgmr.msra.gmra.mxu1 %vm348_vm5, %v5404_v29  ;;  %v665_v51 = vsel %vm348_vm5, %v660_v57, 0 }
 0x2ab   :  { %626 = vmatpush.bf16.xpose.msra.mxu2 %v617_v25  ;;  %948 = vmax.xlane.f32.xlu1 %v947_v19 }
 0x2ac   :  { %698 = vmatpush.bf16.xpose.msrb.mxu1 %v689_v30 }
 0x2ae   :  { %v390_v42 = vpop.f32.mrf.mxu2 }
 0x2b1   :  { %v564_v47 = vpop.permute.xlu0 %563  ;;  %v804_v50 = vpop.permute.xlu1 %803 }
 0x2b2   :  { %v569_v55 = vsel %vm348_vm5, %v564_v47, 0  ;;  %v5572_v24 = vpop.permute.xlu2 %1338 }
 0x2b3   :  { %578 = vmatpush.bf16.xpose.msra.mxu0 %v569_v55 }
 0x2b4   :  { %794 = vmatpush.bf16.xpose.msra.mxu1 %v785_v17 }
 0x2b5   :  { %v436_v20 = vpop.f32.mrf.mxu1 }
 0x2b6   :  { %v5575_v27 = vmul.f32 0.35355338, %v436_v20  ;;  %v460_v29 = vpop.f32.mrf.mxu2  ;;  %4498 = vmatmul.msk.bf16.vlgmr.msra.gmra.mxu3 %vm348_vm5, %v5451_v9  ;;  %v809_v9 = vsel %vm348_vm5, %v804_v50, 0  ;;  %v1344_v20 = vsel %vm1237_vm6, %v5572_v24, 0 }
 0x2b7   :  { %v5594_v36 = vmul.f32 0.35355338, %v460_v29 }
 0x2b8   :  { %v953_v43 = vsel %vm348_vm5, %v5575_v27, -inf }
 0x2b9   :  { %v708_v11 = vpop.permute.xlu0 %707  ;;  %v828_v31 = vpop.permute.xlu1 %827  ;;  %954 = vmax.xlane.f32.xlu2 %v953_v43 }
 0x2ba   :  { %v713_v34 = vsel %vm348_vm5, %v708_v11, 0  ;;  %v5582_v60 = vpop.permute.xlu2 %1422  ;;  %v833_v38 = vsel %vm348_vm5, %v828_v31, 0  ;;  %4491 = vmatmul.msk.bf16.vlgmr.msra.gmra.mxu0 %vm348_vm5, %v5434_v62  ;;  %4493 = vmatmul.msk.bf16.vlgmr.msra.gmra.mxu2 %vm348_vm5, %v5414_v41  ;;  %v944_v62 = vsel %vm348_vm5, %v5592_v7, -inf  ;;  %v956_v41 = vsel %vm348_vm5, %v5594_v36, -inf }
 0x2bb   :  { %674 = vmatpush.bf16.xpose.msrb.mxu0 %v665_v51  ;;  %4496 = vmatmul.msk.bf16.vlgmr.msrb.gmra.mxu1 %vm348_vm5, %v5422_v52 }
 0x2bc   :  { %722 = vmatpush.bf16.xpose.msrb.mxu2 %v713_v34  ;;  %842 = vmatpush.bf16.xpose.msrb.mxu3 %v833_v38 }
 0x2bd   :  { %v438_v35 = vpop.f32.mrf.mxu1 }
 0x2be   :  { %v462_v0 = vpop.f32.mrf.mxu2  ;;  %v484_v8 = vpop.f32.mrf.mxu3 }
 0x2c1   :  { %v852_v63 = vpop.permute.xlu0 %851  ;;  %945 = vmax.xlane.f32.xlu0 %v944_v62  ;;  %v876_v10 = vpop.permute.xlu1 %875  ;;  %957 = vmax.xlane.f32.xlu2 %v956_v41 }
 0x2c2   :  { %v5600_v52 = vpop.permute.xlu2 %1548  ;;  %v881_v15 = vsel %vm348_vm5, %v876_v10, 0 }
 0x2c3   :  { %890 = vmatpush.bf16.xpose.msrb.mxu1 %v881_v15 }
 0x2c4   :  { %818 = vmatpush.bf16.xpose.msra.mxu2 %v809_v9 }
 0x2c6   :  { %v486_v40 = vpop.f32.mrf.mxu3  ;;  %4502 = vmatmul.msk.bf16.vlgmr.msrb.gmra.mxu3 %vm348_vm5, %v5461_v22  ;;  %v5618_v22 = vmul.f32 0.35355338, %v484_v8 }
 0x2c8   :  { %v959_v57 = vsel %vm348_vm5, %v5618_v22, -inf }
 0x2c9   :  { %v1297_v25 = vpop.permute.xlu0 %1296  ;;  %951 = vmax.xlane.f32.xlu0 %v950_v12  ;;  %v1233_v6 = vpop.permute.xlu1 %1232 }
 0x2ca   :  { %v900_v3 = vpop.permute.xlu2 %899  ;;  %v1239_v44 = vsel %vm1237_vm6, %v1233_v6, 0  ;;  %4495 = vmatmul.msk.bf16.vlgmr.msrb.gmra.mxu0 %vm348_vm5, %v5424_v54  ;;  %4497 = vmatmul.msk.bf16.vlgmr.msrb.gmra.mxu2 %vm348_vm5, %v5459_v21  ;;  %v1302_v21 = vsel %vm1237_vm6, %v1297_v25, 0 }
 0x2cb   :  { %v905_v37 = vsel %vm348_vm5, %v900_v3, 0  ;;  %4500 = vmatmul.msk.bf16.vlgmr.msra.gmra.mxu1 %vm348_vm5, %v5465_v28  ;;  %1248 = vmatpush.bf16.msra.mxu3 %v1239_v44 }
 0x2cc   :  { %914 = vmatpush.bf16.xpose.msrb.mxu2 %v905_v37 }
 0x2d1   :  { %v1276_v19 = vpop.permute.xlu0 %1275  ;;  %960 = vmax.xlane.f32.xlu0 %v959_v57  ;;  %v1381_v47 = vpop.permute.xlu1 %1380 }
 0x2d2   :  { %v1281_v30 = vsel %vm1237_vm6, %v1276_v19, 0  ;;  %v1386_v55 = vsel %vm1237_vm6, %v1381_v47, 0 }
 0x2d3   :  { %1290 = vmatpush.bf16.msra.mxu1 %v1281_v30 }
 0x2d9   :  { %v1318_v54 = vpop.permute.xlu0 %1317  ;;  %v5645_v29 = vpop.permute.xlu1 %1401 }
 0x2da   :  { %v1323_v17 = vsel %vm1237_vm6, %v1318_v54, 0  ;;  %4501 = vmatmul.msk.bf16.vlgmr.msra.gmra.mxu2 %vm348_vm5, %v5432_v61  ;;  %v857_v61 = vsel %vm348_vm5, %v852_v63, 0 }
 0x2db   :  { %4504 = vmatmul.msk.bf16.vlgmr.msrb.gmra.mxu1 %vm348_vm5, %v5475_v45  ;;  %1311 = vmatpush.bf16.msra.mxu2 %v1302_v21  ;;  %v1260_v45 = vsel %vm1237_vm6, %v5564_v33, 0 }
 0x2dc   :  { %1332 = vmatpush.bf16.msrb.mxu3 %v1323_v17 }
 0x2e1   :  { %v1360_v28 = vpop.permute.xlu0 %1359  ;;  %v5651_v34 = vpop.permute.xlu1 %1485 }
 0x2e2   :  { %v1365_v42 = vsel %vm1237_vm6, %v1360_v28, 0 }
 0x2e3   :  { %1374 = vmatpush.bf16.msrb.mxu1 %v1365_v42 }
 0x2e9   :  { %v756_v50 = vpop.permute.xlu0 %755  ;;  %v5661_v0 = vpop.permute.xlu1 %1569 }
 0x2ea   :  { %v761_v51 = vsel %vm348_vm5, %v756_v50, 0  ;;  %4505 = vmatmul.msk.bf16.vlgmr.msrb.gmra.mxu2 %vm348_vm5, %v5512_v32 }
 0x2eb   :  { %1395 = vmatpush.bf16.msrb.mxu2 %v1386_v55  ;;  %770 = vmatpush.bf16.xpose.msra.mxu0 %v761_v51 }
 0x2f1   :  { %v5643_v32 = vpop.permute.xlu0 %1443 }
 0x2f2   :  { %4499 = vmatmul.msk.bf16.vlgmr.msra.gmra.mxu0 %vm348_vm5, %v5520_v53 }
 0x2f3   :  { %866 = vmatpush.bf16.xpose.msrb.mxu0 %v857_v61 }
 0x2f9   :  { %v5647_v43 = vpop.permute.xlu0 %1506 }
 0x2fb   :  { %1269 = vmatpush.bf16.msra.mxu0 %v1260_v45 }
 0x301   :  { %v5659_v9 = vpop.permute.xlu0 %1527 }
 0x302   :  { %4503 = vmatmul.msk.bf16.vlgmr.msrb.gmra.mxu0 %vm348_vm5, %v5477_v46 }
 0x303   :  { %1353 = vmatpush.bf16.msrb.mxu0 %v1344_v20 }
 0x309   :  { %v5663_v41 = vpop.permute.xlu0 %1464 }
 0x317   :  { %v508_v11 = vpop.f32.mrf.mxu1 }
 0x318   :  { %v5649_v31 = vmul.f32 0.35355338, %v508_v11 }
 0x319   :  { %v556_v33 = vpop.f32.mrf.mxu3 }
 0x31a   :  { %v5653_v53 = vmul.f32 0.35355338, %v556_v33  ;;  %v962_v24 = vsel %vm348_vm5, %v5649_v31, -inf }
 0x31b   :  { %963 = vmax.xlane.f32.xlu2 %v962_v24 }
 0x31c   :  { %v968_v46 = vsel %vm348_vm5, %v5653_v53, -inf }
 0x31d   :  { %969 = vmax.xlane.f32.xlu1 %v968_v46 }
 0x31e   :  { %v949_v63 = vpop.xlane.xlu1 %948 }
 0x31f   :  { %v510_v38 = vpop.f32.mrf.mxu1  ;;  %v1017_v12 = vsub.f32 %v5559_v23, %v949_v63 }
 0x321   :  { %v558_v35 = vpop.f32.mrf.mxu3  ;;  %v1042_v44 = vmul.f32 1.442695, %v1017_v12 }
 0x327   :  { %v604_v8 = vpop.f32.mrf.mxu1 }
 0x329   :  { %v652_v62 = vpop.f32.mrf.mxu3 }
 0x32a   :  { %v5687_v38 = vmul.f32 0.35355338, %v652_v62 }
 0x32c   :  { %v955_v10 = vpop.xlane.xlu2 %954  ;;  %v980_v62 = vsel %vm348_vm5, %v5687_v38, -inf }
 0x32d   :  { %v532_v15 = vpop.f32.mrf.mxu2  ;;  %v1019_v40 = vsub.f32 %v5575_v27, %v955_v10 }
 0x32e   :  { %v5685_v46 = vmul.f32 0.35355338, %v532_v15 }
 0x32f   :  { %v1046_v25 = vmul.f32 1.442695, %v1019_v40  ;;  %v606_v6 = vpop.f32.mrf.mxu1 }
 0x330   :  { %v965_v6 = vsel %vm348_vm5, %v5685_v46, -inf }
 0x331   :  { %4833 = vpow2.f32 %v1046_v25  ;;  %v654_v3 = vpop.f32.mrf.mxu3 }
 0x332   :  { %4835 = vpow2.f32 %v1042_v44  ;;  %v5698_v3 = vmul.f32 0.35355338, %v604_v8 }
 0x334   :  { %v946_v37 = vpop.xlane.xlu0 %945  ;;  %v958_v44 = vpop.xlane.xlu2 %957 }
 0x335   :  { %v1016_v57 = vsub.f32 %v5592_v7, %v946_v37  ;;  %v534_v19 = vpop.f32.mrf.mxu2 }
 0x337   :  { %v5668_v30 = vpop.eup %4833  ;;  %v1040_v54 = vmul.f32 1.442695, %v1016_v57  ;;  %v580_v21 = vpop.f32.mrf.mxu0 }
 0x338   :  { %v5670_v17 = vmul.f32 0.35355338, %v580_v21  ;;  %v700_v28 = vpop.f32.mrf.mxu1  ;;  %v1097_v23 = vsel %vm348_vm5, %v5668_v30, 0.0  ;;  %v5676_v47 = vpop.eup %4835 }
 0x339   :  { %4837 = vpow2.f32 %v1040_v54  ;;  %1098 = vadd.xlane.f32.xlu0 %v1097_v23  ;;  %v748_v27 = vpop.f32.mrf.mxu3  ;;  %v1091_v33 = vsel %vm348_vm5, %v5676_v47, 0.0  ;;  %v1020_v54 = vsub.f32 %v5594_v36, %v958_v44 }
 0x33a   :  { %v971_v42 = vsel %vm348_vm5, %v5670_v17, -inf  ;;  %v5713_v36 = vmul.f32 0.35355338, %v748_v27 }
 0x33b   :  { %972 = vmax.xlane.f32.xlu2 %v971_v42 }
 0x33c   :  { %v952_v7 = vpop.xlane.xlu0 %951 }
 0x33d   :  { %v1018_v50 = vsub.f32 %v5604_v16, %v952_v7  ;;  %v628_v55 = vpop.f32.mrf.mxu2  ;;  %v974_v7 = vsel %vm348_vm5, %v5698_v3, -inf }
 0x33f   :  { %v5679_v51 = vpop.eup %4837  ;;  %v1044_v61 = vmul.f32 1.442695, %v1018_v50  ;;  %v582_v45 = vpop.f32.mrf.mxu0 }
 0x340   :  { %v702_v20 = vpop.f32.mrf.mxu1  ;;  %v1088_v11 = vsel %vm348_vm5, %v5679_v51, 0.0 }
 0x341   :  { %4839 = vpow2.f32 %v1044_v61  ;;  %1089 = vadd.xlane.f32.xlu1 %v1088_v11  ;;  %1092 = vadd.xlane.f32.xlu0 %v1091_v33  ;;  %v750_v24 = vpop.f32.mrf.mxu3  ;;  %v5711_v61 = vmul.f32 0.35355338, %v700_v28  ;;  %v992_v33 = vsel %vm348_vm5, %v5713_v36, -inf }
 0x343   :  { %v986_v24 = vsel %vm348_vm5, %v5711_v61, -inf }
 0x344   :  { %v961_v16 = vpop.xlane.xlu0 %960 }
 0x345   :  { %v630_v35 = vpop.f32.mrf.mxu2  ;;  %v1021_v40 = vsub.f32 %v5618_v22, %v961_v16  ;;  %v5702_v22 = vmul.f32 0.35355338, %v628_v55  ;;  %v1048_v55 = vmul.f32 1.442695, %v1020_v54 }
 0x347   :  { %v5689_v63 = vpop.eup %4839  ;;  %v676_v10 = vpop.f32.mrf.mxu0  ;;  %v1050_v37 = vmul.f32 1.442695, %v1021_v40  ;;  %v977_v8 = vsel %vm348_vm5, %v5702_v22, -inf }
 0x348   :  { %v796_v12 = vpop.f32.mrf.mxu1  ;;  %v1094_v25 = vsel %vm348_vm5, %v5689_v63, 0.0  ;;  %v5700_v57 = vmul.f32 0.35355338, %v676_v10 }
 0x349   :  { %1095 = vadd.xlane.f32.xlu2 %v1094_v25  ;;  %966 = vmax.xlane.f32.xlu1 %v965_v6  ;;  %v844_v15 = vpop.f32.mrf.mxu3  ;;  %4841 = vpow2.f32 %v1050_v37  ;;  %v5729_v40 = vmul.f32 0.35355338, %v796_v12 }
 0x34a   :  { %981 = vmax.xlane.f32.xlu0 %v980_v62  ;;  %v983_v42 = vsel %vm348_vm5, %v5700_v57, -inf  ;;  %4843 = vpow2.f32 %v1048_v55 }
 0x34b   :  { %v998_v6 = vsel %vm348_vm5, %v5729_v40, -inf }
 0x34d   :  { %v724_v19 = vpop.f32.mrf.mxu2 }
 0x34f   :  { %v678_v21 = vpop.f32.mrf.mxu0  ;;  %v5715_v20 = vpop.eup %4841 }
 0x350   :  { %v798_v23 = vpop.f32.mrf.mxu1  ;;  %v1103_v28 = vsel %vm348_vm5, %v5715_v20, 0.0  ;;  %v5725_v27 = vpop.eup %4843 }
 0x351   :  { %984 = vmax.xlane.f32.xlu2 %v983_v42  ;;  %975 = vmax.xlane.f32.xlu1 %v974_v7  ;;  %v846_v50 = vpop.f32.mrf.mxu3  ;;  %v1100_v10 = vsel %vm348_vm5, %v5725_v27, 0.0  ;;  %v5739_v23 = vmul.f32 0.35355338, %v724_v19  ;;  %v5743_v7 = vmul.f32 0.35355338, %v844_v15 }
 0x352   :  { %978 = vmax.xlane.f32.xlu0 %v977_v8 }
 0x353   :  { %v989_v12 = vsel %vm348_vm5, %v5739_v23, -inf  ;;  %v1004_v50 = vsel %vm348_vm5, %v5743_v7, -inf }
 0x355   :  { %v726_v45 = vpop.f32.mrf.mxu2 }
 0x358   :  { %v5717_v11 = vpop.f32.mrf.mxu1 }
 0x359   :  { %993 = vmax.xlane.f32.xlu2 %v992_v33  ;;  %987 = vmax.xlane.f32.xlu1 %v986_v24 }
 0x35a   :  { %1104 = vadd.xlane.f32.xlu0 %v1103_v28 }
 0x35d   :  { %v820_v16 = vpop.f32.mrf.mxu2 }
 0x35e   :  { %v5751_v19 = vmul.f32 0.35355338, %v820_v16 }
 0x360   :  { %v894_v35 = vpop.f32.mrf.mxu1 }
 0x361   :  { %1101 = vadd.xlane.f32.xlu1 %v1100_v10 }
 0x365   :  { %v822_v25 = vpop.f32.mrf.mxu2 }
 0x366   :  { %v1001_v25 = vsel %vm348_vm5, %v5751_v19, -inf }
 0x369   :  { %999 = vmax.xlane.f32.xlu1 %v998_v6 }
 0x36d   :  { %v5733_v62 = vpop.f32.mrf.mxu2 }
 0x36f   :  { %v772_v44 = vpop.f32.mrf.mxu0 }
 0x370   :  { %v5735_v37 = vmul.f32 0.35355338, %v772_v44 }
 0x372   :  { %v995_v54 = vsel %vm348_vm5, %v5735_v37, -inf }
 0x373   :  { %996 = vmax.xlane.f32.xlu2 %v995_v54 }
 0x375   :  { %v918_v21 = vpop.f32.mrf.mxu2 }
 0x377   :  { %v774_v42 = vpop.f32.mrf.mxu0 }
 0x37b   :  { %990 = vmax.xlane.f32.xlu2 %v989_v12 }
 0x37f   :  { %v868_v8 = vpop.f32.mrf.mxu0 }
 0x380   :  { %v5747_v55 = vmul.f32 0.35355338, %v868_v8 }
 0x382   :  { %v1007_v33 = vsel %vm348_vm5, %v5747_v55, -inf }
 0x383   :  { %1005 = vmax.xlane.f32.xlu2 %v1004_v50 }
 0x387   :  { %v870_v45 = vpop.f32.mrf.mxu0 }
 0x38b   :  { %1008 = vmax.xlane.f32.xlu2 %v1007_v33 }
 0x38e   :  { %v964_v24 = vpop.xlane.xlu2 %963 }
 0x38f   :  { %v1022_v28 = vsub.f32 %v5649_v31, %v964_v24 }
 0x390   :  { %v970_v35 = vpop.xlane.xlu1 %969 }
 0x391   :  { %v1052_v15 = vmul.f32 1.442695, %v1022_v28  ;;  %v1024_v10 = vsub.f32 %v5653_v53, %v970_v35  ;;  %v1470_v28 = vsel %vm1237_vm6, %v5663_v41, 0 }
 0x393   :  { %4845 = vpow2.f32 %v1052_v15  ;;  %1002 = vmax.xlane.f32.xlu2 %v1001_v25  ;;  %v1056_v6 = vmul.f32 1.442695, %v1024_v10 }
 0x395   :  { %4847 = vpow2.f32 %v1056_v6 }
 0x399   :  { %v5757_v44 = vpop.eup %4845 }
 0x39a   :  { %v1106_v16 = vsel %vm348_vm5, %v5757_v44, 0.0 }
 0x39b   :  { %1107 = vadd.xlane.f32.xlu1 %v1106_v16  ;;  %v5761_v54 = vpop.eup %4847 }
 0x39c   :  { %v1112_v31 = vsel %vm348_vm5, %v5761_v54, 0.0 }
 0x3a3   :  { %1113 = vadd.xlane.f32.xlu1 %v1112_v31 }
 0x3ab   :  { %1632 = vrot.lane.b32.xlu2 %v5463_v26, %s5130_s14 }
 0x3ac   :  { %v1099_v53 = vpop.xlane.xlu0 %1098 }
 0x3ad   :  { %4849 = vrcp.f32 %v1099_v53 }
 0x3ae   :  { %v973_v21 = vpop.xlane.xlu2 %972 }
 0x3af   :  { %v1025_v42 = vsub.f32 %v5670_v17, %v973_v21 }
 0x3b1   :  { %v1058_v12 = vmul.f32 1.442695, %v1025_v42 }
 0x3b3   :  { %v4850_v8 = vpop.eup %4849  ;;  %4851 = vpow2.f32 %v1058_v12  ;;  %v1407_v12 = vsel %vm1237_vm6, %v5645_v29, 0 }
 0x3b4   :  { %v1187_v50 = vmul.f32 %v4850_v8, %v5668_v30  ;;  %v1090_v45 = vpop.xlane.xlu1 %1089  ;;  %v1093_v33 = vpop.xlane.xlu0 %1092 }
 0x3b5   :  { %4853 = vrcp.f32 %v1090_v45 }
 0x3b6   :  { %v1211_v24 = vpack.c.bf16 %v1187_v50, %v1187_v50  ;;  %4855 = vrcp.f32 %v1093_v33 }
 0x3b8   :  { %4509 = vmatmul.msk.bf16.vlgmr.msra.gmra.mxu2 %vm348_vm5, %v1211_v24 }
 0x3b9   :  { %v5772_v26 = vpop.eup %4851  ;;  %1479 = vmatpush.bf16.msra.mxu2 %v1470_v28 }
 0x3ba   :  { %v1115_v17 = vsel %vm348_vm5, %v5772_v26, 0.0 }
 0x3bb   :  { %v4854_v35 = vpop.eup %4853  ;;  %1116 = vadd.xlane.f32.xlu1 %v1115_v17 }
 0x3bc   :  { %v4856_v15 = vpop.eup %4855  ;;  %v1184_v30 = vmul.f32 %v4854_v35, %v5679_v51  ;;  %v1096_v10 = vpop.xlane.xlu2 %1095  ;;  %v1428_v51 = vsel %vm1237_vm6, %v5582_v60, 0 }
 0x3bd   :  { %v967_v25 = vpop.xlane.xlu1 %966  ;;  %v1185_v6 = vmul.f32 %v4856_v15, %v5676_v47  ;;  %4857 = vrcp.f32 %v1096_v10  ;;  %v982_v16 = vpop.xlane.xlu0 %981  ;;  %v1449_v15 = vsel %vm1237_vm6, %v5643_v32, 0 }
 0x3be   :  { %v1023_v41 = vsub.f32 %v5685_v46, %v967_v25  ;;  %v1208_v31 = vpack.c.bf16 %v1184_v30, %v1184_v30  ;;  %v1028_v53 = vsub.f32 %v5687_v38, %v982_v16 }
 0x3bf   :  { %v1209_v21 = vpack.c.bf16 %v1185_v6, %v1185_v6 }
 0x3c0   :  { %v1054_v42 = vmul.f32 1.442695, %v1023_v41  ;;  %v1064_v8 = vmul.f32 1.442695, %v1028_v53  ;;  %4506 = vmatmul.msk.bf16.vlgmr.msra.gmra.mxu3 %vm348_vm5, %v1208_v31 }
 0x3c1   :  { %1416 = vmatpush.bf16.msra.mxu3 %v1407_v12  ;;  %4507 = vmatmul.msk.bf16.vlgmr.msra.gmra.mxu0 %vm348_vm5, %v1209_v21 }
 0x3c2   :  { %4859 = vpow2.f32 %v1054_v42  ;;  %1437 = vmatpush.bf16.msra.mxu0 %v1428_v51 }
 0x3c3   :  { %4861 = vpow2.f32 %v1064_v8  ;;  %v4858_v47 = vpop.eup %4857 }
 0x3c4   :  { %v1186_v46 = vmul.f32 %v4858_v47, %v5689_v63  ;;  %v985_v38 = vpop.xlane.xlu2 %984 }
 0x3c5   :  { %v976_v50 = vpop.xlane.xlu1 %975  ;;  %v1029_v45 = vsub.f32 %v5700_v57, %v985_v38  ;;  %v979_v33 = vpop.xlane.xlu0 %978 }
 0x3c6   :  { %v1026_v29 = vsub.f32 %v5698_v3, %v976_v50  ;;  %v1210_v24 = vpack.c.bf16 %v1186_v46, %v1186_v46  ;;  %v1027_v30 = vsub.f32 %v5702_v22, %v979_v33  ;;  %v5804_v22 = vmul.f32 0.35355338, %v5717_v11 }
 0x3c7   :  { %v1066_v60 = vmul.f32 1.442695, %v1029_v45  ;;  %v5820_v46 = vmul.f32 0.35355338, %v5733_v62 }
 0x3c8   :  { %v5789_v28 = vpop.eup %4859  ;;  %v1060_v17 = vmul.f32 1.442695, %v1026_v29  ;;  %4508 = vmatmul.msk.bf16.vlgmr.msra.gmra.mxu1 %vm348_vm5, %v1210_v24  ;;  %v1062_v57 = vmul.f32 1.442695, %v1027_v30  ;;  %v1010_v11 = vsel %vm348_vm5, %v5804_v22, -inf }
 0x3c9   :  { %v5791_v35 = vpop.eup %4861  ;;  %v1109_v63 = vsel %vm348_vm5, %v5789_v28, 0.0  ;;  %4863 = vpow2.f32 %v1066_v60  ;;  %1458 = vmatpush.bf16.msra.mxu1 %v1449_v15  ;;  %v1013_v45 = vsel %vm348_vm5, %v5820_v46, -inf  ;;  %v1491_v15 = vsel %vm1237_vm6, %v5651_v34, 0 }
 0x3ca   :  { %1110 = vadd.xlane.f32.xlu0 %v1109_v63  ;;  %v1124_v3 = vsel %vm348_vm5, %v5791_v35, 0.0  ;;  %4865 = vpow2.f32 %v1060_v17 }
 0x3cb   :  { %1125 = vadd.xlane.f32.xlu1 %v1124_v3 }
 0x3cc   :  { %v994_v6 = vpop.xlane.xlu2 %993 }
 0x3cd   :  { %v988_v10 = vpop.xlane.xlu1 %987  ;;  %v1105_v25 = vpop.xlane.xlu0 %1104  ;;  %v1032_v21 = vsub.f32 %v5713_v36, %v994_v6  ;;  %v1512_v36 = vsel %vm1237_vm6, %v5647_v43, 0 }
 0x3ce   :  { %4867 = vrcp.f32 %v1105_v25  ;;  %v1030_v16 = vsub.f32 %v5711_v61, %v988_v10 }
 0x3cf   :  { %v5801_v32 = vpop.eup %4863  ;;  %4869 = vpow2.f32 %v1062_v57  ;;  %v1072_v47 = vmul.f32 1.442695, %v1032_v21 }
 0x3d0   :  { %v5806_v41 = vpop.eup %4865  ;;  %v1127_v31 = vsel %vm348_vm5, %v5801_v32, 0.0  ;;  %v1068_v12 = vmul.f32 1.442695, %v1030_v16 }
 0x3d1   :  { %v1118_v53 = vsel %vm348_vm5, %v5806_v41, 0.0 }
 0x3d2   :  { %1119 = vadd.xlane.f32.xlu0 %v1118_v53 }
 0x3d3   :  { %1128 = vadd.xlane.f32.xlu1 %v1127_v31 }
 0x3d4   :  { %v4868_v42 = vpop.eup %4867  ;;  %1011 = vmax.xlane.f32.xlu2 %v1010_v11 }
 0x3d5   :  { %v1102_v8 = vpop.xlane.xlu1 %1101  ;;  %v1189_v51 = vmul.f32 %v4868_v42, %v5715_v20  ;;  %v5817_v61 = vpop.eup %4869 }
 0x3d6   :  { %4871 = vrcp.f32 %v1102_v8  ;;  %v1121_v50 = vsel %vm348_vm5, %v5817_v61, 0.0 }
 0x3d7   :  { %v1213_v38 = vpack.c.bf16 %v1189_v51, %v1189_v51  ;;  %4873 = vpow2.f32 %v1068_v12 }
 0x3d8   :  { %4875 = vpow2.f32 %v1072_v47 }
 0x3d9   :  { %4511 = vmatmul.msk.bf16.vlgmr.msrb.gmra.mxu0 %vm348_vm5, %v1213_v38 }
 0x3da   :  { %1521 = vmatpush.bf16.msrb.mxu0 %v1512_v36  ;;  %1122 = vadd.xlane.f32.xlu0 %v1121_v50 }
 0x3dc   :  { %v4872_v20 = vpop.eup %4871  ;;  %1014 = vmax.xlane.f32.xlu2 %v1013_v45  ;;  %v1533_v45 = vsel %vm1237_vm6, %v5659_v9, 0 }
 0x3dd   :  { %v1188_v62 = vmul.f32 %v4872_v20, %v5725_v27  ;;  %v1000_v29 = vpop.xlane.xlu1 %999  ;;  %v5831_v24 = vpop.eup %4873 }
 0x3de   :  { %v1034_v33 = vsub.f32 %v5729_v40, %v1000_v29  ;;  %v5833_v17 = vpop.eup %4875  ;;  %v1130_v30 = vsel %vm348_vm5, %v5831_v24, 0.0 }
 0x3df   :  { %v1212_v43 = vpack.c.bf16 %v1188_v62, %v1188_v62  ;;  %v1136_v27 = vsel %vm348_vm5, %v5833_v17, 0.0 }
 0x3e0   :  { %v1076_v60 = vmul.f32 1.442695, %v1034_v33 }
 0x3e1   :  { %4510 = vmatmul.msk.bf16.vlgmr.msrb.gmra.mxu3 %vm348_vm5, %v1212_v43 }
 0x3e2   :  { %1500 = vmatpush.bf16.msrb.mxu3 %v1491_v15  ;;  %4877 = vpow2.f32 %v1076_v60  ;;  %1131 = vadd.xlane.f32.xlu0 %v1130_v30 }
 0x3e4   :  { %1137 = vadd.xlane.f32.xlu2 %v1136_v27 }
 0x3e6   :  { %v997_v40 = vpop.xlane.xlu2 %996 }
 0x3e7   :  { %v1033_v63 = vsub.f32 %v5735_v37, %v997_v40 }
 0x3e8   :  { %v5843_v3 = vpop.eup %4877 }
 0x3e9   :  { %v1074_v57 = vmul.f32 1.442695, %v1033_v63  ;;  %v1142_v34 = vsel %vm348_vm5, %v5843_v3, 0.0 }
 0x3eb   :  { %4879 = vpow2.f32 %v1074_v57 }
 0x3ec   :  { %1611 = vrot.lane.b32.xlu1 %v5481_v49, %s5130_s14  ;;  %1143 = vadd.xlane.f32.xlu2 %v1142_v34 }
 0x3ee   :  { %v991_v10 = vpop.xlane.xlu2 %990 }
 0x3ef   :  { %v1031_v25 = vsub.f32 %v5739_v23, %v991_v10 }
 0x3f1   :  { %v5850_v6 = vpop.eup %4879  ;;  %v1070_v16 = vmul.f32 1.442695, %v1031_v25 }
 0x3f2   :  { %v1139_v37 = vsel %vm348_vm5, %v5850_v6, 0.0 }
 0x3f3   :  { %4881 = vpow2.f32 %v1070_v16  ;;  %1140 = vadd.xlane.f32.xlu0 %v1139_v37 }
 0x3f4   :  { %1653 = vrot.lane.b32.xlu1 %v5479_v48, %s5130_s14 }
 0x3f6   :  { %v1006_v31 = vpop.xlane.xlu2 %1005 }
 0x3f7   :  { %v1036_v9 = vsub.f32 %v5743_v7, %v1006_v31 }
 0x3f9   :  { %v5856_v49 = vpop.eup %4881  ;;  %v1080_v33 = vmul.f32 1.442695, %v1036_v9 }
 0x3fa   :  { %v1133_v53 = vsel %vm348_vm5, %v5856_v49, 0.0 }
 0x3fb   :  { %1134 = vadd.xlane.f32.xlu0 %v1133_v53 }
 0x3fe   :  { %v1009_v21 = vpop.xlane.xlu2 %1008 }
 0x3ff   :  { %v1037_v23 = vsub.f32 %v5747_v55, %v1009_v21 }
 0x401   :  { %v1082_v11 = vmul.f32 1.442695, %v1037_v23 }
 0x403   :  { %4883 = vpow2.f32 %v1082_v11 }
 0x406   :  { %v1003_v42 = vpop.xlane.xlu2 %1002 }
 0x407   :  { %v1035_v48 = vsub.f32 %v5751_v19, %v1003_v42  ;;  %v1554_v42 = vsel %vm1237_vm6, %v5600_v52, 0 }
 0x409   :  { %v5861_v12 = vpop.eup %4883  ;;  %v1078_v47 = vmul.f32 1.442695, %v1035_v48 }
 0x40a   :  { %v1151_v8 = vsel %vm348_vm5, %v5861_v12, 0.0 }
 0x40b   :  { %1152 = vadd.xlane.f32.xlu2 %v1151_v8 }
 0x40e   :  { %v1108_v51 = vpop.xlane.xlu1 %1107  ;;  %v1633_v63 = vpop.permute.xlu2 %1632 }
 0x40f   :  { %4885 = vrcp.f32 %v1108_v51  ;;  %1590 = vrot.lane.b32.xlu0 %v5531_v39, %s5130_s14 }
 0x410   :  { %4887 = vpow2.f32 %v1078_v47 }
 0x415   :  { %v4886_v38 = vpop.eup %4885 }
 0x416   :  { %v1190_v55 = vmul.f32 %v4886_v38, %v5757_v44  ;;  %v1114_v36 = vpop.xlane.xlu1 %1113  ;;  %v5869_v20 = vpop.eup %4887  ;;  %v1575_v44 = vsel %vm1237_vm6, %v5661_v0, 0 }
 0x417   :  { %4889 = vrcp.f32 %v1114_v36  ;;  %v1145_v19 = vsel %vm348_vm5, %v5869_v20, 0.0 }
 0x418   :  { %v1214_v50 = vpack.c.bf16 %v1190_v55, %v1190_v55  ;;  %4891 = vpow2.f32 %v1080_v33  ;;  %v1638_v33 = vsel %vm1237_vm6, %v1633_v63, 0 }
 0x41a   :  { %4512 = vmatmul.msk.bf16.vlgmr.msrb.gmra.mxu1 %vm348_vm5, %v1214_v50 }
 0x41b   :  { %1542 = vmatpush.bf16.msrb.mxu1 %v1533_v45 }
 0x41d   :  { %v4890_v62 = vpop.eup %4889 }
 0x41e   :  { %1146 = vadd.xlane.f32.xlu1 %v1145_v19  ;;  %v1192_v39 = vmul.f32 %v4890_v62, %v5761_v54  ;;  %v5883_v60 = vpop.eup %4891 }
 0x41f   :  { %v1148_v30 = vsel %vm348_vm5, %v5883_v60, 0.0 }
 0x420   :  { %v1216_v29 = vpack.c.bf16 %v1192_v39, %v1192_v39 }
 0x422   :  { %4514 = vmatmul.msk.bf16.vlgmr.msra.gmra.mxu3 %vm348_vm5, %v1216_v29 }
 0x423   :  { %1584 = vmatpush.bf16.msra.mxu3 %v1575_v44  ;;  %1716 = vrot.lane.b32.xlu2 %v5522_v59, %s5130_s14 }
 0x42e   :  { %v1117_v43 = vpop.xlane.xlu1 %1116 }
 0x42f   :  { %4893 = vrcp.f32 %v1117_v43 }
 0x435   :  { %v4894_v15 = vpop.eup %4893 }
 0x436   :  { %v1193_v54 = vmul.f32 %v4894_v15, %v5772_v26 }
 0x437   :  { %1674 = vrot.lane.b32.xlu1 %v5490_v56, %s5130_s14 }
 0x438   :  { %v1217_v0 = vpack.c.bf16 %v1193_v54, %v1193_v54 }
 0x439   :  { %1149 = vadd.xlane.f32.xlu0 %v1148_v30 }
 0x43a   :  { %4515 = vmatmul.msk.bf16.vlgmr.msra.gmra.mxu0 %vm348_vm5, %v1217_v0 }
 0x43b   :  { %v5891_v59 = vpop.f32.mrf.mxu2 }
 0x43d   :  { %v1111_v7 = vpop.xlane.xlu0 %1110 }
 0x43e   :  { %4895 = vrcp.f32 %v1111_v7  ;;  %v1126_v27 = vpop.xlane.xlu1 %1125  ;;  %v5893_v40 = vpop.f32.mrf.mxu0 }
 0x43f   :  { %4897 = vrcp.f32 %v1126_v27 }
 0x443   :  { %v5895_v57 = vpop.f32.mrf.mxu3  ;;  %v1315_v56 = vpop.f32.mrf.mxu2 }
 0x444   :  { %v4896_v26 = vpop.eup %4895 }
 0x445   :  { %v4898_v34 = vpop.eup %4897  ;;  %v1191_v10 = vmul.f32 %v4896_v26, %v5789_v28  ;;  %v1120_v16 = vpop.xlane.xlu0 %1119 }
 0x446   :  { %v1196_v25 = vmul.f32 %v4898_v34, %v5791_v35  ;;  %v5899_v37 = vpop.f32.mrf.mxu1  ;;  %4899 = vrcp.f32 %v1120_v16  ;;  %v1129_v53 = vpop.xlane.xlu1 %1128 }
 0x447   :  { %v1215_v31 = vpack.c.bf16 %v1191_v10, %v1191_v10  ;;  %v1273_v21 = vpop.f32.mrf.mxu0  ;;  %4901 = vrcp.f32 %v1129_v53  ;;  %v1012_v11 = vpop.xlane.xlu2 %1011 }
 0x448   :  { %v1220_v23 = vpack.c.bf16 %v1196_v25, %v1196_v25  ;;  %v1038_v8 = vsub.f32 %v5804_v22, %v1012_v11 }
 0x449   :  { %4513 = vmatmul.msk.bf16.vlgmr.msrb.gmra.mxu2 %vm348_vm5, %v1215_v31 }
 0x44a   :  { %1563 = vmatpush.bf16.msrb.mxu2 %v1554_v42  ;;  %4518 = vmatmul.msk.bf16.vlgmr.msrb.gmra.mxu3 %vm348_vm5, %v1220_v23  ;;  %v1084_v28 = vmul.f32 1.442695, %v1038_v8 }
 0x44b   :  { %v1252_v35 = vpop.f32.mrf.mxu3 }
 0x44c   :  { %v4900_v48 = vpop.eup %4899  ;;  %4903 = vpow2.f32 %v1084_v28 }
 0x44d   :  { %v4902_v51 = vpop.eup %4901  ;;  %v1194_v47 = vmul.f32 %v4900_v48, %v5806_v41  ;;  %v1123_v38 = vpop.xlane.xlu0 %1122 }
 0x44e   :  { %v1294_v55 = vpop.f32.mrf.mxu1  ;;  %v1197_v36 = vmul.f32 %v4902_v51, %v5801_v32  ;;  %4905 = vrcp.f32 %v1123_v38 }
 0x44f   :  { %v1218_v52 = vpack.c.bf16 %v1194_v47, %v1194_v47  ;;  %v1015_v50 = vpop.xlane.xlu2 %1014 }
 0x450   :  { %v1221_v22 = vpack.c.bf16 %v1197_v36, %v1197_v36  ;;  %v1039_v45 = vsub.f32 %v5820_v46, %v1015_v50 }
 0x451   :  { %4516 = vmatmul.msk.bf16.vlgmr.msra.gmra.mxu1 %vm348_vm5, %v1218_v52 }
 0x452   :  { %v5910_v19 = vpop.eup %4903  ;;  %v1086_v62 = vmul.f32 1.442695, %v1039_v45  ;;  %4519 = vmatmul.msk.bf16.vlgmr.msrb.gmra.mxu0 %vm348_vm5, %v1221_v22 }
 0x453   :  { %v1154_v41 = vsel %vm348_vm5, %v5910_v19, 0.0 }
 0x454   :  { %v4906_v39 = vpop.eup %4905  ;;  %1155 = vadd.xlane.f32.xlu0 %v1154_v41  ;;  %4907 = vpow2.f32 %v1086_v62 }
 0x455   :  { %v1195_v32 = vmul.f32 %v4906_v39, %v5817_v61  ;;  %v1132_v29 = vpop.xlane.xlu0 %1131 }
 0x456   :  { %4909 = vrcp.f32 %v1132_v29  ;;  %v5916_v44 = vpop.f32.mrf.mxu0 }
 0x457   :  { %v1219_v46 = vpack.c.bf16 %v1195_v32, %v1195_v32  ;;  %v1138_v9 = vpop.xlane.xlu2 %1137 }
 0x458   :  { %4911 = vrcp.f32 %v1138_v9 }
 0x459   :  { %4517 = vmatmul.msk.bf16.vlgmr.msra.gmra.mxu2 %vm348_vm5, %v1219_v46 }
 0x45a   :  { %1647 = vmatpush.bf16.msra.mxu2 %v1638_v33  ;;  %v5920_v43 = vpop.eup %4907 }
 0x45b   :  { %v1157_v63 = vsel %vm348_vm5, %v5920_v43, 0.0 }
 0x45c   :  { %v4910_v15 = vpop.eup %4909 }
 0x45d   :  { %v1198_v54 = vmul.f32 %v4910_v15, %v5831_v24 }
 0x45e   :  { %v1612_v0 = vpop.permute.xlu1 %1611  ;;  %v4912_v61 = vpop.eup %4911 }
 0x45f   :  { %v1617_v30 = vsel %vm1237_vm6, %v1612_v0, 0  ;;  %v1357_v7 = vpop.f32.mrf.mxu0  ;;  %v1222_v27 = vpack.c.bf16 %v1198_v54, %v1198_v54  ;;  %v1200_v26 = vmul.f32 %v4912_v61, %v5833_v17  ;;  %v1144_v56 = vpop.xlane.xlu2 %1143 }
 0x460   :  { %1626 = vmatpush.bf16.msra.mxu1 %v1617_v30  ;;  %4913 = vrcp.f32 %v1144_v56 }
 0x461   :  { %1158 = vadd.xlane.f32.xlu1 %v1157_v63  ;;  %v1224_v34 = vpack.c.bf16 %v1200_v26, %v1200_v26  ;;  %4520 = vmatmul.msk.bf16.vlgmr.msrb.gmra.mxu1 %vm348_vm5, %v1222_v27 }
 0x463   :  { %4522 = vmatmul.msk.bf16.vlgmr.msra.gmra.mxu3 %vm348_vm5, %v1224_v34 }
 0x464   :  { %v5928_v10 = vpop.f32.mrf.mxu3 }
 0x466   :  { %v1654_v24 = vpop.permute.xlu1 %1653  ;;  %v1141_v16 = vpop.xlane.xlu0 %1140 }
 0x467   :  { %v1659_v25 = vsel %vm1237_vm6, %v1654_v24, 0  ;;  %v4914_v17 = vpop.eup %4913 }
 0x468   :  { %1668 = vmatpush.bf16.msrb.mxu3 %v1659_v25  ;;  %1695 = vrot.lane.b32.xlu0 %v5492_v58, %s5130_s14  ;;  %v1202_v31 = vmul.f32 %v4914_v17, %v5843_v3 }
 0x46a   :  { %v1226_v23 = vpack.c.bf16 %v1202_v31, %v1202_v31 }
 0x46c   :  { %v1336_v53 = vpop.f32.mrf.mxu3 }
 0x46e   :  { %v1135_v21 = vpop.xlane.xlu0 %1134 }
 0x46f   :  { %4915 = vrcp.f32 %v1135_v21 }
 0x470   :  { %4917 = vrcp.f32 %v1141_v16 }
 0x471   :  { %4524 = vmatmul.msk.bf16.vlgmr.msra.gmra.mxu1 %vm348_vm5, %v1226_v23 }
 0x475   :  { %v4916_v11 = vpop.eup %4915 }
 0x476   :  { %v1199_v42 = vmul.f32 %v4916_v11, %v5856_v49  ;;  %v4918_v28 = vpop.eup %4917 }
 0x477   :  { %v1201_v48 = vmul.f32 %v4918_v28, %v5850_v6 }
 0x478   :  { %v1223_v8 = vpack.c.bf16 %v1199_v42, %v1199_v42 }
 0x479   :  { %v1225_v51 = vpack.c.bf16 %v1201_v48, %v1201_v48 }
 0x47a   :  { %4521 = vmatmul.msk.bf16.vlgmr.msrb.gmra.mxu2 %vm348_vm5, %v1223_v8 }
 0x47e   :  { %v1153_v35 = vpop.xlane.xlu2 %1152 }
 0x481   :  { %v1591_v58 = vpop.permute.xlu0 %1590 }
 0x482   :  { %v1596_v3 = vsel %vm1237_vm6, %v1591_v58, 0 }
 0x483   :  { %1605 = vmatpush.bf16.msra.mxu0 %v1596_v3 }
 0x486   :  { %v1717_v47 = vpop.permute.xlu2 %1716  ;;  %4523 = vmatmul.msk.bf16.vlgmr.msra.gmra.mxu0 %vm348_vm5, %v1225_v51 }
 0x487   :  { %v1722_v38 = vsel %vm1237_vm6, %v1717_v47, 0 }
 0x488   :  { %1731 = vmatpush.bf16.msrb.mxu2 %v1722_v38 }
 0x491   :  { %v1147_v49 = vpop.xlane.xlu1 %1146 }
 0x492   :  { %4919 = vrcp.f32 %v1147_v49 }
 0x493   :  { %4921 = vrcp.f32 %v1153_v35 }
 0x497   :  { %v1376_v36 = vpop.f32.mrf.mxu1 }
 0x498   :  { %v4920_v55 = vpop.eup %4919 }
 0x499   :  { %v1203_v52 = vmul.f32 %v4920_v55, %v5869_v20  ;;  %v4922_v22 = vpop.eup %4921 }
 0x49a   :  { %v1205_v62 = vmul.f32 %v4922_v22, %v5861_v12 }
 0x49b   :  { %v1227_v50 = vpack.c.bf16 %v1203_v52, %v1203_v52 }
 0x49c   :  { %v1229_v32 = vpack.c.bf16 %v1205_v62, %v1205_v62 }
 0x49d   :  { %4525 = vmatmul.msk.bf16.vlgmr.msra.gmra.mxu2 %vm348_vm5, %v1227_v50 }
 0x49f   :  { %v1378_v6 = vpop.f32.mrf.mxu1 }
 0x4a5   :  { %v1418_v45 = vpop.f32.mrf.mxu3 }
 0x4a9   :  { %v1675_v41 = vpop.permute.xlu1 %1674 }
 0x4aa   :  { %v1680_v39 = vsel %vm1237_vm6, %v1675_v41, 0 }
 0x4ab   :  { %1689 = vmatpush.bf16.msrb.mxu0 %v1680_v39 }
 0x4ac   :  { %v1150_v29 = vpop.xlane.xlu0 %1149 }
 0x4ad   :  { %4923 = vrcp.f32 %v1150_v29  ;;  %v1420_v46 = vpop.f32.mrf.mxu3  ;;  %v202_v29 = vld [vmem:[%s7177_s4 + $0x10] sm:$0xff] }
 0x4ae   :  { %4527 = vmatmul.msk.bf16.vlgmr.msrb.gmra.mxu0 %vm348_vm5, %v1229_v32  ;;  %v203_v46 = vld [vmem:[%s7177_s4 + $0x18] sm:$0xff] }
 0x4b3   :  { %v4924_v20 = vpop.eup %4923 }
 0x4b4   :  { %v1204_v9 = vmul.f32 %v4924_v20, %v5883_v60  ;;  %v1833_v20 = vpack.c.bf16 %v203_v46, %v202_v29 }
 0x4b6   :  { %v1228_v33 = vpack.c.bf16 %v1204_v9, %v1204_v9  ;;  %1850 = vmatpush.bf16.msra.mxu3 %v1833_v20 }
 0x4b7   :  { %v1439_v15 = vpop.f32.mrf.mxu0 }
 0x4b8   :  { %4526 = vmatmul.msk.bf16.vlgmr.msrb.gmra.mxu3 %vm348_vm5, %v1228_v33  ;;  %v4695_v16 = vpack.i.bf16 %v1439_v15, %v1418_v45 }
 0x4bf   :  { %v1441_v54 = vpop.f32.mrf.mxu0 }
 0x4c7   :  { %v1156_v30 = vpop.xlane.xlu0 %1155 }
 0x4c8   :  { %4925 = vrcp.f32 %v1156_v30 }
 0x4cc   :  { %v1397_v0 = vpop.f32.mrf.mxu2 }
 0x4cd   :  { %v4680_v12 = vpack.i.bf16 %v1397_v0, %v1376_v36  ;;  %v1502_v61 = vpop.f32.mrf.mxu3 }
 0x4ce   :  { %v1460_v7 = vpop.f32.mrf.mxu1  ;;  %v4926_v34 = vpop.eup %4925 }
 0x4cf   :  { %4681 = vrot.lane.b32.xlu1 %v4680_v12, %s5131_s15  ;;  %v1523_v27 = vpop.f32.mrf.mxu0  ;;  %v1206_v17 = vmul.f32 %v4926_v34, %v5910_v19  ;;  %v200_v12 = vld [vmem:[%s7177_s4] sm:$0xff] }
 0x4d0   :  { %v4685_v26 = vpack.i.bf16 %v1523_v27, %v1502_v61  ;;  %v201_v61 = vld [vmem:[%s7177_s4 + $0x8] sm:$0xff] }
 0x4d1   :  { %v1230_v42 = vpack.c.bf16 %v1206_v17, %v1206_v17  ;;  %v1832_v30 = vpack.c.bf16 %v201_v61, %v200_v12 }
 0x4d2   :  { %4686 = vrot.lane.b32.xlu2 %v4685_v26, %s5132_s16 }
 0x4d3   :  { %1851 = vmatpush.bf16.msra.mxu3 %v1832_v30 }
 0x4d4   :  { %v1399_v60 = vpop.f32.mrf.mxu2  ;;  %v1159_v56 = vpop.xlane.xlu1 %1158 }
 0x4d5   :  { %4927 = vrcp.f32 %v1159_v56  ;;  %v1504_v63 = vpop.f32.mrf.mxu3 }
 0x4d6   :  { %v1462_v24 = vpop.f32.mrf.mxu1 }
 0x4d7   :  { %v1525_v25 = vpop.f32.mrf.mxu0 }
 0x4da   :  { %4696 = vrot.lane.b32.xlu2 %v4695_v16, %s5131_s15  ;;  %v1696_v53 = vpop.permute.xlu0 %1695 }
 0x4db   :  { %v4928_v31 = vpop.eup %4927  ;;  %v1701_v23 = vsel %vm1237_vm6, %v1696_v53, 0 }
 0x4dc   :  { %v1207_v21 = vmul.f32 %v4928_v31, %v5920_v43  ;;  %v1481_v11 = vpop.f32.mrf.mxu2  ;;  %1710 = vmatpush.bf16.msrb.mxu1 %v1701_v23 }
 0x4dd   :  { %v4710_v28 = vpack.i.bf16 %v1481_v11, %v1460_v7 }
 0x4de   :  { %v1231_v8 = vpack.c.bf16 %v1207_v21, %v1207_v21  ;;  %v1544_v35 = vpop.f32.mrf.mxu1 }
 0x4df   :  { %4528 = vmatmul.msk.bf16.vlgmr.msrb.gmra.mxu1 %vm348_vm5, %v1230_v42 }
 0x4e0   :  { %4529 = vmatmul.msk.bf16.vlgmr.msrb.gmra.mxu2 %vm348_vm5, %v1231_v8 }
 0x4e4   :  { %v1483_v48 = vpop.f32.mrf.mxu2 }
 0x4e6   :  { %v1546_v19 = vpop.f32.mrf.mxu1  ;;  %v1586_v58 = vpop.f32.mrf.mxu3 }
 0x4ee   :  { %v1628_v3 = vpop.f32.mrf.mxu1  ;;  %v1588_v51 = vpop.f32.mrf.mxu3 }
 0x4f6   :  { %v1630_v47 = vpop.f32.mrf.mxu1 }
 0x4fd   :  { %v1565_v38 = vpop.f32.mrf.mxu2 }
 0x4fe   :  { %v4700_v22 = vpack.i.bf16 %v1565_v38, %v1544_v35 }
 0x503   :  { %v1607_v43 = vpop.f32.mrf.mxu0 }
 0x504   :  { %v4715_v49 = vpack.i.bf16 %v1607_v43, %v1586_v58 }
 0x505   :  { %v1567_v55 = vpop.f32.mrf.mxu2 }
 0x506   :  { %4716 = vrot.lane.b32.xlu1 %v4715_v49, %s5132_s16 }
 0x50b   :  { %v1609_v36 = vpop.f32.mrf.mxu0 }
 0x520   :  { %v1649_v52 = vpop.f32.mrf.mxu2 }
 0x521   :  { %v4690_v50 = vpack.i.bf16 %v1649_v52, %v1628_v3 }
 0x523   :  { %4691 = vrot.lane.b32.xlu0 %v4690_v50, %s5133_s17 }
 0x528   :  { %v1651_v6 = vpop.f32.mrf.mxu2 }
 0x52b   :  { %4701 = vrot.lane.b32.xlu0 %v4700_v22, %s5132_s16  ;;  %v1691_v45 = vpop.f32.mrf.mxu0 }
 0x52c   :  { %v4687_v27 = vpop.permute.xlu2 %4686 }
 0x52d   :  { %v4689_v34 = vunpack.i.h.bf16 %v4687_v27  ;;  %v4688_v24 = vunpack.i.l.bf16 %v4687_v27 }
 0x533   :  { %4711 = vrot.lane.b32.xlu0 %v4710_v28, %s5131_s15  ;;  %v1693_v62 = vpop.f32.mrf.mxu0 }
 0x534   :  { %v4697_v11 = vpop.permute.xlu2 %4696 }
 0x535   :  { %v4699_v42 = vunpack.i.h.bf16 %v4697_v11  ;;  %v4698_v8 = vunpack.i.l.bf16 %v4697_v11 }
 0x537   :  { %v1812_v19 = vsel %vm348_vm5, %v5891_v59, %v4699_v42  ;;  %v1811_v58 = vsel %vm348_vm5, %v5899_v37, %v4698_v8 }
 0x53b   :  { %v1670_v41 = vpop.f32.mrf.mxu3 }
 0x53c   :  { %v4705_v39 = vpack.i.bf16 %v1691_v45, %v1670_v41 }
 0x53e   :  { %4706 = vrot.lane.b32.xlu2 %v4705_v39, %s5133_s17 }
 0x541   :  { %v4682_v7 = vpop.permute.xlu1 %4681 }
 0x542   :  { %v4684_v26 = vunpack.i.h.bf16 %v4682_v7  ;;  %v4683_v60 = vunpack.i.l.bf16 %v4682_v7 }
 0x543   :  { %v1672_v32 = vpop.f32.mrf.mxu3 }
 0x544   :  { %v1810_v56 = vsel %vm348_vm5, %v5893_v40, %v4684_v26  ;;  %v1809_v63 = vsel %vm348_vm5, %v5895_v57, %v4683_v60 }
 0x545   :  { %v1816_v31 = vsel %vm1815_vm7, %v1809_v63, %v4688_v24  ;;  %v1817_v53 = vsel %vm1815_vm7, %v1810_v56, %v4689_v34 }
 0x55c   :  { %v1712_v9 = vpop.f32.mrf.mxu1 }
 0x563   :  { %v1733_v33 = vpop.f32.mrf.mxu2 }
 0x564   :  { %v4720_v15 = vpack.i.bf16 %v1733_v33, %v1712_v9  ;;  %v1714_v54 = vpop.f32.mrf.mxu1 }
 0x566   :  { %4721 = vrot.lane.b32.xlu2 %v4720_v15, %s5133_s17 }
 0x56b   :  { %v1735_v0 = vpop.f32.mrf.mxu2 }
 0x578   :  { %v4717_v59 = vpop.permute.xlu1 %4716 }
 0x579   :  { %v4719_v22 = vunpack.i.h.bf16 %v4717_v59  ;;  %v4718_v45 = vunpack.i.l.bf16 %v4717_v59 }
 0x595   :  { %v4692_v25 = vpop.permute.xlu0 %4691 }
 0x596   :  { %v4694_v16 = vunpack.i.h.bf16 %v4692_v25  ;;  %v4693_v17 = vunpack.i.l.bf16 %v4692_v25 }
 0x598   :  { %v1823_v21 = vsel %vm1822_vm8, %v1816_v31, %v4693_v17  ;;  %v1824_v23 = vsel %vm1822_vm8, %v1817_v53, %v4694_v16  ;;  %v4707_v48 = vpop.permute.xlu2 %4706 }
 0x599   :  { %v1829_v40 = vpack.c.bf16 %v1824_v23, %v1823_v21  ;;  %v4709_v47 = vunpack.i.h.bf16 %v4707_v48  ;;  %v4708_v38 = vunpack.i.l.bf16 %v4707_v48 }
 0x59b   :  { %4530 = vmatmul.msk.bf16.vlgmr.msra.gmra.mxu3 %vm41_vm0, %v1829_v40 }
 0x59d   :  { %v4702_v57 = vpop.permute.xlu0 %4701 }
 0x59e   :  { %v4704_v28 = vunpack.i.h.bf16 %v4702_v57  ;;  %v4703_v35 = vunpack.i.l.bf16 %v4702_v57 }
 0x5a0   :  { %v1819_v3 = vsel %vm1815_vm7, %v1812_v19, %v4704_v28  ;;  %v1818_v51 = vsel %vm1815_vm7, %v1811_v58, %v4703_v35 }
 0x5a1   :  { %v1825_v43 = vsel %vm1822_vm8, %v1818_v51, %v4708_v38  ;;  %v1826_v49 = vsel %vm1822_vm8, %v1819_v3, %v4709_v47 }
 0x5a2   :  { %v1830_v55 = vpack.c.bf16 %v1826_v49, %v1825_v43 }
 0x5a5   :  { %v4712_v36 = vpop.permute.xlu0 %4711 }
 0x5a6   :  { %v4714_v52 = vunpack.i.h.bf16 %v4712_v36  ;;  %v4713_v50 = vunpack.i.l.bf16 %v4712_v36 }
 0x5a8   :  { %v1814_v37 = vsel %vm348_vm5, %v5916_v44, %v4714_v52  ;;  %v1813_v6 = vsel %vm348_vm5, %v5928_v10, %v4713_v50  ;;  %v6005_v44 = vld [vmem:[%s7178_s5] sm:$0x3f] }
 0x5a9   :  { %v1820_v32 = vsel %vm1815_vm7, %v1813_v6, %v4718_v45  ;;  %v1821_v29 = vsel %vm1815_vm7, %v1814_v37, %v4719_v22  ;;  %v1834_v10 = vperm.slane %v6005_v44, 0 }
 0x5ab   :  { %4531 = vmatmul.msk.bf16.gmra.mxu3 %vm41_vm0, %v1830_v55 }
 0x5c0   :  { %v4722_v62 = vpop.permute.xlu2 %4721 }
 0x5c1   :  { %v4724_v41 = vunpack.i.h.bf16 %v4722_v62  ;;  %v4723_v39 = vunpack.i.l.bf16 %v4722_v62 }
 0x5c3   :  { %v1827_v46 = vsel %vm1822_vm8, %v1820_v32, %v4723_v39  ;;  %v1828_v20 = vsel %vm1822_vm8, %v1821_v29, %v4724_v41  ;;  %v206_v41 = vld [vmem:[%s7179_s6 + $0x10] sm:$0xff]  ;;  %v207_v39 = vld [vmem:[%s7179_s6 + $0x18] sm:$0xff] }
 0x5c4   :  { %v1831_v9 = vpack.c.bf16 %v1828_v20, %v1827_v46  ;;  %v2024_v29 = vpack.c.bf16 %v207_v39, %v206_v41 }
 0x5c6   :  { %4532 = vmatmul.msk.bf16.gmra.mxu3 %vm41_vm0, %v1831_v9  ;;  %2043 = vmatpush.bf16.msra.mxu0 %v2024_v29  ;;  %v204_v9 = vld [vmem:[%s7179_s6] sm:$0xff] }
 0x61e   :  { %v1853_v33 = vpop.f32.mrf.mxu3 }
 0x61f   :  { %v1854_v15 = vadd.f32 %v1853_v33, %v1834_v10 }
 0x621   :  { %v1868_v54 = vadd.f32 %v1854_v15, %v5300_v4 }
 0x623   :  { %v1874_v0 = vsel %vm41_vm0, %v1868_v54, 0.0 }
 0x624   :  { %1875 = vadd.xlane.f32.xlu0 %v1874_v0 }
 0x626   :  { %v1855_v12 = vpop.f32.mrf.mxu3 }
 0x627   :  { %v1856_v61 = vadd.f32 %v1855_v12, %v1834_v10 }
 0x629   :  { %v1869_v30 = vadd.f32 %v1856_v61, %v5302_v5 }
 0x62b   :  { %v1877_v7 = vsel %vm41_vm0, %v1869_v30, 0.0 }
 0x62c   :  { %1878 = vadd.xlane.f32.xlu1 %v1877_v7 }
 0x62e   :  { %v1858_v27 = vpop.f32.mrf.mxu3 }
 0x62f   :  { %v1859_v26 = vadd.f32 %v1858_v27, %v1834_v10 }
 0x631   :  { %v1870_v60 = vadd.f32 %v1859_v26, %v5295_v1 }
 0x633   :  { %v1880_v56 = vsel %vm41_vm0, %v1870_v60, 0.0 }
 0x634   :  { %1881 = vadd.xlane.f32.xlu2 %v1880_v56 }
 0x636   :  { %v1860_v63 = vpop.f32.mrf.mxu3 }
 0x637   :  { %v1861_v34 = vadd.f32 %v1860_v63, %v1834_v10 }
 0x639   :  { %v1871_v4 = vadd.f32 %v1861_v34, %v5297_v2 }
 0x63b   :  { %v1883_v24 = vsel %vm41_vm0, %v1871_v4, 0.0 }
 0x63c   :  { %1884 = vadd.xlane.f32.xlu0 %v1883_v24 }
 0x649   :  { %v1863_v25 = vpop.f32.mrf.mxu3 }
 0x64a   :  { %v1864_v16 = vadd.f32 %v1863_v25, %v1834_v10 }
 0x64c   :  { %v1872_v5 = vadd.f32 %v1864_v16, %v5313_v13 }
 0x64e   :  { %v1886_v17 = vsel %vm41_vm0, %v1872_v5, 0.0 }
 0x64f   :  { %1887 = vadd.xlane.f32.xlu1 %v1886_v17 }
 0x651   :  { %v1865_v31 = vpop.f32.mrf.mxu3 }
 0x652   :  { %v1866_v53 = vadd.f32 %v1865_v31, %v1834_v10  ;;  %v205_v10 = vld [vmem:[%s7179_s6 + $0x8] sm:$0xff] }
 0x653   :  { %v2023_v33 = vpack.c.bf16 %v205_v10, %v204_v9 }
 0x654   :  { %v1873_v1 = vadd.f32 %v1866_v53, %v5315_v14 }
 0x655   :  { %2044 = vmatpush.bf16.msra.mxu0 %v2023_v33 }
 0x656   :  { %v1889_v21 = vsel %vm41_vm0, %v1873_v1, 0.0 }
 0x657   :  { %1890 = vadd.xlane.f32.xlu2 %v1889_v21 }
 0x697   :  { %v1876_v23 = vpop.xlane.xlu0 %1875 }
 0x698   :  { %v1892_v2 = vmul.f32 %v1876_v23, %v5210_v18 }
 0x69a   :  { %v6021_v11 = vsub.f32 %v1868_v54, %v1892_v2 }
 0x69c   :  { %v1904_v40 = vmul.f32 %v6021_v11, %v6021_v11 }
 0x69e   :  { %v1910_v13 = vsel %vm41_vm0, %v1904_v40, 0.0 }
 0x69f   :  { %v1879_v57 = vpop.xlane.xlu1 %1878  ;;  %1911 = vadd.xlane.f32.xlu0 %v1910_v13 }
 0x6a0   :  { %v1893_v42 = vmul.f32 %v1879_v57, %v5210_v18 }
 0x6a2   :  { %v6027_v8 = vsub.f32 %v1869_v30, %v1893_v42  ;;  %v6077_v42 = vperm.slane %v6005_v44, 2 }
 0x6a4   :  { %v1905_v14 = vmul.f32 %v6027_v8, %v6027_v8 }
 0x6a6   :  { %v1913_v28 = vsel %vm41_vm0, %v1905_v14, 0.0 }
 0x6a7   :  { %v1882_v35 = vpop.xlane.xlu2 %1881  ;;  %1914 = vadd.xlane.f32.xlu1 %v1913_v28 }
 0x6a8   :  { %v1894_v48 = vmul.f32 %v1882_v35, %v5210_v18 }
 0x6aa   :  { %v6033_v19 = vsub.f32 %v1870_v60, %v1894_v48 }
 0x6ac   :  { %v1906_v58 = vmul.f32 %v6033_v19, %v6033_v19 }
 0x6ae   :  { %v1916_v3 = vsel %vm41_vm0, %v1906_v58, 0.0 }
 0x6af   :  { %1917 = vadd.xlane.f32.xlu2 %v1916_v3  ;;  %v1885_v51 = vpop.xlane.xlu0 %1884 }
 0x6b0   :  { %v1895_v47 = vmul.f32 %v1885_v51, %v5210_v18 }
 0x6b2   :  { %v6039_v38 = vsub.f32 %v1871_v4, %v1895_v47 }
 0x6b4   :  { %v1907_v43 = vmul.f32 %v6039_v38, %v6039_v38 }
 0x6b6   :  { %v1919_v49 = vsel %vm41_vm0, %v1907_v43, 0.0 }
 0x6b7   :  { %1920 = vadd.xlane.f32.xlu0 %v1919_v49 }
 0x6c2   :  { %v1888_v55 = vpop.xlane.xlu1 %1887 }
 0x6c3   :  { %v1896_v36 = vmul.f32 %v1888_v55, %v5210_v18 }
 0x6c5   :  { %v6045_v52 = vsub.f32 %v1872_v5, %v1896_v36 }
 0x6c7   :  { %v1908_v50 = vmul.f32 %v6045_v52, %v6045_v52 }
 0x6c9   :  { %v1922_v59 = vsel %vm41_vm0, %v1908_v50, 0.0 }
 0x6ca   :  { %v1891_v37 = vpop.xlane.xlu2 %1890  ;;  %1923 = vadd.xlane.f32.xlu1 %v1922_v59 }
 0x6cb   :  { %v1897_v6 = vmul.f32 %v1891_v37, %v5210_v18 }
 0x6cd   :  { %v6051_v22 = vsub.f32 %v1873_v1, %v1897_v6  ;;  %v6073_v1 = vperm.slane %v6005_v44, 1 }
 0x6cf   :  { %v1909_v45 = vmul.f32 %v6051_v22, %v6051_v22 }
 0x6d1   :  { %v1925_v62 = vsel %vm41_vm0, %v1909_v45, 0.0 }
 0x6d2   :  { %1926 = vadd.xlane.f32.xlu2 %v1925_v62 }
 0x712   :  { %v1912_v32 = vpop.xlane.xlu0 %1911 }
 0x713   :  { %v1928_v46 = vmul.f32 %v1912_v32, %v5210_v18 }
 0x715   :  { %v1934_v20 = vadd.f32 1e-12, %v1928_v46 }
 0x717   :  { %4929 = vrsqrt.f32 %v1934_v20  ;;  %vm1946_vm10 = vweird.f32 %v1934_v20 }
 0x71a   :  { %v1915_v15 = vpop.xlane.xlu1 %1914 }
 0x71b   :  { %v1929_v54 = vmul.f32 %v1915_v15, %v5210_v18 }
 0x71d   :  { %v4930_v0 = vpop.eup %4929  ;;  %v1935_v12 = vadd.f32 1e-12, %v1929_v54 }
 0x71e   :  { %v1941_v61 = vmul.f32 %v4930_v0, %v1934_v20  ;;  %vm1947_vm9 = vweird.f32 %v4930_v0 }
 0x71f   :  { %4931 = vrsqrt.f32 %v1935_v12  ;;  %vm1948_vm11 = vmor %vm1946_vm10, %vm1947_vm9  ;;  %vm1956_vm13 = vweird.f32 %v1935_v12 }
 0x720   :  { %v1942_v30 = vmul.f32 %v4930_v0, %v1941_v61 }
 0x722   :  { %v1943_v7 = vmul.f32 0.5, %v1942_v30  ;;  %v1918_v27 = vpop.xlane.xlu2 %1917 }
 0x723   :  { %v1930_v26 = vmul.f32 %v1918_v27, %v5210_v18 }
 0x724   :  { %v1944_v60 = vsub.f32 1.5, %v1943_v7 }
 0x725   :  { %v4932_v56 = vpop.eup %4931  ;;  %v1936_v63 = vadd.f32 1e-12, %v1930_v26 }
 0x726   :  { %v1945_v34 = vmul.f32 %v4930_v0, %v1944_v60  ;;  %v1951_v4 = vmul.f32 %v4932_v56, %v1935_v12  ;;  %vm1957_vm12 = vweird.f32 %v4932_v56 }
 0x727   :  { %4933 = vrsqrt.f32 %v1936_v63  ;;  %vm1958_vm14 = vmor %vm1956_vm13, %vm1957_vm12  ;;  %vm1966_vm1 = vweird.f32 %v1936_v63 }
 0x728   :  { %v1952_v24 = vmul.f32 %v4932_v56, %v1951_v4  ;;  %v1949_v25 = vsel %vm1948_vm11, %v4930_v0, %v1945_v34 }
 0x729   :  { %v2000_v21 = vmul.f32 %v1949_v25, %v6021_v11 }
 0x72a   :  { %v1953_v16 = vmul.f32 0.5, %v1952_v24  ;;  %v1921_v5 = vpop.xlane.xlu0 %1920 }
 0x72b   :  { %v1931_v17 = vmul.f32 %v1921_v5, %v5210_v18  ;;  %v2007_v14 = vmul.f32 %v6073_v1, %v2000_v21  ;;  %v214_v21 = vld [vmem:[%s7181_s8 + $0x28] sm:$0xff] }
 0x72c   :  { %v1954_v31 = vsub.f32 1.5, %v1953_v16 }
 0x72d   :  { %v4934_v53 = vpop.eup %4933  ;;  %v1937_v23 = vadd.f32 1e-12, %v1931_v17  ;;  %v6083_v3 = vadd.f32 %v6077_v42, %v2007_v14  ;;  %v210_v14 = vld [vmem:[%s7181_s8 + $0x8] sm:$0xff] }
 0x72e   :  { %v1955_v2 = vmul.f32 %v4932_v56, %v1954_v31  ;;  %v1961_v40 = vmul.f32 %v4934_v53, %v1936_v63  ;;  %vm1967_vm15 = vweird.f32 %v4934_v53 }
 0x72f   :  { %4935 = vrsqrt.f32 %v1937_v23  ;;  %vm1968_vm2 = vmor %vm1966_vm1, %vm1967_vm15  ;;  %vm1976_vm4 = vweird.f32 %v1937_v23  ;;  %vm2123_vm1 = vcmask 523264  }
 0x730   :  { %v1959_v13 = vsel %vm1958_vm14, %v4932_v56, %v1955_v2  ;;  %v1962_v57 = vmul.f32 %v4934_v53, %v1961_v40  ;;  %v211_v2 = vld [vmem:[%s7181_s8 + $0x10] sm:$0xff]  ;;  %v212_v40 = vld [vmem:[%s7181_s8 + $0x18] sm:$0xff] }
 0x731   :  { %v2001_v28 = vmul.f32 %v1959_v13, %v6027_v8  ;;  %v2119_v13 = vpack.c.bf16 %v212_v40, %v211_v2 }
 0x732   :  { %v1963_v35 = vmul.f32 0.5, %v1962_v57  ;;  %v6140_v57 = vld [vmem:[%s7180_s7] ss:$0 sm:$0xff] }
 0x733   :  { %v2008_v48 = vmul.f32 %v6073_v1, %v2001_v28 }
 0x734   :  { %v1964_v58 = vsub.f32 1.5, %v1963_v35 }
 0x735   :  { %v4936_v11 = vpop.eup %4935  ;;  %v6086_v51 = vadd.f32 %v6077_v42, %v2008_v48 }
 0x736   :  { %v1965_v47 = vmul.f32 %v4934_v53, %v1964_v58  ;;  %v1971_v43 = vmul.f32 %v4936_v11, %v1937_v23  ;;  %vm1977_vm3 = vweird.f32 %v4936_v11 }
 0x737   :  { %v2020_v49 = vpack.c.bf16 %v6086_v51, %v6083_v3  ;;  %vm1978_vm9 = vmor %vm1976_vm4, %vm1977_vm3 }
 0x738   :  { %v1972_v55 = vmul.f32 %v4936_v11, %v1971_v43  ;;  %v1969_v8 = vsel %vm1968_vm2, %v4934_v53, %v1965_v47 }
 0x739   :  { %4533 = vmatmul.msk.bf16.vlgmr.msra.gmra.mxu0 %vm41_vm0, %v2020_v49  ;;  %v2002_v59 = vmul.f32 %v1969_v8, %v6033_v19 }
 0x73a   :  { %v1973_v36 = vmul.f32 0.5, %v1972_v55 }
 0x73b   :  { %v2009_v32 = vmul.f32 %v6073_v1, %v2002_v59 }
 0x73c   :  { %v1974_v50 = vsub.f32 1.5, %v1973_v36 }
 0x73d   :  { %v1924_v37 = vpop.xlane.xlu1 %1923  ;;  %v6097_v20 = vadd.f32 %v6077_v42, %v2009_v32 }
 0x73e   :  { %v1975_v6 = vmul.f32 %v4936_v11, %v1974_v50  ;;  %v1932_v45 = vmul.f32 %v1924_v37, %v5210_v18 }
 0x740   :  { %v1979_v62 = vsel %vm1978_vm9, %v4936_v11, %v1975_v6  ;;  %v1938_v41 = vadd.f32 1e-12, %v1932_v45 }
 0x741   :  { %v2003_v39 = vmul.f32 %v1979_v62, %v6039_v38 }
 0x742   :  { %4937 = vrsqrt.f32 %v1938_v41  ;;  %vm1986_vm11 = vweird.f32 %v1938_v41 }
 0x743   :  { %v2010_v29 = vmul.f32 %v6073_v1, %v2003_v39 }
 0x745   :  { %v1927_v46 = vpop.xlane.xlu2 %1926  ;;  %v6100_v19 = vadd.f32 %v6077_v42, %v2010_v29 }
 0x746   :  { %v1933_v9 = vmul.f32 %v1927_v46, %v5210_v18 }
 0x747   :  { %v2021_v10 = vpack.c.bf16 %v6100_v19, %v6097_v20 }
 0x748   :  { %v4938_v33 = vpop.eup %4937  ;;  %v1939_v15 = vadd.f32 1e-12, %v1933_v9 }
 0x749   :  { %v1981_v38 = vmul.f32 %v4938_v33, %v1938_v41  ;;  %4534 = vmatmul.msk.bf16.gmra.mxu0 %vm41_vm0, %v2021_v10  ;;  %vm1987_vm10 = vweird.f32 %v4938_v33 }
 0x74a   :  { %4939 = vrsqrt.f32 %v1939_v15  ;;  %vm1988_vm12 = vmor %vm1986_vm11, %vm1987_vm10  ;;  %vm1996_vm14 = vweird.f32 %v1939_v15 }
 0x74b   :  { %v1982_v54 = vmul.f32 %v4938_v33, %v1981_v38 }
 0x74d   :  { %v1983_v0 = vmul.f32 0.5, %v1982_v54 }
 0x74f   :  { %v1984_v12 = vsub.f32 1.5, %v1983_v0 }
 0x750   :  { %v4940_v61 = vpop.eup %4939 }
 0x751   :  { %v1985_v30 = vmul.f32 %v4938_v33, %v1984_v12  ;;  %v1991_v7 = vmul.f32 %v4940_v61, %v1939_v15  ;;  %vm1997_vm13 = vweird.f32 %v4940_v61 }
 0x752   :  { %vm1998_vm15 = vmor %vm1996_vm14, %vm1997_vm13 }
 0x753   :  { %v1992_v27 = vmul.f32 %v4940_v61, %v1991_v7  ;;  %v1989_v26 = vsel %vm1988_vm12, %v4938_v33, %v1985_v30 }
 0x754   :  { %v2004_v63 = vmul.f32 %v1989_v26, %v6045_v52  ;;  %v215_v52 = vld [vmem:[%s7181_s8 + $0x30] sm:$0xff] }
 0x755   :  { %v1993_v60 = vmul.f32 0.5, %v1992_v27 }
 0x756   :  { %v2011_v25 = vmul.f32 %v6073_v1, %v2004_v63 }
 0x757   :  { %v1994_v56 = vsub.f32 1.5, %v1993_v60 }
 0x758   :  { %v6111_v5 = vadd.f32 %v6077_v42, %v2011_v25 }
 0x759   :  { %v1995_v34 = vmul.f32 %v4940_v61, %v1994_v56 }
 0x75b   :  { %v1999_v4 = vsel %vm1998_vm15, %v4940_v61, %v1995_v34 }
 0x75c   :  { %v2005_v24 = vmul.f32 %v1999_v4, %v6051_v22  ;;  %v216_v22 = vld [vmem:[%s7181_s8 + $0x38] sm:$0xff] }
 0x75d   :  { %v2121_v53 = vpack.c.bf16 %v216_v22, %v215_v52 }
 0x75e   :  { %v2012_v16 = vmul.f32 %v6073_v1, %v2005_v24  ;;  %v213_v1 = vld [vmem:[%s7181_s8 + $0x20] sm:$0xff] }
 0x75f   :  { %2137 = vmatpush.bf16.msra.mxu1 %v2121_v53  ;;  %v2120_v23 = vpack.c.bf16 %v214_v21, %v213_v1 }
 0x760   :  { %v6114_v17 = vadd.f32 %v6077_v42, %v2012_v16  ;;  %v209_v42 = vld [vmem:[%s7181_s8] sm:$0xff] }
 0x761   :  { %v2118_v28 = vpack.c.bf16 %v210_v14, %v209_v42 }
 0x762   :  { %v2022_v31 = vpack.c.bf16 %v6114_v17, %v6111_v5 }
 0x763   :  { %2138 = vmatpush.bf16.msra.mxu1 %v2120_v23 }
 0x764   :  { %4535 = vmatmul.msk.bf16.gmra.mxu0 %vm41_vm0, %v2022_v31 }
 0x767   :  { %2139 = vmatpush.bf16.msra.mxu1 %v2119_v13 }
 0x76b   :  { %2140 = vmatpush.bf16.msra.mxu1 %v2118_v28 }
 0x7b6   :  { %v2046_v35 = vpop.f32.mrf.mxu0 }
 0x7b7   :  { %v2047_v48 = vadd.f32 %v6140_v57, %v2046_v35 }
 0x7b9   :  { %v2067_v58 = vmul.f32 0.044715, %v2047_v48  ;;  %v2061_v54 = vmul.f32 0.5, %v2047_v48 }
 0x7bb   :  { %v2073_v11 = vmul.f32 %v2067_v58, %v2047_v48 }
 0x7bd   :  { %v2079_v47 = vmul.f32 %v2073_v11, %v2047_v48 }
 0x7be   :  { %v2048_v43 = vpop.f32.mrf.mxu0 }
 0x7bf   :  { %v2085_v49 = vadd.f32 %v2079_v47, %v2047_v48  ;;  %v2049_v55 = vadd.f32 %v6140_v57, %v2048_v43 }
 0x7c1   :  { %v2068_v8 = vmul.f32 0.044715, %v2049_v55  ;;  %v2091_v36 = vmul.f32 0.7978846, %v2085_v49  ;;  %v2062_v0 = vmul.f32 0.5, %v2049_v55 }
 0x7c3   :  { %v2074_v50 = vmul.f32 %v2068_v8, %v2049_v55  ;;  %4941 = vtanh.f32 %v2091_v36 }
 0x7c5   :  { %v2080_v59 = vmul.f32 %v2074_v50, %v2049_v55 }
 0x7c6   :  { %v2051_v37 = vpop.f32.mrf.mxu0 }
 0x7c7   :  { %v2086_v6 = vadd.f32 %v2080_v59, %v2049_v55  ;;  %v2052_v45 = vadd.f32 %v6140_v57, %v2051_v37 }
 0x7c9   :  { %v2092_v62 = vmul.f32 0.7978846, %v2086_v6  ;;  %v2069_v41 = vmul.f32 0.044715, %v2052_v45  ;;  %v4942_v32 = vpop.eup %4941  ;;  %v2063_v31 = vmul.f32 0.5, %v2052_v45 }
 0x7ca   :  { %v2103_v33 = vadd.f32 1.0, %v4942_v32 }
 0x7cb   :  { %4943 = vtanh.f32 %v2092_v62  ;;  %v2075_v39 = vmul.f32 %v2069_v41, %v2052_v45 }
 0x7cc   :  { %v2109_v7 = vmul.f32 %v2103_v33, %v2061_v54 }
 0x7cd   :  { %v2081_v29 = vmul.f32 %v2075_v39, %v2052_v45 }
 0x7ce   :  { %v2053_v46 = vpop.f32.mrf.mxu0 }
 0x7cf   :  { %v2087_v9 = vadd.f32 %v2081_v29, %v2052_v45  ;;  %v2054_v10 = vadd.f32 %v6140_v57, %v2053_v46 }
 0x7d1   :  { %v4944_v15 = vpop.eup %4943  ;;  %v2070_v38 = vmul.f32 0.044715, %v2054_v10  ;;  %v2093_v61 = vmul.f32 0.7978846, %v2087_v9  ;;  %v2064_v52 = vmul.f32 0.5, %v2054_v10 }
 0x7d2   :  { %v2104_v12 = vadd.f32 1.0, %v4944_v15 }
 0x7d3   :  { %v2076_v30 = vmul.f32 %v2070_v38, %v2054_v10  ;;  %4945 = vtanh.f32 %v2093_v61 }
 0x7d4   :  { %v2110_v27 = vmul.f32 %v2104_v12, %v2062_v0 }
 0x7d5   :  { %v2082_v26 = vmul.f32 %v2076_v30, %v2054_v10 }
 0x7d6   :  { %v2115_v60 = vpack.c.bf16 %v2110_v27, %v2109_v7 }
 0x7d7   :  { %v2088_v56 = vadd.f32 %v2082_v26, %v2054_v10 }
 0x7d8   :  { %4536 = vmatmul.msk.bf16.vlgmr.msra.gmra.mxu1 %vm2123_vm1, %v2115_v60 }
 0x7d9   :  { %v2094_v63 = vmul.f32 0.7978846, %v2088_v56  ;;  %v4946_v34 = vpop.eup %4945 }
 0x7da   :  { %v2105_v4 = vadd.f32 1.0, %v4946_v34 }
 0x7db   :  { %4947 = vtanh.f32 %v2094_v63 }
 0x7dc   :  { %v2111_v1 = vmul.f32 %v2105_v4, %v2063_v31 }
 0x7e1   :  { %v4948_v24 = vpop.eup %4947  ;;  %v2056_v25 = vpop.f32.mrf.mxu0 }
 0x7e2   :  { %v2057_v16 = vadd.f32 %v6140_v57, %v2056_v25  ;;  %v2106_v22 = vadd.f32 1.0, %v4948_v24 }
 0x7e4   :  { %v2071_v53 = vmul.f32 0.044715, %v2057_v16  ;;  %v2112_v21 = vmul.f32 %v2106_v22, %v2064_v52  ;;  %v2065_v8 = vmul.f32 0.5, %v2057_v16 }
 0x7e6   :  { %v2077_v23 = vmul.f32 %v2071_v53, %v2057_v16  ;;  %v2116_v2 = vpack.c.bf16 %v2112_v21, %v2111_v1 }
 0x7e8   :  { %v2083_v40 = vmul.f32 %v2077_v23, %v2057_v16  ;;  %4537 = vmatmul.msk.bf16.gmra.mxu1 %vm2123_vm1, %v2116_v2 }
 0x7e9   :  { %v2058_v13 = vpop.f32.mrf.mxu0 }
 0x7ea   :  { %v2089_v42 = vadd.f32 %v2083_v40, %v2057_v16  ;;  %v2059_v14 = vadd.f32 %v6140_v57, %v2058_v13  ;;  %v2122_v57 = vperm.slane %v6005_v44, 3 }
 0x7ec   :  { %v2072_v28 = vmul.f32 0.044715, %v2059_v14  ;;  %v2095_v35 = vmul.f32 0.7978846, %v2089_v42  ;;  %v2066_v36 = vmul.f32 0.5, %v2059_v14 }
 0x7ee   :  { %v2078_v48 = vmul.f32 %v2072_v28, %v2059_v14  ;;  %4949 = vtanh.f32 %v2095_v35 }
 0x7f0   :  { %v2084_v58 = vmul.f32 %v2078_v48, %v2059_v14 }
 0x7f2   :  { %v2090_v11 = vadd.f32 %v2084_v58, %v2059_v14 }
 0x7f4   :  { %v2096_v47 = vmul.f32 0.7978846, %v2090_v11  ;;  %v4950_v43 = vpop.eup %4949 }
 0x7f5   :  { %v2107_v49 = vadd.f32 1.0, %v4950_v43 }
 0x7f6   :  { %4951 = vtanh.f32 %v2096_v47 }
 0x7f7   :  { %v2113_v59 = vmul.f32 %v2107_v49, %v2065_v8  ;;  %v4542_v8 = vld [vmem:[%s7175_s2 + $0x38] sm:$0xff] }
 0x7fc   :  { %v4952_v55 = vpop.eup %4951 }
 0x7fd   :  { %v2108_v50 = vadd.f32 1.0, %v4952_v55  ;;  %v4541_v55 = vld [vmem:[%s7175_s2 + $0x30] sm:$0xff] }
 0x7ff   :  { %v2114_v37 = vmul.f32 %v2108_v50, %v2066_v36  ;;  %v2343_v50 = vpack.c.bf16 %v4542_v8, %v4541_v55 }
 0x801   :  { %v2117_v6 = vpack.c.bf16 %v2114_v37, %v2113_v59  ;;  %2362 = vmatpush.bf16.msra.mxu2 %v2343_v50 }
 0x803   :  { %4538 = vmatmul.msk.bf16.gmra.mxu1 %vm2123_vm1, %v2117_v6  ;;  %v4539_v6 = vld [vmem:[%s7175_s2 + $0x20] sm:$0xff] }
 0x855   :  { %v2142_v45 = vpop.f32.mrf.mxu1 }
 0x856   :  { %v2143_v62 = vadd.f32 %v2142_v45, %v2122_v57 }
 0x858   :  { %v2157_v41 = vadd.f32 %v2143_v62, %v6083_v3 }
 0x85a   :  { %v2163_v39 = vsel %vm41_vm0, %v2157_v41, 0.0 }
 0x85b   :  { %2164 = vadd.xlane.f32.xlu0 %v2163_v39 }
 0x85d   :  { %v2144_v32 = vpop.f32.mrf.mxu1 }
 0x85e   :  { %v2145_v29 = vadd.f32 %v2144_v32, %v2122_v57 }
 0x860   :  { %v2158_v46 = vadd.f32 %v2145_v29, %v6086_v51 }
 0x862   :  { %v2166_v9 = vsel %vm41_vm0, %v2158_v46, 0.0 }
 0x863   :  { %2167 = vadd.xlane.f32.xlu1 %v2166_v9 }
 0x865   :  { %v2147_v10 = vpop.f32.mrf.mxu1 }
 0x866   :  { %v2148_v33 = vadd.f32 %v2147_v10, %v2122_v57 }
 0x868   :  { %v2159_v15 = vadd.f32 %v2148_v33, %v6097_v20 }
 0x86a   :  { %v2169_v38 = vsel %vm41_vm0, %v2159_v15, 0.0 }
 0x86b   :  { %2170 = vadd.xlane.f32.xlu2 %v2169_v38 }
 0x86d   :  { %v2149_v54 = vpop.f32.mrf.mxu1 }
 0x86e   :  { %v2150_v0 = vadd.f32 %v2149_v54, %v2122_v57 }
 0x870   :  { %v2160_v3 = vadd.f32 %v2150_v0, %v6100_v19 }
 0x872   :  { %v2172_v12 = vsel %vm41_vm0, %v2160_v3, 0.0 }
 0x873   :  { %2173 = vadd.xlane.f32.xlu0 %v2172_v12 }
 0x880   :  { %v2152_v61 = vpop.f32.mrf.mxu1 }
 0x881   :  { %v2153_v30 = vadd.f32 %v2152_v61, %v2122_v57 }
 0x883   :  { %v2161_v51 = vadd.f32 %v2153_v30, %v6111_v5 }
 0x885   :  { %v2175_v7 = vsel %vm41_vm0, %v2161_v51, 0.0 }
 0x886   :  { %2176 = vadd.xlane.f32.xlu1 %v2175_v7 }
 0x888   :  { %v2154_v27 = vpop.f32.mrf.mxu1 }
 0x889   :  { %v2155_v26 = vadd.f32 %v2154_v27, %v2122_v57  ;;  %v4540_v57 = vld [vmem:[%s7175_s2 + $0x28] sm:$0xff] }
 0x88a   :  { %v2342_v45 = vpack.c.bf16 %v4540_v57, %v4539_v6 }
 0x88b   :  { %v2162_v20 = vadd.f32 %v2155_v26, %v6114_v17 }
 0x88c   :  { %2363 = vmatpush.bf16.msra.mxu2 %v2342_v45 }
 0x88d   :  { %v2178_v60 = vsel %vm41_vm0, %v2162_v20, 0.0 }
 0x88e   :  { %2179 = vadd.xlane.f32.xlu2 %v2178_v60 }
 0x8ce   :  { %v2165_v56 = vpop.xlane.xlu0 %2164 }
 0x8cf   :  { %v2181_v19 = vmul.f32 %v2165_v56, %v5210_v18 }
 0x8d1   :  { %v6171_v63 = vsub.f32 %v2157_v41, %v2181_v19 }
 0x8d3   :  { %v2193_v34 = vmul.f32 %v6171_v63, %v6171_v63 }
 0x8d5   :  { %v2199_v5 = vsel %vm41_vm0, %v2193_v34, 0.0 }
 0x8d6   :  { %v2168_v4 = vpop.xlane.xlu1 %2167  ;;  %2200 = vadd.xlane.f32.xlu0 %v2199_v5 }
 0x8d7   :  { %v2182_v24 = vmul.f32 %v2168_v4, %v5210_v18 }
 0x8d9   :  { %v6177_v25 = vsub.f32 %v2158_v46, %v2182_v24  ;;  %v6227_v24 = vperm.slane %v6005_v44, 5 }
 0x8db   :  { %v2194_v17 = vmul.f32 %v6177_v25, %v6177_v25 }
 0x8dd   :  { %v2202_v16 = vsel %vm41_vm0, %v2194_v17, 0.0 }
 0x8de   :  { %2203 = vadd.xlane.f32.xlu1 %v2202_v16  ;;  %v2171_v31 = vpop.xlane.xlu2 %2170 }
 0x8df   :  { %v2183_v52 = vmul.f32 %v2171_v31, %v5210_v18 }
 0x8e1   :  { %v6183_v22 = vsub.f32 %v2159_v15, %v2183_v52 }
 0x8e3   :  { %v2195_v53 = vmul.f32 %v6183_v22, %v6183_v22 }
 0x8e5   :  { %v2205_v1 = vsel %vm41_vm0, %v2195_v53, 0.0 }
 0x8e6   :  { %2206 = vadd.xlane.f32.xlu2 %v2205_v1  ;;  %v2174_v21 = vpop.xlane.xlu0 %2173 }
 0x8e7   :  { %v2184_v23 = vmul.f32 %v2174_v21, %v5210_v18 }
 0x8e9   :  { %v6189_v2 = vsub.f32 %v2160_v3, %v2184_v23 }
 0x8eb   :  { %v2196_v40 = vmul.f32 %v6189_v2, %v6189_v2 }
 0x8ed   :  { %v2208_v13 = vsel %vm41_vm0, %v2196_v40, 0.0 }
 0x8ee   :  { %2209 = vadd.xlane.f32.xlu0 %v2208_v13 }
 0x8f9   :  { %v2177_v42 = vpop.xlane.xlu1 %2176 }
 0x8fa   :  { %v2185_v14 = vmul.f32 %v2177_v42, %v5210_v18 }
 0x8fc   :  { %v6195_v28 = vsub.f32 %v2161_v51, %v2185_v14 }
 0x8fe   :  { %v2197_v35 = vmul.f32 %v6195_v28, %v6195_v28 }
 0x900   :  { %v2211_v48 = vsel %vm41_vm0, %v2197_v35, 0.0 }
 0x901   :  { %2212 = vadd.xlane.f32.xlu1 %v2211_v48  ;;  %v2180_v58 = vpop.xlane.xlu2 %2179 }
 0x902   :  { %v2186_v11 = vmul.f32 %v2180_v58, %v5210_v18 }
 0x904   :  { %v6201_v47 = vsub.f32 %v2162_v20, %v2186_v11  ;;  %v6223_v20 = vperm.slane %v6005_v44, 4 }
 0x906   :  { %v2198_v43 = vmul.f32 %v6201_v47, %v6201_v47 }
 0x908   :  { %v2214_v49 = vsel %vm41_vm0, %v2198_v43, 0.0 }
 0x909   :  { %2215 = vadd.xlane.f32.xlu2 %v2214_v49 }
 0x949   :  { %v2201_v36 = vpop.xlane.xlu0 %2200 }
 0x94a   :  { %v2217_v59 = vmul.f32 %v2201_v36, %v5210_v18 }
 0x94c   :  { %v2223_v37 = vadd.f32 1e-12, %v2217_v59 }
 0x94e   :  { %4953 = vrsqrt.f32 %v2223_v37  ;;  %vm2235_vm3 = vweird.f32 %v2223_v37 }
 0x951   :  { %v2204_v62 = vpop.xlane.xlu1 %2203 }
 0x952   :  { %v2218_v41 = vmul.f32 %v2204_v62, %v5210_v18 }
 0x954   :  { %v4954_v39 = vpop.eup %4953  ;;  %v2224_v32 = vadd.f32 1e-12, %v2218_v41 }
 0x955   :  { %v2230_v29 = vmul.f32 %v4954_v39, %v2223_v37  ;;  %vm2236_vm2 = vweird.f32 %v4954_v39 }
 0x956   :  { %4955 = vrsqrt.f32 %v2224_v32  ;;  %vm2237_vm4 = vmor %vm2235_vm3, %vm2236_vm2  ;;  %vm2245_vm10 = vweird.f32 %v2224_v32 }
 0x957   :  { %v2231_v46 = vmul.f32 %v4954_v39, %v2230_v29 }
 0x959   :  { %v2232_v9 = vmul.f32 0.5, %v2231_v46  ;;  %v2207_v10 = vpop.xlane.xlu2 %2206 }
 0x95a   :  { %v2219_v33 = vmul.f32 %v2207_v10, %v5210_v18 }
 0x95b   :  { %v2233_v15 = vsub.f32 1.5, %v2232_v9 }
 0x95c   :  { %v4956_v38 = vpop.eup %4955  ;;  %v2225_v54 = vadd.f32 1e-12, %v2219_v33 }
 0x95d   :  { %v2234_v0 = vmul.f32 %v4954_v39, %v2233_v15  ;;  %v2240_v3 = vmul.f32 %v4956_v38, %v2224_v32  ;;  %vm2246_vm9 = vweird.f32 %v4956_v38 }
 0x95e   :  { %4957 = vrsqrt.f32 %v2225_v54  ;;  %vm2247_vm11 = vmor %vm2245_vm10, %vm2246_vm9  ;;  %vm2255_vm13 = vweird.f32 %v2225_v54 }
 0x95f   :  { %v2241_v12 = vmul.f32 %v4956_v38, %v2240_v3  ;;  %v2238_v61 = vsel %vm2237_vm4, %v4954_v39, %v2234_v0 }
 0x960   :  { %v2289_v60 = vmul.f32 %v2238_v61, %v6171_v63 }
 0x961   :  { %v2242_v30 = vmul.f32 0.5, %v2241_v12  ;;  %v2210_v51 = vpop.xlane.xlu0 %2209 }
 0x962   :  { %v2220_v7 = vmul.f32 %v2210_v51, %v5210_v18  ;;  %v2296_v17 = vmul.f32 %v6223_v20, %v2289_v60 }
 0x963   :  { %v2243_v27 = vsub.f32 1.5, %v2242_v30 }
 0x964   :  { %v4958_v26 = vpop.eup %4957  ;;  %v2226_v56 = vadd.f32 1e-12, %v2220_v7  ;;  %v6233_v1 = vadd.f32 %v6227_v24, %v2296_v17 }
 0x965   :  { %v2244_v19 = vmul.f32 %v4956_v38, %v2243_v27  ;;  %v2250_v34 = vmul.f32 %v4958_v26, %v2225_v54  ;;  %vm2256_vm12 = vweird.f32 %v4958_v26 }
 0x966   :  { %4959 = vrsqrt.f32 %v2226_v56  ;;  %vm2257_vm14 = vmor %vm2255_vm13, %vm2256_vm12  ;;  %vm2265_vm2 = vweird.f32 %v2226_v56 }
 0x967   :  { %v2248_v5 = vsel %vm2247_vm11, %v4956_v38, %v2244_v19  ;;  %v2251_v4 = vmul.f32 %v4958_v26, %v2250_v34 }
 0x968   :  { %v2290_v16 = vmul.f32 %v2248_v5, %v6177_v25 }
 0x969   :  { %v2252_v31 = vmul.f32 0.5, %v2251_v4 }
 0x96a   :  { %v2297_v52 = vmul.f32 %v6223_v20, %v2290_v16 }
 0x96b   :  { %v2253_v53 = vsub.f32 1.5, %v2252_v31 }
 0x96c   :  { %v4960_v63 = vpop.eup %4959  ;;  %v6236_v21 = vadd.f32 %v6227_v24, %v2297_v52 }
 0x96d   :  { %v2254_v23 = vmul.f32 %v4958_v26, %v2253_v53  ;;  %v2260_v40 = vmul.f32 %v4960_v63, %v2226_v56  ;;  %vm2266_vm15 = vweird.f32 %v4960_v63 }
 0x96e   :  { %v2339_v44 = vpack.c.bf16 %v6236_v21, %v6233_v1  ;;  %vm2267_vm3 = vmor %vm2265_vm2, %vm2266_vm15 }
 0x96f   :  { %v2261_v13 = vmul.f32 %v4960_v63, %v2260_v40  ;;  %v2258_v25 = vsel %vm2257_vm14, %v4958_v26, %v2254_v23 }
 0x970   :  { %4562 = vmatmul.msk.bf16.vlgmr.msra.gmra.mxu2 %vm41_vm0, %v2339_v44  ;;  %v2291_v35 = vmul.f32 %v2258_v25, %v6183_v22 }
 0x971   :  { %v2262_v42 = vmul.f32 0.5, %v2261_v13 }
 0x972   :  { %v2298_v8 = vmul.f32 %v6223_v20, %v2291_v35 }
 0x973   :  { %v2263_v14 = vsub.f32 1.5, %v2262_v42 }
 0x974   :  { %v2213_v48 = vpop.xlane.xlu1 %2212  ;;  %v6247_v59 = vadd.f32 %v6227_v24, %v2298_v8 }
 0x975   :  { %v2264_v58 = vmul.f32 %v4960_v63, %v2263_v14  ;;  %v2221_v11 = vmul.f32 %v2213_v48, %v5210_v18 }
 0x977   :  { %v2268_v43 = vsel %vm2267_vm3, %v4960_v63, %v2264_v58  ;;  %v2227_v49 = vadd.f32 1e-12, %v2221_v11 }
 0x978   :  { %v2292_v55 = vmul.f32 %v2268_v43, %v6189_v2 }
 0x979   :  { %4961 = vrsqrt.f32 %v2227_v49  ;;  %vm2275_vm9 = vweird.f32 %v2227_v49 }
 0x97a   :  { %v2299_v36 = vmul.f32 %v6223_v20, %v2292_v55 }
 0x97c   :  { %v2216_v50 = vpop.xlane.xlu2 %2215  ;;  %v6250_v22 = vadd.f32 %v6227_v24, %v2299_v36 }
 0x97d   :  { %v2222_v37 = vmul.f32 %v2216_v50, %v5210_v18 }
 0x97e   :  { %v2340_v6 = vpack.c.bf16 %v6250_v22, %v6247_v59 }
 0x97f   :  { %v4962_v57 = vpop.eup %4961  ;;  %v2228_v45 = vadd.f32 1e-12, %v2222_v37 }
 0x980   :  { %v2270_v2 = vmul.f32 %v4962_v57, %v2227_v49  ;;  %4563 = vmatmul.msk.bf16.gmra.mxu2 %vm41_vm0, %v2340_v6  ;;  %vm2276_vm4 = vweird.f32 %v4962_v57 }
 0x981   :  { %4963 = vrsqrt.f32 %v2228_v45  ;;  %vm2277_vm10 = vmor %vm2275_vm9, %vm2276_vm4  ;;  %vm2285_vm12 = vweird.f32 %v2228_v45 }
 0x982   :  { %v2271_v62 = vmul.f32 %v4962_v57, %v2270_v2 }
 0x984   :  { %v2272_v41 = vmul.f32 0.5, %v2271_v62 }
 0x986   :  { %v2273_v39 = vsub.f32 1.5, %v2272_v41 }
 0x987   :  { %v4964_v32 = vpop.eup %4963 }
 0x988   :  { %v2274_v29 = vmul.f32 %v4962_v57, %v2273_v39  ;;  %v2280_v46 = vmul.f32 %v4964_v32, %v2228_v45  ;;  %vm2286_vm11 = vweird.f32 %v4964_v32 }
 0x989   :  { %vm2287_vm13 = vmor %vm2285_vm12, %vm2286_vm11 }
 0x98a   :  { %v2281_v9 = vmul.f32 %v4964_v32, %v2280_v46  ;;  %v2278_v10 = vsel %vm2277_vm10, %v4962_v57, %v2274_v29 }
 0x98b   :  { %v2293_v38 = vmul.f32 %v2278_v10, %v6195_v28  ;;  %v4817_v28 = vld [vmem:[%s7176_s3 + $0x1] ss:$0 sm:$0xff] }
 0x98c   :  { %v2282_v33 = vmul.f32 0.5, %v2281_v9 }
 0x98d   :  { %v2300_v12 = vmul.f32 %v6223_v20, %v2293_v38 }
 0x98e   :  { %v2283_v15 = vsub.f32 1.5, %v2282_v33 }
 0x98f   :  { %v6261_v30 = vadd.f32 %v6227_v24, %v2300_v12 }
 0x990   :  { %v2284_v54 = vmul.f32 %v4964_v32, %v2283_v15 }
 0x992   :  { %v2288_v0 = vsel %vm2287_vm13, %v4964_v32, %v2284_v54 }
 0x993   :  { %v2294_v3 = vmul.f32 %v2288_v0, %v6201_v47 }
 0x995   :  { %v2301_v61 = vmul.f32 %v6223_v20, %v2294_v3 }
 0x997   :  { %v6264_v51 = vadd.f32 %v6227_v24, %v2301_v61 }
 0x999   :  { %v2341_v7 = vpack.c.bf16 %v6264_v51, %v6261_v30 }
 0x99b   :  { %4564 = vmatmul.msk.bf16.gmra.mxu2 %vm41_vm0, %v2341_v7 }
 0x9f3   :  { %v2365_v47 = vpop.f32.mrf.mxu2 }
 0x9f4   :  { %v2366_v27 = vadd.f32 %v4817_v28, %v2365_v47 }
 0x9f6   :  { %v6272_v26 = vpack.c.bf16 %v2366_v27, %v2366_v27 }
 0x9f8   :  { %v2465_v20 = vunpack.c.l.b16 %v6272_v26 }
 0x9fa   :  { %v2466_v60 = vpack.c.b16 %v2465_v20, %v2465_v20 }
 0x9fb   :  { %v2367_v56 = vpop.f32.mrf.mxu2 }
 0x9fc   :  { %v2368_v19 = vadd.f32 %v4817_v28, %v2367_v56  ;;  %3352 = vrot.lane.b32.xlu1 %v2466_v60, %s5130_s14  ;;  %2467 = vrot.lane.b32.xlu0 %v2466_v60, %s5127_s11 }
 0x9fe   :  { %v2441_v34 = vpack.c.bf16 %v2368_v19, %v2368_v19  ;;  %v4730_v5 = vpack.i.bf16 %v2366_v27, %v2368_v19 }
 0xa00   :  { %4731 = vrot.lane.b32.xlu2 %v4730_v5, %s5129_s13  ;;  %v2489_v4 = vunpack.c.l.b16 %v2441_v34 }
 0xa02   :  { %v2490_v31 = vpack.c.b16 %v2489_v4, %v2489_v4 }
 0xa03   :  { %v2370_v24 = vpop.f32.mrf.mxu2 }
 0xa04   :  { %v2371_v17 = vadd.f32 %v4817_v28, %v2370_v24  ;;  %4726 = vrot.lane.b32.xlu0 %v4730_v5, %s5126_s10 }
 0xa06   :  { %v6279_v16 = vpack.c.bf16 %v2371_v17, %v2371_v17  ;;  %v4735_v52 = vpack.i.bf16 %v2371_v17, %v2368_v19 }
 0xa08   :  { %2491 = vrot.lane.b32.xlu2 %v2490_v31, %s5127_s11  ;;  %4736 = vrot.lane.b32.xlu1 %v4735_v52, %s5128_s12  ;;  %v2513_v53 = vunpack.c.l.b16 %v6279_v16 }
 0xa0a   :  { %v2514_v63 = vpack.c.b16 %v2513_v53, %v2513_v53 }
 0xa0b   :  { %v2372_v23 = vpop.f32.mrf.mxu2 }
 0xa0c   :  { %v2373_v40 = vadd.f32 %v4817_v28, %v2372_v23  ;;  %2515 = vrot.lane.b32.xlu0 %v2514_v63, %s5127_s11 }
 0xa0e   :  { %v6285_v44 = vpack.c.bf16 %v2373_v40, %v2373_v40  ;;  %v4740_v13 = vpack.i.bf16 %v2373_v40, %v2366_v27  ;;  %v4745_v14 = vpack.i.bf16 %v2373_v40, %v2371_v17 }
 0xa10   :  { %4741 = vrot.lane.b32.xlu1 %v4740_v13, %s5128_s12  ;;  %v2537_v25 = vunpack.c.l.b16 %v6285_v44 }
 0xa12   :  { %v2538_v42 = vpack.c.b16 %v2537_v25, %v2537_v25 }
 0xa14   :  { %2539 = vrot.lane.b32.xlu0 %v2538_v42, %s5127_s11 }
 0xa18   :  { %4746 = vrot.lane.b32.xlu1 %v4745_v14, %s5129_s13 }
 0xa1c   :  { %3373 = vrot.lane.b32.xlu0 %v2490_v31, %s5130_s14 }
 0xa1e   :  { %v2375_v35 = vpop.f32.mrf.mxu2 }
 0xa1f   :  { %v2376_v48 = vadd.f32 %v4817_v28, %v2375_v35 }
 0xa21   :  { %v4750_v58 = vpack.i.bf16 %v2376_v48, %v2373_v40  ;;  %v6299_v50 = vpack.c.bf16 %v2376_v48, %v2376_v48 }
 0xa23   :  { %4751 = vrot.lane.b32.xlu2 %v4750_v58, %s5126_s10  ;;  %v2561_v57 = vunpack.c.l.b16 %v6299_v50 }
 0xa25   :  { %v6305_v45 = vpack.c.b16 %v2561_v57, %v2561_v57 }
 0xa26   :  { %v2377_v11 = vpop.f32.mrf.mxu2 }
 0xa27   :  { %v2378_v43 = vadd.f32 %v4817_v28, %v2377_v11 }
 0xa29   :  { %v4755_v49 = vpack.i.bf16 %v2378_v43, %v2371_v17  ;;  %v4765_v55 = vpack.i.bf16 %v2376_v48, %v2378_v43  ;;  %v6293_v8 = vpack.c.bf16 %v2378_v43, %v2378_v43  ;;  %v4760_v37 = vpack.i.bf16 %v2378_v43, %v2376_v48 }
 0xa2b   :  { %3415 = vrot.lane.b32.xlu2 %v2538_v42, %s5130_s14  ;;  %4756 = vrot.lane.b32.xlu1 %v4755_v49, %s5126_s10  ;;  %v2585_v36 = vunpack.c.l.b16 %v6293_v8 }
 0xa2c   :  { %4766 = vrot.lane.b32.xlu0 %v4765_v55, %s5129_s13 }
 0xa2d   :  { %v2586_v6 = vpack.c.b16 %v2585_v36, %v2585_v36 }
 0xa33   :  { %4761 = vrot.lane.b32.xlu1 %v4760_v37, %s5128_s12  ;;  %3394 = vrot.lane.b32.xlu2 %v2514_v63, %s5130_s14 }
 0xa34   :  { %2587 = vrot.lane.b32.xlu0 %v2586_v6, %s5127_s11 }
 0xa3b   :  { %2563 = vrot.lane.b32.xlu2 %v6305_v45, %s5127_s11 }
 0xa5a   :  { %v4732_v2 = vpop.permute.xlu2 %4731 }
 0xa5b   :  { %v4734_v62 = vunpack.i.h.bf16 %v4732_v2  ;;  %v4733_v40 = vunpack.i.l.bf16 %v4732_v2 }
 0xa5d   :  { %v6309_v41 = vpack.c.bf16 %v4734_v62, %v4734_v62 }
 0xa5f   :  { %v2897_v39 = vunpack.c.l.b16 %v6309_v41 }
 0xa61   :  { %v6312_v32 = vpack.c.b16 %v2897_v39, %v2897_v39 }
 0xa62   :  { %v2492_v29 = vpop.permute.xlu2 %2491 }
 0xa63   :  { %v2497_v46 = vsel %vm348_vm5, %v2492_v29, 0  ;;  %2899 = vrot.lane.b32.xlu0 %v6312_v32, %s5127_s11 }
 0xa64   :  { %2506 = vmatpush.bf16.xpose.msrb.mxu0 %v2497_v46 }
 0xa6b   :  { %4566 = vmatmul.msk.bf16.vlgmr.msrb.gmra.mxu0 %vm348_vm5, %v2441_v34 }
 0xa6e   :  { %v2468_v9 = vpop.permute.xlu0 %2467  ;;  %v6319_v33 = vpop.permute.xlu1 %3352 }
 0xa6f   :  { %v2473_v10 = vsel %vm348_vm5, %v2468_v9, 0 }
 0xa70   :  { %2482 = vmatpush.bf16.xpose.msrb.mxu3 %v2473_v10 }
 0xa76   :  { %v4727_v15 = vpop.permute.xlu0 %4726 }
 0xa77   :  { %v4729_v38 = vunpack.i.h.bf16 %v4727_v15  ;;  %v4728_v54 = vunpack.i.l.bf16 %v4727_v15  ;;  %4565 = vmatmul.msk.bf16.vlgmr.msrb.gmra.mxu3 %vm348_vm5, %v6272_v26 }
 0xa79   :  { %v6323_v0 = vpack.c.bf16 %v4729_v38, %v4729_v38  ;;  %v6325_v3 = vpack.c.bf16 %v4728_v54, %v4728_v54 }
 0xa7a   :  { %v4737_v12 = vpop.permute.xlu1 %4736 }
 0xa7b   :  { %v2609_v61 = vunpack.c.l.b16 %v6323_v0  ;;  %v2633_v7 = vunpack.c.l.b16 %v6325_v3  ;;  %v4738_v34 = vunpack.i.l.bf16 %v4737_v12  ;;  %v4739_v2 = vunpack.i.h.bf16 %v4737_v12 }
 0xa7d   :  { %v6329_v28 = vpack.c.b16 %v2609_v61, %v2609_v61  ;;  %v6331_v47 = vpack.c.b16 %v2633_v7, %v2633_v7  ;;  %v6333_v27 = vpop.permute.xlu2 %4751  ;;  %v6355_v53 = vpack.c.bf16 %v4738_v34, %v4738_v34  ;;  %v6400_v46 = vpack.c.bf16 %v4739_v2, %v4739_v2 }
 0xa7e   :  { %v2516_v20 = vpop.permute.xlu0 %2515  ;;  %v4754_v26 = vunpack.i.h.bf16 %v6333_v27  ;;  %v4753_v61 = vunpack.i.l.bf16 %v6333_v27 }
 0xa7f   :  { %v2521_v60 = vsel %vm348_vm5, %v2516_v20, 0  ;;  %2611 = vrot.lane.b32.xlu1 %v6329_v28, %s5127_s11  ;;  %2635 = vrot.lane.b32.xlu0 %v6331_v47, %s5127_s11  ;;  %v2777_v13 = vunpack.c.l.b16 %v6355_v53  ;;  %v2801_v12 = vunpack.c.l.b16 %v6400_v46 }
 0xa80   :  { %2530 = vmatpush.bf16.xpose.msrb.mxu1 %v2521_v60  ;;  %v6344_v5 = vpack.c.bf16 %v4754_v26, %v4754_v26  ;;  %v6413_v34 = vpack.c.bf16 %v4753_v61, %v4753_v61 }
 0xa81   :  { %v6373_v14 = vpack.c.b16 %v2777_v13, %v2777_v13 }
 0xa82   :  { %v6341_v56 = vpop.permute.xlu1 %4741  ;;  %v2705_v63 = vunpack.c.l.b16 %v6344_v5 }
 0xa83   :  { %v4743_v19 = vunpack.i.l.bf16 %v6341_v56 }
 0xa84   :  { %v6363_v25 = vpack.c.b16 %v2705_v63, %v2705_v63 }
 0xa85   :  { %v6346_v4 = vpack.c.bf16 %v4743_v19, %v4743_v19  ;;  %v6348_v24 = vpop.permute.xlu2 %3415  ;;  %v2802_v19 = vpack.c.b16 %v2801_v12, %v2801_v12 }
 0xa86   :  { %v2540_v17 = vpop.permute.xlu0 %2539 }
 0xa87   :  { %v2753_v31 = vunpack.c.l.b16 %v6346_v4  ;;  %v2545_v52 = vsel %vm348_vm5, %v2540_v17, 0  ;;  %4567 = vmatmul.msk.bf16.vlgmr.msrb.gmra.mxu1 %vm348_vm5, %v6279_v16  ;;  %3457 = vrot.lane.b32.xlu0 %v2586_v6, %s5130_s14  ;;  %v6371_v16 = vpack.c.bf16 %v4733_v40, %v4733_v40 }
 0xa88   :  { %2554 = vmatpush.bf16.xpose.msrb.mxu2 %v2545_v52  ;;  %v2681_v52 = vunpack.c.l.b16 %v6413_v34 }
 0xa89   :  { %v6358_v23 = vpack.c.b16 %v2753_v31, %v2753_v31  ;;  %v2921_v48 = vunpack.c.l.b16 %v6371_v16 }
 0xa8a   :  { %v6375_v35 = vpop.permute.xlu1 %4746  ;;  %v2682_v13 = vpack.c.b16 %v2681_v52, %v2681_v52 }
 0xa8b   :  { %2755 = vrot.lane.b32.xlu1 %v6358_v23, %s5127_s11  ;;  %v4748_v58 = vunpack.i.l.bf16 %v6375_v35  ;;  %v6384_v49 = vpack.c.b16 %v2921_v48, %v2921_v48 }
 0xa8d   :  { %v6365_v42 = vpop.permute.xlu2 %3394  ;;  %v6386_v55 = vpack.c.bf16 %v4748_v58, %v4748_v58 }
 0xa8e   :  { %v6381_v43 = vpop.permute.xlu0 %3373 }
 0xa8f   :  { %4568 = vmatmul.msk.bf16.vlgmr.msrb.gmra.mxu2 %vm348_vm5, %v6285_v44  ;;  %2707 = vrot.lane.b32.xlu0 %v6363_v25, %s5127_s11  ;;  %v2945_v36 = vunpack.c.l.b16 %v6386_v55 }
 0xa91   :  { %v6395_v39 = vpack.c.b16 %v2945_v36, %v2945_v36 }
 0xa93   :  { %2779 = vrot.lane.b32.xlu1 %v6373_v14, %s5127_s11 }
 0xa95   :  { %v2564_v11 = vpop.permute.xlu2 %2563 }
 0xa96   :  { %v2569_v44 = vsel %vm348_vm5, %v2564_v11, 0  ;;  %v4749_v11 = vunpack.i.h.bf16 %v6375_v35 }
 0xa97   :  { %2578 = vmatpush.bf16.xpose.msra.mxu3 %v2569_v44 }
 0xa98   :  { %v6443_v44 = vpack.c.bf16 %v4749_v11, %v4749_v11 }
 0xa9a   :  { %v2969_v36 = vunpack.c.l.b16 %v6443_v44 }
 0xa9b   :  { %2923 = vrot.lane.b32.xlu1 %v6384_v49, %s5127_s11 }
 0xa9d   :  { %v4757_v37 = vpop.permute.xlu1 %4756 }
 0xa9e   :  { %v4758_v6 = vunpack.i.l.bf16 %v4757_v37  ;;  %v4767_v57 = vpop.permute.xlu0 %4766  ;;  %4569 = vmatmul.msk.bf16.vlgmr.msra.gmra.mxu3 %vm348_vm5, %v6299_v50  ;;  %v4759_v7 = vunpack.i.h.bf16 %v4757_v37  ;;  %v6450_v37 = vpack.c.b16 %v2969_v36, %v2969_v36 }
 0xa9f   :  { %v4769_v10 = vunpack.i.h.bf16 %v4767_v57  ;;  %v4768_v35 = vunpack.i.l.bf16 %v4767_v57 }
 0xaa0   :  { %v6393_v62 = vpack.c.bf16 %v4758_v6, %v4758_v6  ;;  %v6415_v17 = vpack.c.bf16 %v4759_v7, %v4759_v7 }
 0xaa1   :  { %v6408_v60 = vpack.c.bf16 %v4769_v10, %v4769_v10 }
 0xaa2   :  { %v2657_v29 = vunpack.c.l.b16 %v6393_v62  ;;  %v2729_v63 = vunpack.c.l.b16 %v6415_v17 }
 0xaa3   :  { %2947 = vrot.lane.b32.xlu1 %v6395_v39, %s5127_s11  ;;  %v2993_v27 = vunpack.c.l.b16 %v6408_v60 }
 0xaa4   :  { %v2658_v9 = vpack.c.b16 %v2657_v29, %v2657_v29  ;;  %v2730_v58 = vpack.c.b16 %v2729_v63, %v2729_v63  ;;  %v6458_v29 = vpack.c.bf16 %v4768_v35, %v4768_v35 }
 0xaa5   :  { %v4762_v15 = vpop.permute.xlu1 %4761  ;;  %v6428_v40 = vpack.c.b16 %v2993_v27, %v2993_v27 }
 0xaa6   :  { %v4763_v38 = vunpack.i.l.bf16 %v4762_v15  ;;  %v2588_v54 = vpop.permute.xlu0 %2587  ;;  %2659 = vrot.lane.b32.xlu2 %v2658_v9, %s5127_s11 }
 0xaa7   :  { %v2593_v50 = vsel %vm348_vm5, %v2588_v54, 0 }
 0xaa8   :  { %v6406_v20 = vpack.c.bf16 %v4763_v38, %v4763_v38  ;;  %2602 = vmatpush.bf16.xpose.msra.mxu0 %v2593_v50 }
 0xaaa   :  { %v2849_v26 = vunpack.c.l.b16 %v6406_v20 }
 0xaab   :  { %3499 = vrot.lane.b32.xlu1 %v6331_v47, %s5130_s14  ;;  %v4744_v47 = vunpack.i.h.bf16 %v6341_v56 }
 0xaac   :  { %v6417_v31 = vpack.c.b16 %v2849_v26, %v2849_v26 }
 0xaad   :  { %v6432_v48 = vpack.c.bf16 %v4744_v47, %v4744_v47 }
 0xaae   :  { %2803 = vrot.lane.b32.xlu2 %v2802_v19, %s5127_s11  ;;  %2851 = vrot.lane.b32.xlu0 %v6417_v31, %s5127_s11 }
 0xaaf   :  { %4570 = vmatmul.msk.bf16.vlgmr.msra.gmra.mxu0 %vm348_vm5, %v6293_v8  ;;  %v2825_v8 = vunpack.c.l.b16 %v6432_v48 }
 0xab1   :  { %v2826_v56 = vpack.c.b16 %v2825_v8, %v2825_v8 }
 0xab3   :  { %2995 = vrot.lane.b32.xlu1 %v6428_v40, %s5127_s11 }
 0xab6   :  { %2683 = vrot.lane.b32.xlu2 %v2682_v13, %s5127_s11  ;;  %2731 = vrot.lane.b32.xlu0 %v2730_v58, %s5127_s11 }
 0xabb   :  { %3604 = vrot.lane.b32.xlu1 %v6358_v23, %s5130_s14  ;;  %v4764_v23 = vunpack.i.h.bf16 %v4762_v15 }
 0xabd   :  { %v6452_v6 = vpack.c.bf16 %v4764_v23, %v4764_v23 }
 0xabe   :  { %2827 = vrot.lane.b32.xlu2 %v2826_v56, %s5127_s11  ;;  %3520 = vrot.lane.b32.xlu0 %v2658_v9, %s5130_s14 }
 0xabf   :  { %v2873_v2 = vunpack.c.l.b16 %v6452_v6 }
 0xac3   :  { %3583 = vrot.lane.b32.xlu1 %v2730_v58, %s5130_s14 }
 0xac6   :  { %3436 = vrot.lane.b32.xlu2 %v6305_v45, %s5130_s14  ;;  %3562 = vrot.lane.b32.xlu0 %v6363_v25, %s5130_s14  ;;  %v6460_v45 = vpack.c.b16 %v2873_v2, %v2873_v2  ;;  %v3017_v25 = vunpack.c.l.b16 %v6458_v29 }
 0xac8   :  { %v6466_v9 = vpack.c.b16 %v3017_v25, %v3017_v25 }
 0xace   :  { %2971 = vrot.lane.b32.xlu2 %v6450_v37, %s5127_s11  ;;  %3667 = vrot.lane.b32.xlu0 %v2826_v56, %s5130_s14 }
 0xad5   :  { %v2900_v10 = vpop.permute.xlu0 %2899 }
 0xad6   :  { %2875 = vrot.lane.b32.xlu2 %v6460_v45, %s5127_s11  ;;  %3646 = vrot.lane.b32.xlu0 %v2802_v19, %s5130_s14 }
 0xade   :  { %3478 = vrot.lane.b32.xlu2 %v6329_v28, %s5130_s14  ;;  %3019 = vrot.lane.b32.xlu0 %v6466_v9, %s5127_s11 }
 0xae6   :  { %3541 = vrot.lane.b32.xlu2 %v2682_v13, %s5130_s14 }
 0xae8   :  { %v2508_v57 = vpop.f32.mrf.mxu0 }
 0xae9   :  { %v6473_v15 = vmul.f32 0.35355338, %v2508_v57 }
 0xaeb   :  { %v3067_v38 = vsel %vm348_vm5, %v6473_v15, -inf }
 0xaed   :  { %3068 = vmax.xlane.f32.xlu1 %v3067_v38 }
 0xaee   :  { %3625 = vrot.lane.b32.xlu2 %v6373_v14, %s5130_s14 }
 0xaf0   :  { %v2510_v54 = vpop.f32.mrf.mxu0 }
 0xaf1   :  { %v2612_v50 = vpop.permute.xlu1 %2611  ;;  %v2636_v12 = vpop.permute.xlu0 %2635 }
 0xaf2   :  { %v2617_v28 = vsel %vm348_vm5, %v2612_v50, 0  ;;  %v2641_v61 = vsel %vm348_vm5, %v2636_v12, 0 }
 0xaf3   :  { %2626 = vmatpush.bf16.xpose.msra.mxu1 %v2617_v28  ;;  %2650 = vmatpush.bf16.xpose.msra.mxu2 %v2641_v61 }
 0xaf9   :  { %v6481_v7 = vpop.permute.xlu0 %3457 }
 0xafa   :  { %v2484_v26 = vpop.f32.mrf.mxu3  ;;  %4571 = vmatmul.msk.bf16.vlgmr.msra.gmra.mxu1 %vm348_vm5, %v6323_v0  ;;  %4572 = vmatmul.msk.bf16.vlgmr.msra.gmra.mxu2 %vm348_vm5, %v6325_v3  ;;  %v2905_v3 = vsel %vm348_vm5, %v2900_v10, 0 }
 0xafb   :  { %v6497_v2 = vmul.f32 0.35355338, %v2484_v26 }
 0xafd   :  { %v2756_v19 = vpop.permute.xlu1 %2755  ;;  %v3064_v10 = vsel %vm348_vm5, %v6497_v2, -inf }
 0xafe   :  { %v2761_v47 = vsel %vm348_vm5, %v2756_v19, 0 }
 0xb00   :  { %v2660_v14 = vpop.permute.xlu2 %2659 }
 0xb01   :  { %v2665_v27 = vsel %vm348_vm5, %v2660_v14, 0  ;;  %v2708_v52 = vpop.permute.xlu0 %2707 }
 0xb02   :  { %v2713_v63 = vsel %vm348_vm5, %v2708_v52, 0  ;;  %v2486_v13 = vpop.f32.mrf.mxu3  ;;  %2674 = vmatpush.bf16.xpose.msrb.mxu3 %v2665_v27 }
 0xb03   :  { %2722 = vmatpush.bf16.xpose.msrb.mxu1 %v2713_v63 }
 0xb04   :  { %v2532_v58 = vpop.f32.mrf.mxu1 }
 0xb05   :  { %v2780_v8 = vpop.permute.xlu1 %2779  ;;  %v6510_v50 = vmul.f32 0.35355338, %v2532_v58 }
 0xb06   :  { %v2785_v25 = vsel %vm348_vm5, %v2780_v8, 0 }
 0xb07   :  { %v3070_v61 = vsel %vm348_vm5, %v6510_v50, -inf }
 0xb08   :  { %v2804_v56 = vpop.permute.xlu2 %2803 }
 0xb09   :  { %v2809_v0 = vsel %vm348_vm5, %v2804_v56, 0  ;;  %4573 = vmatmul.msk.bf16.vlgmr.msrb.gmra.mxu3 %vm348_vm5, %v6393_v62  ;;  %v3358_v56 = vsel %vm1237_vm6, %v6319_v33, 0 }
 0xb0a   :  { %2770 = vmatpush.bf16.xpose.msra.mxu3 %v2761_v47  ;;  %4575 = vmatmul.msk.bf16.vlgmr.msrb.gmra.mxu1 %vm348_vm5, %v6344_v5 }
 0xb0b   :  { %2818 = vmatpush.bf16.xpose.msra.mxu1 %v2809_v0  ;;  %v3400_v0 = vsel %vm1237_vm6, %v6365_v42, 0 }
 0xb0c   :  { %v2534_v11 = vpop.f32.mrf.mxu1 }
 0xb0d   :  { %v2924_v36 = vpop.permute.xlu1 %2923 }
 0xb0e   :  { %v2929_v42 = vsel %vm348_vm5, %v2924_v36, 0 }
 0xb10   :  { %v2684_v23 = vpop.permute.xlu2 %2683 }
 0xb11   :  { %v2689_v35 = vsel %vm348_vm5, %v2684_v23, 0 }
 0xb12   :  { %v2556_v57 = vpop.f32.mrf.mxu2  ;;  %2698 = vmatpush.bf16.xpose.msrb.mxu0 %v2689_v35 }
 0xb13   :  { %2914 = vmatpush.bf16.xpose.msrb.mxu1 %v2905_v3  ;;  %v6500_v38 = vmul.f32 0.35355338, %v2556_v57 }
 0xb15   :  { %v2948_v62 = vpop.permute.xlu1 %2947  ;;  %v3073_v5 = vsel %vm348_vm5, %v6500_v38, -inf }
 0xb16   :  { %3074 = vmax.xlane.f32.xlu0 %v3073_v5  ;;  %v2953_v27 = vsel %vm348_vm5, %v2948_v62, 0 }
 0xb17   :  { %3065 = vmax.xlane.f32.xlu2 %v3064_v10 }
 0xb18   :  { %v2828_v54 = vpop.permute.xlu2 %2827 }
 0xb19   :  { %4574 = vmatmul.msk.bf16.vlgmr.msrb.gmra.mxu0 %vm348_vm5, %v6413_v34  ;;  %4577 = vmatmul.msk.bf16.vlgmr.msra.gmra.mxu3 %vm348_vm5, %v6346_v4  ;;  %v2833_v3 = vsel %vm348_vm5, %v2828_v54, 0 }
 0xb1a   :  { %2794 = vmatpush.bf16.xpose.msra.mxu0 %v2785_v25  ;;  %v2558_v12 = vpop.f32.mrf.mxu2  ;;  %4579 = vmatmul.msk.bf16.vlgmr.msra.gmra.mxu1 %vm348_vm5, %v6400_v46 }
 0xb1d   :  { %v6514_v28 = vpop.permute.xlu1 %3499 }
 0xb1f   :  { %3071 = vmax.xlane.f32.xlu2 %v3070_v61 }
 0xb20   :  { %v3437_v26 = vpop.permute.xlu2 %3436  ;;  %v2852_v19 = vpop.permute.xlu0 %2851 }
 0xb21   :  { %v2857_v14 = vsel %vm348_vm5, %v2852_v19, 0  ;;  %v2580_v34 = vpop.f32.mrf.mxu3  ;;  %v3442_v5 = vsel %vm1237_vm6, %v3437_v26, 0 }
 0xb22   :  { %v6520_v4 = vmul.f32 0.35355338, %v2580_v34  ;;  %2866 = vmatpush.bf16.xpose.msrb.mxu3 %v2857_v14 }
 0xb24   :  { %v3076_v46 = vsel %vm348_vm5, %v6520_v4, -inf }
 0xb25   :  { %v2996_v52 = vpop.permute.xlu1 %2995  ;;  %3077 = vmax.xlane.f32.xlu0 %v3076_v46 }
 0xb26   :  { %v3001_v47 = vsel %vm348_vm5, %v2996_v52, 0 }
 0xb27   :  { %3010 = vmatpush.bf16.xpose.msra.mxu1 %v3001_v47 }
 0xb28   :  { %v2972_v63 = vpop.permute.xlu2 %2971  ;;  %v2732_v13 = vpop.permute.xlu0 %2731 }
 0xb29   :  { %v2737_v58 = vsel %vm348_vm5, %v2732_v13, 0  ;;  %v2582_v8 = vpop.f32.mrf.mxu3  ;;  %4578 = vmatmul.msk.bf16.vlgmr.msra.gmra.mxu0 %vm348_vm5, %v6355_v53  ;;  %4581 = vmatmul.msk.bf16.vlgmr.msrb.gmra.mxu3 %vm348_vm5, %v6406_v20 }
 0xb2a   :  { %2962 = vmatpush.bf16.xpose.msra.mxu3 %v2953_v27  ;;  %2746 = vmatpush.bf16.xpose.msrb.mxu2 %v2737_v58 }
 0xb2b   :  { %4583 = vmatmul.msk.bf16.vlgmr.msrb.gmra.mxu1 %vm348_vm5, %v6309_v41  ;;  %v2977_v41 = vsel %vm348_vm5, %v2972_v63, 0 }
 0xb2c   :  { %v2604_v11 = vpop.f32.mrf.mxu0 }
 0xb2d   :  { %v6537_v53 = vmul.f32 0.35355338, %v2604_v11 }
 0xb2f   :  { %3409 = vmatpush.bf16.msrb.mxu1 %v3400_v0  ;;  %v3079_v20 = vsel %vm348_vm5, %v6537_v53, -inf }
 0xb30   :  { %3080 = vmax.xlane.f32.xlu2 %v3079_v20  ;;  %v2876_v33 = vpop.permute.xlu2 %2875  ;;  %v6541_v23 = vpop.permute.xlu0 %3520 }
 0xb31   :  { %v2881_v35 = vsel %vm348_vm5, %v2876_v33, 0  ;;  %4576 = vmatmul.msk.bf16.vlgmr.msrb.gmra.mxu2 %vm348_vm5, %v6415_v17  ;;  %v3379_v17 = vsel %vm1237_vm6, %v6381_v43, 0  ;;  %v6570_v43 = vpop.permute.xlu1 %3604 }
 0xb32   :  { %3367 = vmatpush.bf16.msrb.mxu3 %v3358_v56  ;;  %2842 = vmatpush.bf16.xpose.msra.mxu2 %v2833_v3 }
 0xb33   :  { %2890 = vmatpush.bf16.xpose.msrb.mxu0 %v2881_v35 }
 0xb34   :  { %v2606_v25 = vpop.f32.mrf.mxu0 }
 0xb38   :  { %v3479_v57 = vpop.permute.xlu2 %3478  ;;  %v6548_v62 = vpop.permute.xlu0 %3562 }
 0xb39   :  { %v3484_v10 = vsel %vm1237_vm6, %v3479_v57, 0  ;;  %4585 = vmatmul.msk.bf16.vlgmr.msra.gmra.mxu3 %vm348_vm5, %v6386_v55  ;;  %v6577_v12 = vpop.permute.xlu1 %3583 }
 0xb3a   :  { %2938 = vmatpush.bf16.xpose.msrb.mxu2 %v2929_v42  ;;  %4582 = vmatmul.msk.bf16.vlgmr.msrb.gmra.mxu0 %vm348_vm5, %v6452_v6  ;;  %v3463_v6 = vsel %vm1237_vm6, %v6481_v7, 0 }
 0xb3b   :  { %2986 = vmatpush.bf16.xpose.msra.mxu0 %v2977_v41  ;;  %3451 = vmatpush.bf16.msra.mxu3 %v3442_v5 }
 0xb3c   :  { %4587 = vmatmul.msk.bf16.vlgmr.msra.gmra.mxu1 %vm348_vm5, %v6408_v60 }
 0xb3d   :  { %3493 = vmatpush.bf16.msra.mxu1 %v3484_v10 }
 0xb40   :  { %v6560_v36 = vpop.permute.xlu0 %3667  ;;  %v6588_v14 = vpop.permute.xlu2 %3541 }
 0xb41   :  { %4580 = vmatmul.msk.bf16.vlgmr.msra.gmra.mxu2 %vm348_vm5, %v6432_v48  ;;  %v3421_v48 = vsel %vm1237_vm6, %v6348_v24, 0 }
 0xb43   :  { %3388 = vmatpush.bf16.msrb.mxu0 %v3379_v17 }
 0xb48   :  { %v6564_v54 = vpop.permute.xlu0 %3646  ;;  %v6598_v52 = vpop.permute.xlu2 %3625 }
 0xb4a   :  { %4586 = vmatmul.msk.bf16.vlgmr.msra.gmra.mxu0 %vm348_vm5, %v6443_v44  ;;  %v3505_v44 = vsel %vm1237_vm6, %v6514_v28, 0 }
 0xb4b   :  { %3472 = vmatpush.bf16.msra.mxu0 %v3463_v6 }
 0xb50   :  { %v3020_v55 = vpop.permute.xlu0 %3019 }
 0xb51   :  { %v3025_v60 = vsel %vm348_vm5, %v3020_v55, 0  ;;  %4584 = vmatmul.msk.bf16.vlgmr.msrb.gmra.mxu2 %vm348_vm5, %v6371_v16 }
 0xb52   :  { %3034 = vmatpush.bf16.xpose.msra.mxu2 %v3025_v60 }
 0xb5a   :  { %3430 = vmatpush.bf16.msrb.mxu2 %v3421_v48 }
 0xb60   :  { %v3069_v7 = vpop.xlane.xlu1 %3068 }
 0xb61   :  { %v3137_v61 = vsub.f32 %v6473_v15, %v3069_v7  ;;  %4588 = vmatmul.msk.bf16.vlgmr.msra.gmra.mxu2 %vm348_vm5, %v6458_v29 }
 0xb62   :  { %3514 = vmatpush.bf16.msra.mxu2 %v3505_v44 }
 0xb63   :  { %v3162_v26 = vmul.f32 1.442695, %v3137_v61 }
 0xb65   :  { %4965 = vpow2.f32 %v3162_v26 }
 0xb6b   :  { %v6584_v16 = vpop.eup %4965 }
 0xb6c   :  { %v3211_v24 = vsel %vm348_vm5, %v6584_v16, 0.0 }
 0xb6d   :  { %3212 = vadd.xlane.f32.xlu2 %v3211_v24 }
 0xb77   :  { %v2628_v19 = vpop.f32.mrf.mxu1 }
 0xb78   :  { %v6590_v34 = vmul.f32 0.35355338, %v2628_v19 }
 0xb7a   :  { %v3082_v15 = vsel %vm348_vm5, %v6590_v34, -inf }
 0xb7b   :  { %3083 = vmax.xlane.f32.xlu0 %v3082_v15 }
 0xb7d   :  { %v2652_v28 = vpop.f32.mrf.mxu2 }
 0xb7e   :  { %v6594_v29 = vmul.f32 0.35355338, %v2652_v28 }
 0xb7f   :  { %v2630_v27 = vpop.f32.mrf.mxu1 }
 0xb80   :  { %v3085_v46 = vsel %vm348_vm5, %v6594_v29, -inf }
 0xb81   :  { %3086 = vmax.xlane.f32.xlu1 %v3085_v46 }
 0xb85   :  { %v2654_v47 = vpop.f32.mrf.mxu2 }
 0xb87   :  { %v2724_v63 = vpop.f32.mrf.mxu1 }
 0xb88   :  { %v6623_v26 = vmul.f32 0.35355338, %v2724_v63 }
 0xb89   :  { %v3075_v11 = vpop.xlane.xlu0 %3074 }
 0xb8a   :  { %v3066_v13 = vpop.xlane.xlu2 %3065  ;;  %v3139_v41 = vsub.f32 %v6500_v38, %v3075_v11  ;;  %v3094_v46 = vsel %vm348_vm5, %v6623_v26, -inf }
 0xb8b   :  { %v3136_v58 = vsub.f32 %v6497_v2, %v3066_v13 }
 0xb8c   :  { %v2676_v8 = vpop.f32.mrf.mxu3  ;;  %v3166_v17 = vmul.f32 1.442695, %v3139_v41 }
 0xb8d   :  { %v3160_v56 = vmul.f32 1.442695, %v3136_v58 }
 0xb8f   :  { %4967 = vpow2.f32 %v3160_v56  ;;  %v2726_v0 = vpop.f32.mrf.mxu1 }
 0xb92   :  { %v3072_v3 = vpop.xlane.xlu2 %3071 }
 0xb93   :  { %v3138_v20 = vsub.f32 %v6510_v50, %v3072_v3  ;;  %v6611_v50 = vmul.f32 0.35355338, %v2676_v8 }
 0xb94   :  { %v2678_v33 = vpop.f32.mrf.mxu3 }
 0xb95   :  { %v6602_v42 = vpop.eup %4967  ;;  %v3164_v35 = vmul.f32 1.442695, %v3138_v20  ;;  %v3088_v48 = vsel %vm348_vm5, %v6611_v50, -inf }
 0xb96   :  { %v2700_v25 = vpop.f32.mrf.mxu0  ;;  %v3208_v57 = vsel %vm348_vm5, %v6602_v42, 0.0 }
 0xb97   :  { %v6607_v5 = vmul.f32 0.35355338, %v2700_v25  ;;  %3209 = vadd.xlane.f32.xlu1 %v3208_v57  ;;  %v2820_v2 = vpop.f32.mrf.mxu1  ;;  %4969 = vpow2.f32 %v3164_v35 }
 0xb98   :  { %4971 = vpow2.f32 %v3166_v17  ;;  %v3078_v24 = vpop.xlane.xlu0 %3077  ;;  %v6636_v56 = vmul.f32 0.35355338, %v2820_v2 }
 0xb99   :  { %v3091_v10 = vsel %vm348_vm5, %v6607_v5, -inf  ;;  %v3140_v28 = vsub.f32 %v6520_v4, %v3078_v24 }
 0xb9a   :  { %3092 = vmax.xlane.f32.xlu0 %v3091_v10  ;;  %v3106_v33 = vsel %vm348_vm5, %v6636_v56, -inf }
 0xb9b   :  { %v3168_v63 = vmul.f32 1.442695, %v3140_v28 }
 0xb9c   :  { %v2772_v6 = vpop.f32.mrf.mxu3 }
 0xb9d   :  { %v6613_v55 = vmul.f32 0.35355338, %v2772_v6  ;;  %v6615_v38 = vpop.eup %4969  ;;  %4973 = vpow2.f32 %v3168_v63 }
 0xb9e   :  { %v2702_v60 = vpop.f32.mrf.mxu0  ;;  %v3214_v61 = vsel %vm348_vm5, %v6615_v38, 0.0  ;;  %v6625_v19 = vpop.eup %4971 }
 0xb9f   :  { %3089 = vmax.xlane.f32.xlu1 %v3088_v48  ;;  %v2822_v7 = vpop.f32.mrf.mxu1  ;;  %v3100_v44 = vsel %vm348_vm5, %v6613_v55, -inf  ;;  %v3217_v58 = vsel %vm348_vm5, %v6625_v19, 0.0 }
 0xba0   :  { %3101 = vmax.xlane.f32.xlu2 %v3100_v44 }
 0xba2   :  { %3215 = vadd.xlane.f32.xlu0 %v3214_v61 }
 0xba3   :  { %v3081_v4 = vpop.xlane.xlu2 %3080  ;;  %v6645_v57 = vpop.eup %4973 }
 0xba4   :  { %v2774_v15 = vpop.f32.mrf.mxu3  ;;  %v3141_v11 = vsub.f32 %v6537_v53, %v3081_v4  ;;  %v3220_v53 = vsel %vm348_vm5, %v6645_v57, 0.0 }
 0xba6   :  { %v2796_v27 = vpop.f32.mrf.mxu0  ;;  %v3170_v25 = vmul.f32 1.442695, %v3141_v11 }
 0xba7   :  { %v6630_v47 = vmul.f32 0.35355338, %v2796_v27  ;;  %3095 = vmax.xlane.f32.xlu1 %v3094_v46 }
 0xba8   :  { %v2916_v13 = vpop.f32.mrf.mxu1  ;;  %3218 = vadd.xlane.f32.xlu2 %v3217_v58  ;;  %4975 = vpow2.f32 %v3170_v25 }
 0xba9   :  { %v3103_v8 = vsel %vm348_vm5, %v6630_v47, -inf  ;;  %v6657_v61 = vmul.f32 0.35355338, %v2916_v13 }
 0xbaa   :  { %3104 = vmax.xlane.f32.xlu0 %v3103_v8 }
 0xbab   :  { %v3118_v46 = vsel %vm348_vm5, %v6657_v61, -inf }
 0xbac   :  { %v2868_v0 = vpop.f32.mrf.mxu3 }
 0xbad   :  { %v6638_v3 = vmul.f32 0.35355338, %v2868_v0 }
 0xbae   :  { %v2798_v20 = vpop.f32.mrf.mxu0  ;;  %v6659_v24 = vpop.eup %4975 }
 0xbaf   :  { %3107 = vmax.xlane.f32.xlu1 %v3106_v33  ;;  %v3112_v41 = vsel %vm348_vm5, %v6638_v3, -inf  ;;  %v3223_v63 = vsel %vm348_vm5, %v6659_v24, 0.0 }
 0xbb0   :  { %v2918_v35 = vpop.f32.mrf.mxu1 }
 0xbb2   :  { %3113 = vmax.xlane.f32.xlu0 %v3112_v41 }
 0xbb4   :  { %v2748_v2 = vpop.f32.mrf.mxu2  ;;  %v2870_v10 = vpop.f32.mrf.mxu3 }
 0xbb5   :  { %v6647_v17 = vmul.f32 0.35355338, %v2748_v2 }
 0xbb7   :  { %v2892_v6 = vpop.f32.mrf.mxu0  ;;  %3221 = vadd.xlane.f32.xlu1 %v3220_v53  ;;  %v3097_v7 = vsel %vm348_vm5, %v6647_v17, -inf }
 0xbb8   :  { %v6651_v60 = vmul.f32 0.35355338, %v2892_v6  ;;  %3098 = vmax.xlane.f32.xlu2 %v3097_v7 }
 0xbb9   :  { %v3012_v48 = vpop.f32.mrf.mxu1 }
 0xbba   :  { %v3115_v44 = vsel %vm348_vm5, %v6651_v60, -inf  ;;  %v6665_v8 = vmul.f32 0.35355338, %v3012_v48 }
 0xbbb   :  { %3116 = vmax.xlane.f32.xlu0 %v3115_v44 }
 0xbbc   :  { %v2750_v15 = vpop.f32.mrf.mxu2  ;;  %v2964_v28 = vpop.f32.mrf.mxu3  ;;  %v3130_v33 = vsel %vm348_vm5, %v6665_v8, -inf }
 0xbbd   :  { %v6673_v35 = vmul.f32 0.35355338, %v2964_v28 }
 0xbbf   :  { %v2894_v27 = vpop.f32.mrf.mxu0  ;;  %3119 = vmax.xlane.f32.xlu1 %v3118_v46  ;;  %v3124_v2 = vsel %vm348_vm5, %v6673_v35, -inf }
 0xbc0   :  { %3224 = vadd.xlane.f32.xlu2 %v3223_v63 }
 0xbc1   :  { %v3014_v58 = vpop.f32.mrf.mxu1 }
 0xbc4   :  { %v2844_v4 = vpop.f32.mrf.mxu2  ;;  %v2966_v13 = vpop.f32.mrf.mxu3 }
 0xbc5   :  { %v6667_v0 = vmul.f32 0.35355338, %v2844_v4  ;;  %v3547_v13 = vsel %vm1237_vm6, %v6588_v14, 0 }
 0xbc7   :  { %v2988_v11 = vpop.f32.mrf.mxu0  ;;  %v3109_v20 = vsel %vm348_vm5, %v6667_v0, -inf }
 0xbc8   :  { %3110 = vmax.xlane.f32.xlu0 %v3109_v20  ;;  %3131 = vmax.xlane.f32.xlu2 %v3130_v33  ;;  %v6677_v10 = vmul.f32 0.35355338, %v2988_v11 }
 0xbca   :  { %v3127_v53 = vsel %vm348_vm5, %v6677_v10, -inf }
 0xbcc   :  { %v2846_v41 = vpop.f32.mrf.mxu2 }
 0xbcf   :  { %v2990_v25 = vpop.f32.mrf.mxu0 }
 0xbd0   :  { %3125 = vmax.xlane.f32.xlu0 %v3124_v2 }
 0xbd4   :  { %v2940_v6 = vpop.f32.mrf.mxu2 }
 0xbd5   :  { %v6681_v48 = vmul.f32 0.35355338, %v2940_v6 }
 0xbd7   :  { %v3121_v44 = vsel %vm348_vm5, %v6681_v48, -inf }
 0xbd8   :  { %3128 = vmax.xlane.f32.xlu0 %v3127_v53 }
 0xbdc   :  { %v2942_v7 = vpop.f32.mrf.mxu2 }
 0xbe0   :  { %v3213_v15 = vpop.xlane.xlu2 %3212  ;;  %3122 = vmax.xlane.f32.xlu0 %v3121_v44 }
 0xbe1   :  { %4977 = vrcp.f32 %v3213_v15 }
 0xbe4   :  { %v3036_v28 = vpop.f32.mrf.mxu2 }
 0xbe5   :  { %v6685_v27 = vmul.f32 0.35355338, %v3036_v28 }
 0xbe7   :  { %v4978_v46 = vpop.eup %4977  ;;  %v3133_v58 = vsel %vm348_vm5, %v6685_v27, -inf }
 0xbe8   :  { %v3305_v63 = vmul.f32 %v4978_v46, %v6584_v16  ;;  %3134 = vmax.xlane.f32.xlu2 %v3133_v58 }
 0xbea   :  { %v3329_v4 = vpack.c.bf16 %v3305_v63, %v3305_v63 }
 0xbec   :  { %v3038_v11 = vpop.f32.mrf.mxu2  ;;  %4590 = vmatmul.msk.bf16.vlgmr.msrb.gmra.mxu0 %vm348_vm5, %v3329_v4 }
 0xbed   :  { %3556 = vmatpush.bf16.msrb.mxu0 %v3547_v13  ;;  %v3526_v13 = vsel %vm1237_vm6, %v6541_v23, 0 }
 0xbee   :  { %v3084_v20 = vpop.xlane.xlu0 %3083 }
 0xbef   :  { %v3142_v33 = vsub.f32 %v6590_v34, %v3084_v20 }
 0xbf1   :  { %v3172_v41 = vmul.f32 1.442695, %v3142_v33 }
 0xbf3   :  { %4979 = vpow2.f32 %v3172_v41 }
 0xbf4   :  { %v3087_v25 = vpop.xlane.xlu1 %3086  ;;  %3751 = vrot.lane.b32.xlu0 %v6384_v49, %s5130_s14 }
 0xbf5   :  { %v3143_v16 = vsub.f32 %v6594_v29, %v3087_v25 }
 0xbf7   :  { %v3174_v2 = vmul.f32 1.442695, %v3143_v16 }
 0xbf9   :  { %v6697_v6 = vpop.eup %4979  ;;  %4981 = vpow2.f32 %v3174_v2 }
 0xbfa   :  { %v3226_v14 = vsel %vm348_vm5, %v6697_v6, 0.0 }
 0xbfb   :  { %3227 = vadd.xlane.f32.xlu1 %v3226_v14 }
 0xbff   :  { %v6701_v53 = vpop.eup %4981 }
 0xc00   :  { %v3229_v34 = vsel %vm348_vm5, %v6701_v53, 0.0 }
 0xc01   :  { %3230 = vadd.xlane.f32.xlu2 %v3229_v34 }
 0xc0a   :  { %v3210_v7 = vpop.xlane.xlu1 %3209 }
 0xc0b   :  { %4983 = vrcp.f32 %v3210_v7 }
 0xc0d   :  { %v3093_v44 = vpop.xlane.xlu0 %3092 }
 0xc0e   :  { %v3145_v11 = vsub.f32 %v6607_v5, %v3093_v44 }
 0xc10   :  { %v3178_v20 = vmul.f32 1.442695, %v3145_v11 }
 0xc11   :  { %v4984_v49 = vpop.eup %4983 }
 0xc12   :  { %v3304_v29 = vmul.f32 %v4984_v49, %v6602_v42  ;;  %v3090_v15 = vpop.xlane.xlu1 %3089 }
 0xc13   :  { %v3144_v28 = vsub.f32 %v6611_v50, %v3090_v15  ;;  %v3102_v46 = vpop.xlane.xlu2 %3101 }
 0xc14   :  { %v3328_v58 = vpack.c.bf16 %v3304_v29, %v3304_v29  ;;  %v3148_v5 = vsub.f32 %v6613_v55, %v3102_v46 }
 0xc15   :  { %v3176_v63 = vmul.f32 1.442695, %v3144_v28  ;;  %v3216_v4 = vpop.xlane.xlu0 %3215 }
 0xc16   :  { %4985 = vrcp.f32 %v3216_v4  ;;  %4589 = vmatmul.msk.bf16.vlgmr.msrb.gmra.mxu3 %vm348_vm5, %v3328_v58  ;;  %v3184_v44 = vmul.f32 1.442695, %v3148_v5  ;;  %v3589_v4 = vsel %vm1237_vm6, %v6577_v12, 0 }
 0xc17   :  { %4987 = vpow2.f32 %v3176_v63  ;;  %3535 = vmatpush.bf16.msrb.mxu3 %v3526_v13 }
 0xc1a   :  { %v3096_v33 = vpop.xlane.xlu1 %3095 }
 0xc1b   :  { %v3146_v42 = vsub.f32 %v6623_v26, %v3096_v33  ;;  %v3219_v41 = vpop.xlane.xlu2 %3218  ;;  %v3568_v26 = vsel %vm1237_vm6, %v6548_v62, 0 }
 0xc1c   :  { %v4986_v50 = vpop.eup %4985  ;;  %4989 = vrcp.f32 %v3219_v41 }
 0xc1d   :  { %v6712_v25 = vpop.eup %4987  ;;  %v3306_v16 = vmul.f32 %v4986_v50, %v6615_v38  ;;  %v3180_v2 = vmul.f32 1.442695, %v3146_v42  ;;  %v3105_v23 = vpop.xlane.xlu0 %3104  ;;  %4991 = vpow2.f32 %v3178_v20 }
 0xc1e   :  { %v3232_v14 = vsel %vm348_vm5, %v6712_v25, 0.0  ;;  %v3149_v62 = vsub.f32 %v6630_v47, %v3105_v23 }
 0xc1f   :  { %v3330_v34 = vpack.c.bf16 %v3306_v16, %v3306_v16  ;;  %4993 = vpow2.f32 %v3180_v2  ;;  %3233 = vadd.xlane.f32.xlu1 %v3232_v14 }
 0xc20   :  { %4995 = vpow2.f32 %v3184_v44 }
 0xc21   :  { %4591 = vmatmul.msk.bf16.vlgmr.msrb.gmra.mxu1 %vm348_vm5, %v3330_v34 }
 0xc22   :  { %v4990_v7 = vpop.eup %4989  ;;  %3577 = vmatpush.bf16.msrb.mxu1 %v3568_v26  ;;  %v3108_v38 = vpop.xlane.xlu1 %3107  ;;  %v3610_v26 = vsel %vm1237_vm6, %v6570_v43, 0 }
 0xc23   :  { %v3307_v49 = vmul.f32 %v4990_v7, %v6625_v19  ;;  %v3150_v29 = vsub.f32 %v6636_v56, %v3108_v38  ;;  %v6723_v55 = vpop.eup %4991  ;;  %v3186_v56 = vmul.f32 1.442695, %v3149_v62 }
 0xc24   :  { %v3235_v19 = vsel %vm348_vm5, %v6723_v55, 0.0 }
 0xc25   :  { %v6725_v15 = vpop.eup %4993  ;;  %v3331_v28 = vpack.c.bf16 %v3307_v49, %v3307_v49  ;;  %v3188_v46 = vmul.f32 1.442695, %v3150_v29  ;;  %v6727_v58 = vpop.xlane.xlu0 %3113 }
 0xc26   :  { %v3238_v63 = vsel %vm348_vm5, %v6725_v15, 0.0  ;;  %v6737_v47 = vpop.eup %4995 }
 0xc27   :  { %4997 = vpow2.f32 %v3188_v46  ;;  %3239 = vadd.xlane.f32.xlu2 %v3238_v63  ;;  %4592 = vmatmul.msk.bf16.vlgmr.msrb.gmra.mxu2 %vm348_vm5, %v3331_v28  ;;  %v3244_v16 = vsel %vm348_vm5, %v6737_v47, 0.0  ;;  %v3631_v63 = vsel %vm1237_vm6, %v6598_v52, 0 }
 0xc28   :  { %3598 = vmatpush.bf16.msrb.mxu2 %v3589_v4  ;;  %3236 = vadd.xlane.f32.xlu1 %v3235_v19 }
 0xc2a   :  { %v3222_v13 = vpop.xlane.xlu1 %3221 }
 0xc2b   :  { %4999 = vrcp.f32 %v3222_v13  ;;  %v3099_v11 = vpop.xlane.xlu2 %3098 }
 0xc2c   :  { %v3147_v20 = vsub.f32 %v6647_v17, %v3099_v11  ;;  %5001 = vpow2.f32 %v3186_v56  ;;  %v3152_v11 = vsub.f32 %v6638_v3, %v6727_v58 }
 0xc2d   :  { %v6740_v33 = vpop.eup %4997 }
 0xc2e   :  { %v3117_v12 = vpop.xlane.xlu0 %3116  ;;  %v3182_v42 = vmul.f32 1.442695, %v3147_v20  ;;  %v3250_v50 = vsel %vm348_vm5, %v6740_v33, 0.0 }
 0xc2f   :  { %v3153_v41 = vsub.f32 %v6651_v60, %v3117_v12  ;;  %3251 = vadd.xlane.f32.xlu0 %v3250_v50 }
 0xc30   :  { %5003 = vpow2.f32 %v3182_v42  ;;  %3245 = vadd.xlane.f32.xlu1 %v3244_v16 }
 0xc31   :  { %v3194_v2 = vmul.f32 1.442695, %v3153_v41  ;;  %v5000_v23 = vpop.eup %4999 }
 0xc32   :  { %v3308_v17 = vmul.f32 %v5000_v23, %v6645_v57  ;;  %v6748_v14 = vpop.eup %5001  ;;  %v6778_v56 = vpop.xlane.xlu1 %3119 }
 0xc33   :  { %5005 = vpow2.f32 %v3194_v2  ;;  %v3225_v5 = vpop.xlane.xlu2 %3224  ;;  %v3247_v7 = vsel %vm348_vm5, %v6748_v14, 0.0 }
 0xc34   :  { %v3332_v34 = vpack.c.bf16 %v3308_v17, %v3308_v17  ;;  %5007 = vrcp.f32 %v3225_v5 }
 0xc36   :  { %v6750_v60 = vpop.eup %5003  ;;  %4593 = vmatmul.msk.bf16.vlgmr.msra.gmra.mxu3 %vm348_vm5, %v3332_v34 }
 0xc37   :  { %3619 = vmatpush.bf16.msra.mxu3 %v3610_v26  ;;  %v3241_v57 = vsel %vm348_vm5, %v6750_v60, 0.0 }
 0xc38   :  { %3248 = vadd.xlane.f32.xlu1 %v3247_v7  ;;  %3242 = vadd.xlane.f32.xlu2 %v3241_v57  ;;  %v3652_v7 = vsel %vm1237_vm6, %v6564_v54, 0 }
 0xc39   :  { %v6759_v44 = vpop.eup %5005 }
 0xc3a   :  { %v3259_v38 = vsel %vm348_vm5, %v6759_v44, 0.0  ;;  %v5008_v49 = vpop.eup %5007 }
 0xc3b   :  { %3260 = vadd.xlane.f32.xlu0 %v3259_v38  ;;  %v3309_v43 = vmul.f32 %v5008_v49, %v6659_v24  ;;  %v3111_v29 = vpop.xlane.xlu0 %3110 }
 0xc3c   :  { %v3151_v28 = vsub.f32 %v6667_v0, %v3111_v29  ;;  %v3132_v0 = vpop.xlane.xlu2 %3131 }
 0xc3d   :  { %v3333_v46 = vpack.c.bf16 %v3309_v43, %v3309_v43  ;;  %v3158_v5 = vsub.f32 %v6665_v8, %v3132_v0  ;;  %v3673_v43 = vsel %vm1237_vm6, %v6560_v36, 0 }
 0xc3e   :  { %v3190_v62 = vmul.f32 1.442695, %v3151_v28 }
 0xc3f   :  { %4594 = vmatmul.msk.bf16.vlgmr.msra.gmra.mxu0 %vm348_vm5, %v3333_v46  ;;  %v3204_v57 = vmul.f32 1.442695, %v3158_v5 }
 0xc40   :  { %3640 = vmatpush.bf16.msra.mxu0 %v3631_v63  ;;  %5009 = vpow2.f32 %v3190_v62 }
 0xc43   :  { %v3126_v24 = vpop.xlane.xlu0 %3125 }
 0xc44   :  { %v3156_v13 = vsub.f32 %v6673_v35, %v3126_v24 }
 0xc46   :  { %v6768_v4 = vpop.eup %5009  ;;  %v3200_v12 = vmul.f32 1.442695, %v3156_v13 }
 0xc47   :  { %v3253_v19 = vsel %vm348_vm5, %v6768_v4, 0.0 }
 0xc48   :  { %3254 = vadd.xlane.f32.xlu0 %v3253_v19  ;;  %5011 = vpow2.f32 %v3200_v12 }
 0xc4b   :  { %v3129_v52 = vpop.xlane.xlu0 %3128 }
 0xc4c   :  { %v3157_v3 = vsub.f32 %v6677_v10, %v3129_v52 }
 0xc4e   :  { %v6788_v2 = vpop.eup %5011  ;;  %v3202_v26 = vmul.f32 1.442695, %v3157_v3 }
 0xc50   :  { %3688 = vrot.lane.b32.xlu2 %v6417_v31, %s5130_s14 }
 0xc51   :  { %3709 = vrot.lane.b32.xlu1 %v6460_v45, %s5130_s14  ;;  %v3192_v45 = vmul.f32 1.442695, %v3152_v11 }
 0xc53   :  { %v3123_v31 = vpop.xlane.xlu0 %3122 }
 0xc5b   :  { %v6785_v42 = vpop.xlane.xlu2 %3134 }
 0xc5c   :  { %3730 = vrot.lane.b32.xlu0 %v6312_v32, %s5130_s14  ;;  %v3155_v32 = vsub.f32 %v6681_v48, %v3123_v31  ;;  %v3268_v48 = vsel %vm348_vm5, %v6788_v2, 0.0 }
 0xc5e   :  { %v3198_v16 = vmul.f32 1.442695, %v3155_v32 }
 0xc66   :  { %v3752_v0 = vpop.permute.xlu0 %3751 }
 0xc69   :  { %v6783_v20 = vpop.f32.mrf.mxu0 }
 0xc6e   :  { %v3228_v41 = vpop.xlane.xlu1 %3227 }
 0xc6f   :  { %5013 = vrcp.f32 %v3228_v41 }
 0xc70   :  { %5015 = vpow2.f32 %v3192_v45 }
 0xc71   :  { %v3392_v50 = vpop.f32.mrf.mxu0 }
 0xc74   :  { %v3231_v35 = vpop.xlane.xlu2 %3230 }
 0xc75   :  { %v5014_v23 = vpop.eup %5013  ;;  %5017 = vrcp.f32 %v3231_v35 }
 0xc76   :  { %v3310_v58 = vmul.f32 %v5014_v23, %v6697_v6  ;;  %v6792_v17 = vpop.eup %5015  ;;  %5019 = vpow2.f32 %v3198_v16 }
 0xc77   :  { %v3256_v10 = vsel %vm348_vm5, %v6792_v17, 0.0  ;;  %5021 = vpow2.f32 %v3202_v26 }
 0xc78   :  { %v3334_v34 = vpack.c.bf16 %v3310_v58, %v3310_v58  ;;  %5023 = vpow2.f32 %v3204_v57 }
 0xc79   :  { %3269 = vadd.xlane.f32.xlu2 %v3268_v48 }
 0xc7a   :  { %4595 = vmatmul.msk.bf16.vlgmr.msra.gmra.mxu1 %vm348_vm5, %v3334_v34 }
 0xc7b   :  { %v5018_v6 = vpop.eup %5017  ;;  %3661 = vmatpush.bf16.msra.mxu1 %v3652_v7  ;;  %3257 = vadd.xlane.f32.xlu1 %v3256_v10 }
 0xc7c   :  { %v3311_v8 = vmul.f32 %v5018_v6, %v6701_v53  ;;  %v6803_v38 = vpop.eup %5019 }
 0xc7d   :  { %v3265_v54 = vsel %vm348_vm5, %v6803_v38, 0.0  ;;  %v6810_v29 = vpop.eup %5021 }
 0xc7e   :  { %v3335_v49 = vpack.c.bf16 %v3311_v8, %v3311_v8  ;;  %v6812_v28 = vpop.eup %5023  ;;  %v3271_v53 = vsel %vm348_vm5, %v6810_v29, 0.0 }
 0xc7f   :  { %v3274_v46 = vsel %vm348_vm5, %v6812_v28, 0.0 }
 0xc80   :  { %4596 = vmatmul.msk.bf16.vlgmr.msra.gmra.mxu2 %vm348_vm5, %v3335_v49 }
 0xc81   :  { %3682 = vmatpush.bf16.msra.mxu2 %v3673_v43  ;;  %3266 = vadd.xlane.f32.xlu2 %v3265_v54 }
 0xc86   :  { %3272 = vadd.xlane.f32.xlu0 %v3271_v53 }
 0xc89   :  { %3275 = vadd.xlane.f32.xlu2 %v3274_v46 }
 0xc92   :  { %v3234_v36 = vpop.xlane.xlu1 %3233 }
 0xc93   :  { %5025 = vrcp.f32 %v3234_v36 }
 0xc94   :  { %3772 = vrot.lane.b32.xlu1 %v6395_v39, %s5130_s14 }
 0xc99   :  { %v5026_v62 = vpop.eup %5025  ;;  %v6820_v63 = vpop.f32.mrf.mxu3 }
 0xc9a   :  { %v3312_v19 = vmul.f32 %v5026_v62, %v6712_v25  ;;  %v3240_v24 = vpop.xlane.xlu2 %3239  ;;  %3814 = vrot.lane.b32.xlu0 %v6428_v40, %s5130_s14 }
 0xc9b   :  { %5027 = vrcp.f32 %v3240_v24  ;;  %v3237_v52 = vpop.xlane.xlu1 %3236 }
 0xc9c   :  { %v3336_v13 = vpack.c.bf16 %v3312_v19, %v3312_v19  ;;  %5029 = vrcp.f32 %v3237_v52 }
 0xc9e   :  { %v6825_v11 = vpop.f32.mrf.mxu1  ;;  %4597 = vmatmul.msk.bf16.vlgmr.msrb.gmra.mxu3 %vm348_vm5, %v3336_v13 }
 0xca1   :  { %v5028_v12 = vpop.eup %5027  ;;  %v3371_v39 = vpop.f32.mrf.mxu3  ;;  %3835 = vrot.lane.b32.xlu2 %v6466_v9, %s5130_s14 }
 0xca2   :  { %v5030_v31 = vpop.eup %5029  ;;  %v3314_v25 = vmul.f32 %v5028_v12, %v6725_v15  ;;  %v3252_v40 = vpop.xlane.xlu0 %3251 }
 0xca3   :  { %v3313_v45 = vmul.f32 %v5030_v31, %v6723_v55  ;;  %v3246_v41 = vpop.xlane.xlu1 %3245  ;;  %v3154_v55 = vsub.f32 %v6657_v61, %v6778_v56 }
 0xca4   :  { %v3338_v32 = vpack.c.bf16 %v3314_v25, %v3314_v25  ;;  %5031 = vrcp.f32 %v3246_v41 }
 0xca5   :  { %v3337_v50 = vpack.c.bf16 %v3313_v45, %v3313_v45  ;;  %5033 = vrcp.f32 %v3252_v40  ;;  %v3196_v34 = vmul.f32 1.442695, %v3154_v55 }
 0xca6   :  { %v3413_v16 = vpop.f32.mrf.mxu1  ;;  %4599 = vmatmul.msk.bf16.vlgmr.msrb.gmra.mxu1 %vm348_vm5, %v3338_v32 }
 0xca7   :  { %4598 = vmatmul.msk.bf16.vlgmr.msrb.gmra.mxu0 %vm348_vm5, %v3337_v50 }
 0xcaa   :  { %v5032_v35 = vpop.eup %5031  ;;  %v6834_v23 = vpop.f32.mrf.mxu2 }
 0xcab   :  { %v3316_v9 = vmul.f32 %v5032_v35, %v6737_v47  ;;  %v3249_v3 = vpop.xlane.xlu1 %3248  ;;  %v3243_v15 = vpop.xlane.xlu2 %3242 }
 0xcac   :  { %5035 = vrcp.f32 %v3249_v3  ;;  %v5034_v58 = vpop.eup %5033 }
 0xcad   :  { %v3340_v5 = vpack.c.bf16 %v3316_v9, %v3316_v9  ;;  %5037 = vrcp.f32 %v3243_v15  ;;  %v3318_v48 = vmul.f32 %v5034_v58, %v6740_v33  ;;  %v3757_v33 = vsel %vm1237_vm6, %v3752_v0, 0 }
 0xcae   :  { %5039 = vpow2.f32 %v3196_v34  ;;  %v3261_v61 = vpop.xlane.xlu0 %3260 }
 0xcaf   :  { %4601 = vmatmul.msk.bf16.vlgmr.msra.gmra.mxu3 %vm348_vm5, %v3340_v5  ;;  %v3342_v57 = vpack.c.bf16 %v3318_v48, %v3318_v48  ;;  %5041 = vrcp.f32 %v3261_v61 }
 0xcb2   :  { %v5036_v26 = vpop.eup %5035  ;;  %v3434_v7 = vpop.f32.mrf.mxu2 }
 0xcb3   :  { %v5038_v10 = vpop.eup %5037  ;;  %v3317_v6 = vmul.f32 %v5036_v26, %v6748_v14  ;;  %v3689_v47 = vpop.permute.xlu2 %3688 }
 0xcb4   :  { %v3315_v8 = vmul.f32 %v5038_v10, %v6750_v60  ;;  %v3694_v56 = vsel %vm1237_vm6, %v3689_v47, 0  ;;  %v6850_v54 = vpop.eup %5039 }
 0xcb5   :  { %v3341_v49 = vpack.c.bf16 %v3317_v6, %v3317_v6  ;;  %3703 = vmatpush.bf16.msrb.mxu3 %v3694_v56  ;;  %v3262_v46 = vsel %vm348_vm5, %v6850_v54, 0.0  ;;  %v5042_v36 = vpop.eup %5041 }
 0xcb6   :  { %v3339_v43 = vpack.c.bf16 %v3315_v8, %v3315_v8  ;;  %4603 = vmatmul.msk.bf16.vlgmr.msra.gmra.mxu1 %vm348_vm5, %v3342_v57  ;;  %v3321_v19 = vmul.f32 %v5042_v36, %v6759_v44 }
 0xcb7   :  { %4602 = vmatmul.msk.bf16.vlgmr.msra.gmra.mxu0 %vm348_vm5, %v3341_v49 }
 0xcb8   :  { %4600 = vmatmul.msk.bf16.vlgmr.msrb.gmra.mxu2 %vm348_vm5, %v3339_v43  ;;  %v3345_v39 = vpack.c.bf16 %v3321_v19, %v3321_v19 }
 0xcb9   :  { %3766 = vmatpush.bf16.msrb.mxu2 %v3757_v33  ;;  %v6848_v14 = vpop.f32.mrf.mxu3 }
 0xcbb   :  { %v3255_v60 = vpop.xlane.xlu0 %3254 }
 0xcbc   :  { %v6852_v53 = vpop.f32.mrf.mxu0  ;;  %5043 = vrcp.f32 %v3255_v60 }
 0xcbe   :  { %3263 = vadd.xlane.f32.xlu1 %v3262_v46 }
 0xcc1   :  { %v3455_v62 = vpop.f32.mrf.mxu3 }
 0xcc2   :  { %v5044_v24 = vpop.eup %5043 }
 0xcc3   :  { %v3710_v52 = vpop.permute.xlu1 %3709  ;;  %v3319_v0 = vmul.f32 %v5044_v24, %v6768_v4  ;;  %v3159_v4 = vsub.f32 %v6685_v27, %v6785_v42 }
 0xcc4   :  { %v3715_v13 = vsel %vm1237_vm6, %v3710_v52, 0  ;;  %v3476_v12 = vpop.f32.mrf.mxu0 }
 0xcc5   :  { %3724 = vmatpush.bf16.msrb.mxu0 %v3715_v13  ;;  %v3343_v31 = vpack.c.bf16 %v3319_v0, %v3319_v0  ;;  %v3206_v32 = vmul.f32 1.442695, %v3159_v4 }
 0xcc8   :  { %4604 = vmatmul.msk.bf16.vlgmr.msra.gmra.mxu2 %vm348_vm5, %v3343_v31  ;;  %4606 = vmatmul.msk.bf16.vlgmr.msrb.gmra.mxu0 %vm348_vm5, %v3345_v39 }
 0xcce   :  { %v3731_v25 = vpop.permute.xlu0 %3730 }
 0xccf   :  { %v3736_v45 = vsel %vm1237_vm6, %v3731_v25, 0 }
 0xcd0   :  { %3745 = vmatpush.bf16.msrb.mxu1 %v3736_v45 }
 0xcd7   :  { %3793 = vrot.lane.b32.xlu1 %v6450_v37, %s5130_s14 }
 0xcec   :  { %v3270_v44 = vpop.xlane.xlu2 %3269 }
 0xcee   :  { %v3258_v41 = vpop.xlane.xlu1 %3257 }
 0xcef   :  { %5045 = vrcp.f32 %v3258_v41 }
 0xcf4   :  { %v3267_v40 = vpop.xlane.xlu2 %3266 }
 0xcf5   :  { %v5046_v50 = vpop.eup %5045  ;;  %5047 = vrcp.f32 %v3267_v40 }
 0xcf6   :  { %v3320_v16 = vmul.f32 %v5046_v50, %v6792_v17  ;;  %5049 = vpow2.f32 %v3206_v32 }
 0xcf7   :  { %v3495_v35 = vpop.f32.mrf.mxu1  ;;  %5051 = vrcp.f32 %v3270_v44 }
 0xcf8   :  { %v3344_v9 = vpack.c.bf16 %v3320_v16, %v3320_v16 }
 0xcf9   :  { %v3273_v26 = vpop.xlane.xlu0 %3272 }
 0xcfa   :  { %4605 = vmatmul.msk.bf16.vlgmr.msrb.gmra.mxu3 %vm348_vm5, %v3344_v9 }
 0xcfb   :  { %v5048_v3 = vpop.eup %5047 }
 0xcfc   :  { %v3323_v37 = vmul.f32 %v5048_v3, %v6803_v38  ;;  %v3276_v15 = vpop.xlane.xlu2 %3275  ;;  %v6869_v55 = vpop.eup %5049 }
 0xcfd   :  { %v3277_v58 = vsel %vm348_vm5, %v6869_v55, 0.0  ;;  %v5052_v17 = vpop.eup %5051 }
 0xcfe   :  { %v3347_v27 = vpack.c.bf16 %v3323_v37, %v3323_v37  ;;  %v3324_v48 = vmul.f32 %v5052_v17, %v6788_v2 }
 0xcff   :  { %v3497_v42 = vpop.f32.mrf.mxu1 }
 0xd00   :  { %4608 = vmatmul.msk.bf16.vlgmr.msrb.gmra.mxu2 %vm348_vm5, %v3347_v27  ;;  %v3348_v6 = vpack.c.bf16 %v3324_v48, %v3324_v48 }
 0xd01   :  { %3278 = vadd.xlane.f32.xlu1 %v3277_v58 }
 0xd03   :  { %v3516_v5 = vpop.f32.mrf.mxu2 }
 0xd04   :  { %v3836_v34 = vpop.permute.xlu2 %3835  ;;  %v4770_v61 = vpack.i.bf16 %v3516_v5, %v3495_v35 }
 0xd05   :  { %v3841_v7 = vsel %vm1237_vm6, %v3836_v34, 0 }
 0xd06   :  { %v3773_v38 = vpop.permute.xlu1 %3772  ;;  %3850 = vmatpush.bf16.msra.mxu2 %v3841_v7 }
 0xd07   :  { %v3778_v10 = vsel %vm1237_vm6, %v3773_v38, 0 }
 0xd08   :  { %3787 = vmatpush.bf16.msra.mxu3 %v3778_v10 }
 0xd0b   :  { %4609 = vmatmul.msk.bf16.vlgmr.msra.gmra.mxu3 %vm348_vm5, %v3348_v6  ;;  %v3518_v47 = vpop.f32.mrf.mxu2 }
 0xd0c   :  { %v3815_v57 = vpop.permute.xlu0 %3814 }
 0xd0d   :  { %v3820_v8 = vsel %vm1237_vm6, %v3815_v57, 0 }
 0xd0e   :  { %3829 = vmatpush.bf16.msra.mxu1 %v3820_v8 }
 0xd1a   :  { %4771 = vrot.lane.b32.xlu1 %v4770_v61, %s5131_s15 }
 0xd21   :  { %v3537_v2 = vpop.f32.mrf.mxu3 }
 0xd23   :  { %v6880_v56 = vpop.f32.mrf.mxu1 }
 0xd24   :  { %v3558_v49 = vpop.f32.mrf.mxu0 }
 0xd25   :  { %v4785_v44 = vpack.i.bf16 %v3558_v49, %v3537_v2  ;;  %v4546_v49 = vld [vmem:[%s7177_s4 + $0x30] sm:$0xff] }
 0xd29   :  { %v3539_v43 = vpop.f32.mrf.mxu3 }
 0xd2a   :  { %v4547_v43 = vld [vmem:[%s7177_s4 + $0x38] sm:$0xff] }
 0xd2b   :  { %v3581_v33 = vpop.f32.mrf.mxu1 }
 0xd2c   :  { %v3560_v60 = vpop.f32.mrf.mxu0  ;;  %v3950_v33 = vpack.c.bf16 %v4547_v43, %v4546_v49 }
 0xd2d   :  { %v4544_v60 = vld [vmem:[%s7177_s4 + $0x20] sm:$0xff] }
 0xd2e   :  { %3967 = vmatpush.bf16.msrb.mxu3 %v3950_v33 }
 0xd31   :  { %v3264_v46 = vpop.xlane.xlu1 %3263 }
 0xd32   :  { %5053 = vrcp.f32 %v3264_v46  ;;  %v3621_v36 = vpop.f32.mrf.mxu3  ;;  %v4545_v46 = vld [vmem:[%s7177_s4 + $0x28] sm:$0xff] }
 0xd33   :  { %v3663_v62 = vpop.f32.mrf.mxu1  ;;  %5055 = vrcp.f32 %v3276_v15 }
 0xd34   :  { %v3642_v19 = vpop.f32.mrf.mxu0  ;;  %5057 = vrcp.f32 %v3273_v26 }
 0xd35   :  { %v4775_v24 = vpack.i.bf16 %v3642_v19, %v3621_v36  ;;  %v3949_v36 = vpack.c.bf16 %v4545_v46, %v4544_v60 }
 0xd37   :  { %4776 = vrot.lane.b32.xlu0 %v4775_v24, %s5132_s16  ;;  %3968 = vmatpush.bf16.msrb.mxu3 %v3949_v36 }
 0xd38   :  { %v5054_v52 = vpop.eup %5053 }
 0xd39   :  { %v3322_v0 = vmul.f32 %v5054_v52, %v6850_v54  ;;  %v5056_v4 = vpop.eup %5055 }
 0xd3a   :  { %v3623_v13 = vpop.f32.mrf.mxu3  ;;  %v5058_v32 = vpop.eup %5057  ;;  %v3326_v54 = vmul.f32 %v5056_v4, %v6812_v28 }
 0xd3b   :  { %v3346_v12 = vpack.c.bf16 %v3322_v0, %v3322_v0  ;;  %v3600_v39 = vpop.f32.mrf.mxu2  ;;  %v3665_v31 = vpop.f32.mrf.mxu1  ;;  %v3325_v50 = vmul.f32 %v5058_v32, %v6810_v29 }
 0xd3c   :  { %v4800_v25 = vpack.i.bf16 %v3600_v39, %v6880_v56  ;;  %v3644_v45 = vpop.f32.mrf.mxu0  ;;  %v3350_v9 = vpack.c.bf16 %v3326_v54, %v3326_v54 }
 0xd3d   :  { %4607 = vmatmul.msk.bf16.vlgmr.msrb.gmra.mxu1 %vm348_vm5, %v3346_v12  ;;  %v3349_v37 = vpack.c.bf16 %v3325_v50, %v3325_v50 }
 0xd3f   :  { %4786 = vrot.lane.b32.xlu0 %v4785_v44, %s5131_s15 }
 0xd43   :  { %v3602_v41 = vpop.f32.mrf.mxu2 }
 0xd45   :  { %v3726_v40 = vpop.f32.mrf.mxu0 }
 0xd49   :  { %v3794_v16 = vpop.permute.xlu1 %3793 }
 0xd4a   :  { %v3799_v35 = vsel %vm1237_vm6, %v3794_v16, 0 }
 0xd4b   :  { %v3684_v3 = vpop.f32.mrf.mxu2  ;;  %3808 = vmatpush.bf16.msra.mxu0 %v3799_v35 }
 0xd4c   :  { %v4790_v27 = vpack.i.bf16 %v3684_v3, %v3663_v62 }
 0xd4d   :  { %v3728_v15 = vpop.f32.mrf.mxu0  ;;  %4611 = vmatmul.msk.bf16.vlgmr.msra.gmra.mxu1 %vm348_vm5, %v3350_v9 }
 0xd4e   :  { %4610 = vmatmul.msk.bf16.vlgmr.msra.gmra.mxu0 %vm348_vm5, %v3349_v37 }
 0xd53   :  { %v3686_v42 = vpop.f32.mrf.mxu2 }
 0xd74   :  { %v3279_v58 = vpop.xlane.xlu1 %3278 }
 0xd75   :  { %5059 = vrcp.f32 %v3279_v58 }
 0xd7b   :  { %v5060_v17 = vpop.eup %5059 }
 0xd7c   :  { %v3327_v28 = vmul.f32 %v5060_v17, %v6869_v55 }
 0xd7d   :  { %v3705_v29 = vpop.f32.mrf.mxu3 }
 0xd7e   :  { %v3351_v5 = vpack.c.bf16 %v3327_v28, %v3327_v28  ;;  %v4805_v34 = vpack.i.bf16 %v3726_v40, %v3705_v29 }
 0xd80   :  { %4806 = vrot.lane.b32.xlu1 %v4805_v34, %s5132_s16  ;;  %4612 = vmatmul.msk.bf16.vlgmr.msra.gmra.mxu2 %vm348_vm5, %v3351_v5 }
 0xd83   :  { %v3768_v48 = vpop.f32.mrf.mxu2 }
 0xd85   :  { %v3707_v26 = vpop.f32.mrf.mxu3 }
 0xd8b   :  { %v3770_v7 = vpop.f32.mrf.mxu2 }
 0xd8c   :  { %v4772_v52 = vpop.permute.xlu1 %4771 }
 0xd8d   :  { %v4774_v13 = vunpack.i.h.bf16 %v4772_v52  ;;  %v4773_v12 = vunpack.i.l.bf16 %v4772_v52 }
 0xd8e   :  { %v3789_v38 = vpop.f32.mrf.mxu3 }
 0xd8f   :  { %v3929_v45 = vsel %vm348_vm5, %v6783_v20, %v4774_v13  ;;  %v3928_v44 = vsel %vm348_vm5, %v6820_v63, %v4773_v12 }
 0xd96   :  { %v3791_v10 = vpop.f32.mrf.mxu3 }
 0xda9   :  { %v4777_v0 = vpop.permute.xlu0 %4776 }
 0xdaa   :  { %v4779_v39 = vunpack.i.h.bf16 %v4777_v0  ;;  %v4778_v31 = vunpack.i.l.bf16 %v4777_v0 }
 0xdac   :  { %v3935_v32 = vsel %vm1815_vm7, %v3929_v45, %v4779_v39  ;;  %v3934_v40 = vsel %vm1815_vm7, %v3928_v44, %v4778_v31 }
 0xdb1   :  { %v4787_v35 = vpop.permute.xlu0 %4786 }
 0xdb2   :  { %v4789_v3 = vunpack.i.h.bf16 %v4787_v35  ;;  %v4788_v20 = vunpack.i.l.bf16 %v4787_v35 }
 0xdb4   :  { %v3931_v15 = vsel %vm348_vm5, %v6834_v23, %v4789_v3  ;;  %v3930_v42 = vsel %vm348_vm5, %v6825_v11, %v4788_v20 }
 0xdba   :  { %v3747_v6 = vpop.f32.mrf.mxu1 }
 0xdbb   :  { %v4780_v47 = vpack.i.bf16 %v3768_v48, %v3747_v6 }
 0xdbd   :  { %4781 = vrot.lane.b32.xlu2 %v4780_v47, %s5133_s17 }
 0xdc2   :  { %v3749_v57 = vpop.f32.mrf.mxu1 }
 0xdc5   :  { %4791 = vrot.lane.b32.xlu2 %v4790_v27, %s5132_s16 }
 0xdca   :  { %v3831_v55 = vpop.f32.mrf.mxu1 }
 0xdcb   :  { %v3810_v8 = vpop.f32.mrf.mxu0 }
 0xdcc   :  { %v4795_v61 = vpack.i.bf16 %v3810_v8, %v3789_v38 }
 0xdcd   :  { %4801 = vrot.lane.b32.xlu2 %v4800_v25, %s5131_s15 }
 0xdce   :  { %4796 = vrot.lane.b32.xlu0 %v4795_v61, %s5133_s17 }
 0xdd2   :  { %v3833_v2 = vpop.f32.mrf.mxu1 }
 0xdd3   :  { %v3812_v56 = vpop.f32.mrf.mxu0 }
 0xdf2   :  { %v4807_v23 = vpop.permute.xlu1 %4806 }
 0xdf3   :  { %v4809_v6 = vunpack.i.h.bf16 %v4807_v23  ;;  %v4808_v47 = vunpack.i.l.bf16 %v4807_v23 }
 0xe03   :  { %v3852_v62 = vpop.f32.mrf.mxu2 }
 0xe04   :  { %v4810_v19 = vpack.i.bf16 %v3852_v62, %v3831_v55 }
 0xe06   :  { %4811 = vrot.lane.b32.xlu0 %v4810_v19, %s5133_s17 }
 0xe0b   :  { %v3854_v24 = vpop.f32.mrf.mxu2 }
 0xe17   :  { %v4782_v25 = vpop.permute.xlu2 %4781 }
 0xe18   :  { %v4784_v41 = vunpack.i.h.bf16 %v4782_v25  ;;  %v4783_v4 = vunpack.i.l.bf16 %v4782_v25 }
 0xe1a   :  { %v3940_v54 = vsel %vm1822_vm8, %v3934_v40, %v4783_v4  ;;  %v3941_v50 = vsel %vm1822_vm8, %v3935_v32, %v4784_v41 }
 0xe1b   :  { %v3946_v16 = vpack.c.bf16 %v3941_v50, %v3940_v54 }
 0xe1d   :  { %4613 = vmatmul.msk.bf16.vlgmr.msrb.gmra.mxu3 %vm41_vm0, %v3946_v16 }
 0xe1f   :  { %v4792_v9 = vpop.permute.xlu2 %4791 }
 0xe20   :  { %v4794_v37 = vunpack.i.h.bf16 %v4792_v9  ;;  %v4793_v27 = vunpack.i.l.bf16 %v4792_v9 }
 0xe22   :  { %v3936_v28 = vsel %vm1815_vm7, %v3930_v42, %v4793_v27  ;;  %v3937_v29 = vsel %vm1815_vm7, %v3931_v15, %v4794_v37 }
 0xe27   :  { %v4802_v26 = vpop.permute.xlu2 %4801 }
 0xe28   :  { %v4804_v7 = vunpack.i.h.bf16 %v4802_v26  ;;  %v4803_v38 = vunpack.i.l.bf16 %v4802_v26 }
 0xe2a   :  { %v3933_v11 = vsel %vm348_vm5, %v6852_v53, %v4804_v7  ;;  %v3932_v10 = vsel %vm348_vm5, %v6848_v14, %v4803_v38  ;;  %v6942_v14 = vld [vmem:[%s7178_s5 + $0x8] sm:$0x3f]  ;;  %s4470_s5 = sshll.u32 %s7182_s9, 4  ;;  %s4471_s5 = int_to_ptr.hbm [resolvable:$true] %s4470_s5 }
 0xe2b   :  { %v3938_v61 = vsel %vm1815_vm7, %v3932_v10, %v4808_v47  ;;  %v3939_v2 = vsel %vm1815_vm7, %v3933_v11, %v4809_v6  ;;  %v3951_v53 = vperm.slane %v6942_v14, 0 }
 0xe40   :  { %v4797_v63 = vpop.permute.xlu0 %4796 }
 0xe41   :  { %v4799_v58 = vunpack.i.h.bf16 %v4797_v63  ;;  %v4798_v17 = vunpack.i.l.bf16 %v4797_v63 }
 0xe43   :  { %v3942_v5 = vsel %vm1822_vm8, %v3936_v28, %v4798_v17  ;;  %v3943_v34 = vsel %vm1822_vm8, %v3937_v29, %v4799_v58 }
 0xe44   :  { %v3947_v48 = vpack.c.bf16 %v3943_v34, %v3942_v5 }
 0xe46   :  { %4614 = vmatmul.msk.bf16.gmra.mxu3 %vm41_vm0, %v3947_v48 }
 0xe78   :  { %v4812_v57 = vpop.permute.xlu0 %4811 }
 0xe79   :  { %v4814_v55 = vunpack.i.h.bf16 %v4812_v57  ;;  %v4813_v8 = vunpack.i.l.bf16 %v4812_v57 }
 0xe7b   :  { %v3945_v56 = vsel %vm1822_vm8, %v3939_v2, %v4814_v55  ;;  %v3944_v49 = vsel %vm1822_vm8, %v3938_v61, %v4813_v8  ;;  %v4550_v55 = vld [vmem:[%s7179_s6 + $0x30] sm:$0xff]  ;;  %v4551_v8 = vld [vmem:[%s7179_s6 + $0x38] sm:$0xff] }
 0xe7c   :  { %v3948_v43 = vpack.c.bf16 %v3945_v56, %v3944_v49  ;;  %v4141_v61 = vpack.c.bf16 %v4551_v8, %v4550_v55  ;;  %v4548_v49 = vld [vmem:[%s7179_s6 + $0x20] sm:$0xff] }
 0xe7e   :  { %4615 = vmatmul.msk.bf16.gmra.mxu3 %vm41_vm0, %v3948_v43  ;;  %4160 = vmatpush.bf16.msrb.mxu0 %v4141_v61  ;;  %v4549_v43 = vld [vmem:[%s7179_s6 + $0x28] sm:$0xff] }
 0xea0   :  { %v3970_v33 = vpop.f32.mrf.mxu3 }
 0xea1   :  { %v3971_v60 = vadd.f32 %v3970_v33, %v3951_v53  ;;  %v4140_v33 = vpack.c.bf16 %v4549_v43, %v4548_v49 }
 0xea3   :  { %v3985_v46 = vadd.f32 %v3971_v60, %v6233_v1  ;;  %4161 = vmatpush.bf16.msrb.mxu0 %v4140_v33 }
 0xea5   :  { %v3991_v36 = vsel %vm41_vm0, %v3985_v46, 0.0 }
 0xea6   :  { %3992 = vadd.xlane.f32.xlu2 %v3991_v36 }
 0xea8   :  { %v3972_v62 = vpop.f32.mrf.mxu3 }
 0xea9   :  { %v3973_v19 = vadd.f32 %v3972_v62, %v3951_v53 }
 0xeab   :  { %v3986_v24 = vadd.f32 %v3973_v19, %v6236_v21 }
 0xead   :  { %v3994_v52 = vsel %vm41_vm0, %v3986_v24, 0.0 }
 0xeae   :  { %3995 = vadd.xlane.f32.xlu1 %v3994_v52 }
 0xec9   :  { %v3975_v0 = vpop.f32.mrf.mxu3 }
 0xeca   :  { %v3976_v13 = vadd.f32 %v3975_v0, %v3951_v53 }
 0xecc   :  { %v3987_v12 = vadd.f32 %v3976_v13, %v6247_v59 }
 0xece   :  { %v3997_v39 = vsel %vm41_vm0, %v3987_v12, 0.0 }
 0xecf   :  { %3998 = vadd.xlane.f32.xlu0 %v3997_v39 }
 0xed1   :  { %v3977_v31 = vpop.f32.mrf.mxu3 }
 0xed2   :  { %v3978_v25 = vadd.f32 %v3977_v31, %v3951_v53 }
 0xed4   :  { %v3988_v1 = vadd.f32 %v3978_v25, %v6250_v22 }
 0xed6   :  { %v4000_v45 = vsel %vm41_vm0, %v3988_v1, 0.0 }
 0xed7   :  { %4001 = vadd.xlane.f32.xlu2 %v4000_v45 }
 0xf01   :  { %v3980_v44 = vpop.f32.mrf.mxu3 }
 0xf02   :  { %v3981_v41 = vadd.f32 %v3980_v44, %v3951_v53  ;;  %v7008_v44 = vperm.slane %v6942_v14, 1 }
 0xf04   :  { %v3989_v21 = vadd.f32 %v3981_v41, %v6261_v30 }
 0xf06   :  { %v4003_v4 = vsel %vm41_vm0, %v3989_v21, 0.0 }
 0xf07   :  { %4004 = vadd.xlane.f32.xlu1 %v4003_v4 }
 0xf09   :  { %v3982_v32 = vpop.f32.mrf.mxu3 }
 0xf0a   :  { %v3983_v40 = vadd.f32 %v3982_v32, %v3951_v53  ;;  %v7012_v32 = vperm.slane %v6942_v14, 2 }
 0xf0c   :  { %v3990_v59 = vadd.f32 %v3983_v40, %v6264_v51 }
 0xf0e   :  { %v4006_v54 = vsel %vm41_vm0, %v3990_v59, 0.0 }
 0xf0f   :  { %4007 = vadd.xlane.f32.xlu0 %v4006_v54 }
 0xf19   :  { %v3993_v50 = vpop.xlane.xlu2 %3992 }
 0xf1a   :  { %v4009_v22 = vmul.f32 %v3993_v50, %v5210_v18 }
 0xf1c   :  { %v6958_v16 = vsub.f32 %v3985_v46, %v4009_v22 }
 0xf1e   :  { %v4021_v35 = vmul.f32 %v6958_v16, %v6958_v16 }
 0xf20   :  { %v4027_v30 = vsel %vm41_vm0, %v4021_v35, 0.0 }
 0xf21   :  { %v3996_v9 = vpop.xlane.xlu1 %3995  ;;  %4028 = vadd.xlane.f32.xlu2 %v4027_v30 }
 0xf22   :  { %v4010_v3 = vmul.f32 %v3996_v9, %v5210_v18 }
 0xf24   :  { %v6964_v20 = vsub.f32 %v3986_v24, %v4010_v3 }
 0xf26   :  { %v4022_v51 = vmul.f32 %v6964_v20, %v6964_v20 }
 0xf28   :  { %v4030_v37 = vsel %vm41_vm0, %v4022_v51, 0.0 }
 0xf29   :  { %4031 = vadd.xlane.f32.xlu1 %v4030_v37 }
 0xf42   :  { %v3999_v27 = vpop.xlane.xlu0 %3998 }
 0xf43   :  { %v4011_v63 = vmul.f32 %v3999_v27, %v5210_v18 }
 0xf45   :  { %v6970_v15 = vsub.f32 %v3987_v12, %v4011_v63 }
 0xf47   :  { %v4023_v42 = vmul.f32 %v6970_v15, %v6970_v15 }
 0xf49   :  { %v4033_v58 = vsel %vm41_vm0, %v4023_v42, 0.0 }
 0xf4a   :  { %4034 = vadd.xlane.f32.xlu0 %v4033_v58  ;;  %v4002_v17 = vpop.xlane.xlu2 %4001 }
 0xf4b   :  { %v4012_v28 = vmul.f32 %v4002_v17, %v5210_v18 }
 0xf4d   :  { %v6976_v29 = vsub.f32 %v3988_v1, %v4012_v28 }
 0xf4f   :  { %v4024_v5 = vmul.f32 %v6976_v29, %v6976_v29 }
 0xf51   :  { %v4036_v34 = vsel %vm41_vm0, %v4024_v5, 0.0 }
 0xf52   :  { %4037 = vadd.xlane.f32.xlu2 %v4036_v34 }
 0xf7a   :  { %v4005_v48 = vpop.xlane.xlu1 %4004 }
 0xf7b   :  { %v4013_v26 = vmul.f32 %v4005_v48, %v5210_v18 }
 0xf7d   :  { %v6982_v7 = vsub.f32 %v3989_v21, %v4013_v26 }
 0xf7f   :  { %v4025_v38 = vmul.f32 %v6982_v7, %v6982_v7 }
 0xf81   :  { %v4039_v23 = vsel %vm41_vm0, %v4025_v38, 0.0 }
 0xf82   :  { %v4008_v11 = vpop.xlane.xlu0 %4007  ;;  %4040 = vadd.xlane.f32.xlu1 %v4039_v23 }
 0xf83   :  { %v4014_v10 = vmul.f32 %v4008_v11, %v5210_v18 }
 0xf85   :  { %v6988_v6 = vsub.f32 %v3990_v59, %v4014_v10 }
 0xf87   :  { %v4026_v47 = vmul.f32 %v6988_v6, %v6988_v6 }
 0xf89   :  { %v4042_v57 = vsel %vm41_vm0, %v4026_v47, 0.0 }
 0xf8a   :  { %4043 = vadd.xlane.f32.xlu0 %v4042_v57 }
 0xf94   :  { %v4029_v2 = vpop.xlane.xlu2 %4028 }
 0xf95   :  { %v4045_v56 = vmul.f32 %v4029_v2, %v5210_v18 }
 0xf97   :  { %v4051_v53 = vadd.f32 1e-12, %v4045_v56 }
 0xf99   :  { %5061 = vrsqrt.f32 %v4051_v53  ;;  %vm4063_vm6 = vweird.f32 %v4051_v53 }
 0xf9c   :  { %v4032_v60 = vpop.xlane.xlu1 %4031 }
 0xf9d   :  { %v4046_v46 = vmul.f32 %v4032_v60, %v5210_v18 }
 0xf9f   :  { %v5062_v36 = vpop.eup %5061  ;;  %v4052_v62 = vadd.f32 1e-12, %v4046_v46 }
 0xfa0   :  { %v4058_v19 = vmul.f32 %v5062_v36, %v4051_v53  ;;  %vm4064_vm5 = vweird.f32 %v5062_v36 }
 0xfa1   :  { %5063 = vrsqrt.f32 %v4052_v62  ;;  %vm4065_vm7 = vmor %vm4063_vm6, %vm4064_vm5  ;;  %vm4073_vm14 = vweird.f32 %v4052_v62 }
 0xfa2   :  { %v4059_v24 = vmul.f32 %v5062_v36, %v4058_v19 }
 0xfa4   :  { %v4060_v52 = vmul.f32 0.5, %v4059_v24 }
 0xfa6   :  { %v4061_v0 = vsub.f32 1.5, %v4060_v52 }
 0xfa7   :  { %v5064_v13 = vpop.eup %5063 }
 0xfa8   :  { %v4062_v12 = vmul.f32 %v5062_v36, %v4061_v0  ;;  %v4068_v39 = vmul.f32 %v5064_v13, %v4052_v62  ;;  %vm4074_vm8 = vweird.f32 %v5064_v13 }
 0xfa9   :  { %vm4075_vm15 = vmor %vm4073_vm14, %vm4074_vm8 }
 0xfaa   :  { %v4069_v31 = vmul.f32 %v5064_v13, %v4068_v39  ;;  %v4066_v25 = vsel %vm4065_vm7, %v5062_v36, %v4062_v12 }
 0xfab   :  { %v4117_v41 = vmul.f32 %v4066_v25, %v6958_v16 }
 0xfac   :  { %v4070_v1 = vmul.f32 0.5, %v4069_v31 }
 0xfad   :  { %v4124_v40 = vmul.f32 %v7008_v44, %v4117_v41 }
 0xfae   :  { %v4071_v45 = vsub.f32 1.5, %v4070_v1 }
 0xfaf   :  { %v7018_v50 = vadd.f32 %v7012_v32, %v4124_v40 }
 0xfb0   :  { %v4072_v21 = vmul.f32 %v5064_v13, %v4071_v45 }
 0xfb2   :  { %v4076_v4 = vsel %vm4075_vm15, %v5064_v13, %v4072_v21 }
 0xfb3   :  { %v4118_v59 = vmul.f32 %v4076_v4, %v6964_v20 }
 0xfb5   :  { %v4125_v54 = vmul.f32 %v7008_v44, %v4118_v59 }
 0xfb7   :  { %v7021_v22 = vadd.f32 %v7012_v32, %v4125_v54  ;;  %v4558_v54 = vld [vmem:[%s7181_s8 + $0x68] sm:$0xff] }
 0xfb9   :  { %v4137_v16 = vpack.c.bf16 %v7021_v22, %v7018_v50 }
 0xfbb   :  { %4616 = vmatmul.msk.bf16.vlgmr.msrb.gmra.mxu0 %vm41_vm0, %v4137_v16 }
 0xfbd   :  { %v4035_v35 = vpop.xlane.xlu0 %4034 }
 0xfbe   :  { %v4047_v30 = vmul.f32 %v4035_v35, %v5210_v18  ;;  %v4555_v35 = vld [vmem:[%s7181_s8 + $0x50] sm:$0xff] }
 0xfc0   :  { %v4053_v9 = vadd.f32 1e-12, %v4047_v30  ;;  %v4556_v30 = vld [vmem:[%s7181_s8 + $0x58] sm:$0xff] }
 0xfc2   :  { %5065 = vrsqrt.f32 %v4053_v9  ;;  %vm4083_vm3 = vweird.f32 %v4053_v9 }
 0xfc5   :  { %v4038_v3 = vpop.xlane.xlu2 %4037 }
 0xfc6   :  { %v4048_v20 = vmul.f32 %v4038_v3, %v5210_v18  ;;  %v7077_v3 = vld [vmem:[%s7180_s7 + $0x1] ss:$0 sm:$0xff]  ;;  %s5135_s7 = smov [#allocation2]  }
 0xfc8   :  { %v5066_v51 = vpop.eup %5065  ;;  %v4054_v37 = vadd.f32 1e-12, %v4048_v20  ;;  %v4553_v20 = vld [vmem:[%s7181_s8 + $0x40] sm:$0xff] }
 0xfc9   :  { %v4078_v27 = vmul.f32 %v5066_v51, %v4053_v9  ;;  %vm4084_vm2 = vweird.f32 %v5066_v51  ;;  %v4236_v9 = vpack.c.bf16 %v4556_v30, %v4555_v35 }
 0xfca   :  { %5067 = vrsqrt.f32 %v4054_v37  ;;  %vm4085_vm4 = vmor %vm4083_vm3, %vm4084_vm2  ;;  %vm4093_vm10 = vweird.f32 %v4054_v37 }
 0xfcb   :  { %v4079_v63 = vmul.f32 %v5066_v51, %v4078_v27 }
 0xfcd   :  { %v4080_v42 = vmul.f32 0.5, %v4079_v63 }
 0xfcf   :  { %v4081_v58 = vsub.f32 1.5, %v4080_v42 }
 0xfd0   :  { %v5068_v17 = vpop.eup %5067 }
 0xfd1   :  { %v4082_v28 = vmul.f32 %v5066_v51, %v4081_v58  ;;  %v4088_v5 = vmul.f32 %v5068_v17, %v4054_v37  ;;  %vm4094_vm9 = vweird.f32 %v5068_v17 }
 0xfd2   :  { %vm4095_vm11 = vmor %vm4093_vm10, %vm4094_vm9 }
 0xfd3   :  { %v4089_v34 = vmul.f32 %v5068_v17, %v4088_v5  ;;  %v4086_v48 = vsel %vm4085_vm4, %v5066_v51, %v4082_v28  ;;  %v4554_v51 = vld [vmem:[%s7181_s8 + $0x48] sm:$0xff] }
 0xfd4   :  { %v4119_v23 = vmul.f32 %v4086_v48, %v6970_v15  ;;  %v4235_v37 = vpack.c.bf16 %v4554_v51, %v4553_v20 }
 0xfd5   :  { %v4090_v26 = vmul.f32 0.5, %v4089_v34 }
 0xfd6   :  { %v4126_v57 = vmul.f32 %v7008_v44, %v4119_v23 }
 0xfd7   :  { %v4091_v38 = vsub.f32 1.5, %v4090_v26 }
 0xfd8   :  { %v7033_v8 = vadd.f32 %v7012_v32, %v4126_v57 }
 0xfd9   :  { %v4092_v11 = vmul.f32 %v5068_v17, %v4091_v38 }
 0xfdb   :  { %v4096_v10 = vsel %vm4095_vm11, %v5068_v17, %v4092_v11 }
 0xfdc   :  { %v4120_v47 = vmul.f32 %v4096_v10, %v6976_v29 }
 0xfde   :  { %v4127_v55 = vmul.f32 %v7008_v44, %v4120_v47 }
 0xfe0   :  { %v7036_v61 = vadd.f32 %v7012_v32, %v4127_v55 }
 0xfe2   :  { %v4138_v2 = vpack.c.bf16 %v7036_v61, %v7033_v8 }
 0xfe4   :  { %4617 = vmatmul.msk.bf16.gmra.mxu0 %vm41_vm0, %v4138_v2 }
 0xff5   :  { %v4041_v15 = vpop.xlane.xlu1 %4040 }
 0xff6   :  { %v4049_v56 = vmul.f32 %v4041_v15, %v5210_v18 }
 0xff8   :  { %v4055_v49 = vadd.f32 1e-12, %v4049_v56 }
 0xffa   :  { %5069 = vrsqrt.f32 %v4055_v49  ;;  %vm4103_vm13 = vweird.f32 %v4055_v49 }
 0xffd   :  { %v4044_v29 = vpop.xlane.xlu0 %4043 }
 0xffe   :  { %v4050_v43 = vmul.f32 %v4044_v29, %v5210_v18 }
0x1000   :  { %v5070_v53 = vpop.eup %5069  ;;  %v4056_v33 = vadd.f32 1e-12, %v4050_v43 }
0x1001   :  { %v4098_v60 = vmul.f32 %v5070_v53, %v4055_v49  ;;  %vm4104_vm12 = vweird.f32 %v5070_v53 }
0x1002   :  { %5071 = vrsqrt.f32 %v4056_v33  ;;  %vm4105_vm5 = vmor %vm4103_vm13, %vm4104_vm12  ;;  %vm4113_vm7 = vweird.f32 %v4056_v33 }
0x1003   :  { %v4099_v46 = vmul.f32 %v5070_v53, %v4098_v60 }
0x1005   :  { %v4100_v36 = vmul.f32 0.5, %v4099_v46 }
0x1007   :  { %v4101_v62 = vsub.f32 1.5, %v4100_v36 }
0x1008   :  { %v5072_v19 = vpop.eup %5071 }
0x1009   :  { %v4102_v24 = vmul.f32 %v5070_v53, %v4101_v62  ;;  %v4108_v52 = vmul.f32 %v5072_v19, %v4056_v33  ;;  %vm4114_vm6 = vweird.f32 %v5072_v19 }
0x100a   :  { %vm4115_vm8 = vmor %vm4113_vm7, %vm4114_vm6 }
0x100b   :  { %v4109_v0 = vmul.f32 %v5072_v19, %v4108_v52  ;;  %v4106_v13 = vsel %vm4105_vm5, %v5070_v53, %v4102_v24 }
0x100c   :  { %v4121_v31 = vmul.f32 %v4106_v13, %v6982_v7  ;;  %v4559_v7 = vld [vmem:[%s7181_s8 + $0x70] sm:$0xff] }
0x100d   :  { %v4110_v12 = vmul.f32 0.5, %v4109_v0 }
0x100e   :  { %v4128_v41 = vmul.f32 %v7008_v44, %v4121_v31 }
0x100f   :  { %v4111_v39 = vsub.f32 1.5, %v4110_v12 }
0x1010   :  { %v7048_v4 = vadd.f32 %v7012_v32, %v4128_v41 }
0x1011   :  { %v4112_v25 = vmul.f32 %v5072_v19, %v4111_v39 }
0x1013   :  { %v4116_v1 = vsel %vm4115_vm8, %v5072_v19, %v4112_v25 }
0x1014   :  { %v4122_v45 = vmul.f32 %v4116_v1, %v6988_v6  ;;  %v4560_v6 = vld [vmem:[%s7181_s8 + $0x78] sm:$0xff] }
0x1016   :  { %v4129_v21 = vmul.f32 %v7008_v44, %v4122_v45  ;;  %v4238_v44 = vpack.c.bf16 %v4560_v6, %v4559_v7 }
0x1018   :  { %v7051_v40 = vadd.f32 %v7012_v32, %v4129_v21  ;;  %4253 = vmatpush.bf16.msrb.mxu1 %v4238_v44  ;;  %v4557_v32 = vld [vmem:[%s7181_s8 + $0x60] sm:$0xff]  ;;  %s4468_s8 = sshll.u32 %s5135_s7, 4  ;;  %s4469_s8 = int_to_ptr.vmem [resolvable:$true] %s4468_s8 }
0x1019   :  { %v4237_v16 = vpack.c.bf16 %v4558_v54, %v4557_v32 }
0x101a   :  { %v4139_v59 = vpack.c.bf16 %v7051_v40, %v7048_v4 }
0x101c   :  { %4618 = vmatmul.msk.bf16.gmra.mxu0 %vm41_vm0, %v4139_v59  ;;  %4254 = vmatpush.bf16.msrb.mxu1 %v4237_v16 }
0x1020   :  { %4255 = vmatpush.bf16.msrb.mxu1 %v4236_v9 }
0x1024   :  { %4256 = vmatpush.bf16.msrb.mxu1 %v4235_v37 }
0x1038   :  { %v4163_v27 = vpop.f32.mrf.mxu0 }
0x1039   :  { %v4164_v63 = vadd.f32 %v7077_v3, %v4163_v27 }
0x103b   :  { %v4184_v42 = vmul.f32 0.044715, %v4164_v63  ;;  %v4178_v2 = vmul.f32 0.5, %v4164_v63 }
0x103d   :  { %v4190_v58 = vmul.f32 %v4184_v42, %v4164_v63 }
0x103f   :  { %v4196_v17 = vmul.f32 %v4190_v58, %v4164_v63 }
0x1040   :  { %v4165_v28 = vpop.f32.mrf.mxu0 }
0x1041   :  { %v4202_v5 = vadd.f32 %v4196_v17, %v4164_v63  ;;  %v4166_v34 = vadd.f32 %v7077_v3, %v4165_v28 }
0x1043   :  { %v4185_v48 = vmul.f32 0.044715, %v4166_v34  ;;  %v4208_v26 = vmul.f32 0.7978846, %v4202_v5  ;;  %v4179_v15 = vmul.f32 0.5, %v4166_v34 }
0x1045   :  { %v4191_v38 = vmul.f32 %v4185_v48, %v4166_v34  ;;  %5073 = vtanh.f32 %v4208_v26 }
0x1047   :  { %v4197_v23 = vmul.f32 %v4191_v38, %v4166_v34 }
0x1049   :  { %v4203_v11 = vadd.f32 %v4197_v23, %v4166_v34 }
0x104b   :  { %v4209_v10 = vmul.f32 0.7978846, %v4203_v11  ;;  %v5074_v47 = vpop.eup %5073 }
0x104c   :  { %v4220_v57 = vadd.f32 1.0, %v5074_v47 }
0x104d   :  { %5075 = vtanh.f32 %v4209_v10 }
0x104e   :  { %v4226_v49 = vmul.f32 %v4220_v57, %v4178_v2 }
0x1053   :  { %v5076_v55 = vpop.eup %5075 }
0x1054   :  { %v4221_v56 = vadd.f32 1.0, %v5076_v55 }
0x1056   :  { %v4227_v29 = vmul.f32 %v4221_v56, %v4179_v15 }
0x1058   :  { %v4232_v43 = vpack.c.bf16 %v4227_v29, %v4226_v49 }
0x105a   :  { %4619 = vmatmul.msk.bf16.vlgmr.msrb.gmra.mxu1 %vm2123_vm1, %v4232_v43 }
0x1061   :  { %v4168_v53 = vpop.f32.mrf.mxu0 }
0x1062   :  { %v4169_v33 = vadd.f32 %v7077_v3, %v4168_v53 }
0x1064   :  { %v4186_v60 = vmul.f32 0.044715, %v4169_v33  ;;  %v4180_v41 = vmul.f32 0.5, %v4169_v33 }
0x1066   :  { %v4192_v46 = vmul.f32 %v4186_v60, %v4169_v33 }
0x1068   :  { %v4198_v36 = vmul.f32 %v4192_v46, %v4169_v33 }
0x1069   :  { %v4170_v62 = vpop.f32.mrf.mxu0 }
0x106a   :  { %v4204_v19 = vadd.f32 %v4198_v36, %v4169_v33  ;;  %v4171_v24 = vadd.f32 %v7077_v3, %v4170_v62 }
0x106c   :  { %v4187_v52 = vmul.f32 0.044715, %v4171_v24  ;;  %v4210_v0 = vmul.f32 0.7978846, %v4204_v19  ;;  %v4181_v21 = vmul.f32 0.5, %v4171_v24 }
0x106e   :  { %v4193_v13 = vmul.f32 %v4187_v52, %v4171_v24  ;;  %5077 = vtanh.f32 %v4210_v0 }
0x1070   :  { %v4199_v12 = vmul.f32 %v4193_v13, %v4171_v24 }
0x1072   :  { %v4205_v39 = vadd.f32 %v4199_v12, %v4171_v24 }
0x1074   :  { %v4211_v31 = vmul.f32 0.7978846, %v4205_v39  ;;  %v5078_v25 = vpop.eup %5077 }
0x1075   :  { %v4222_v1 = vadd.f32 1.0, %v5078_v25 }
0x1076   :  { %5079 = vtanh.f32 %v4211_v31 }
0x1077   :  { %v4228_v7 = vmul.f32 %v4222_v1, %v4180_v41 }
0x107c   :  { %v5080_v45 = vpop.eup %5079 }
0x107d   :  { %v4223_v59 = vadd.f32 1.0, %v5080_v45 }
0x107f   :  { %v4229_v6 = vmul.f32 %v4223_v59, %v4181_v21 }
0x1081   :  { %v4233_v44 = vpack.c.bf16 %v4229_v6, %v4228_v7 }
0x1083   :  { %4620 = vmatmul.msk.bf16.gmra.mxu1 %vm2123_vm1, %v4233_v44 }
0x1099   :  { %v4173_v32 = vpop.f32.mrf.mxu0 }
0x109a   :  { %v4174_v54 = vadd.f32 %v7077_v3, %v4173_v32 }
0x109c   :  { %v4188_v16 = vmul.f32 0.044715, %v4174_v54  ;;  %v4182_v48 = vmul.f32 0.5, %v4174_v54 }
0x109e   :  { %v4194_v35 = vmul.f32 %v4188_v16, %v4174_v54 }
0x10a0   :  { %v4200_v30 = vmul.f32 %v4194_v35, %v4174_v54 }
0x10a1   :  { %v4175_v9 = vpop.f32.mrf.mxu0 }
0x10a2   :  { %v4206_v20 = vadd.f32 %v4200_v30, %v4174_v54  ;;  %v4176_v51 = vadd.f32 %v7077_v3, %v4175_v9  ;;  %v4239_v3 = vperm.slane %v6942_v14, 3 }
0x10a4   :  { %v4189_v37 = vmul.f32 0.044715, %v4176_v51  ;;  %v4212_v27 = vmul.f32 0.7978846, %v4206_v20  ;;  %v4183_v26 = vmul.f32 0.5, %v4176_v51 }
0x10a6   :  { %v4195_v63 = vmul.f32 %v4189_v37, %v4176_v51  ;;  %5081 = vtanh.f32 %v4212_v27 }
0x10a8   :  { %v4201_v42 = vmul.f32 %v4195_v63, %v4176_v51 }
0x10aa   :  { %v4207_v58 = vadd.f32 %v4201_v42, %v4176_v51 }
0x10ac   :  { %v4213_v17 = vmul.f32 0.7978846, %v4207_v58  ;;  %v5082_v28 = vpop.eup %5081 }
0x10ad   :  { %v4224_v5 = vadd.f32 1.0, %v5082_v28 }
0x10ae   :  { %5083 = vtanh.f32 %v4213_v17 }
0x10af   :  { %v4230_v23 = vmul.f32 %v4224_v5, %v4182_v48 }
0x10b4   :  { %v5084_v34 = vpop.eup %5083 }
0x10b5   :  { %v4225_v38 = vadd.f32 1.0, %v5084_v34 }
0x10b7   :  { %v4231_v11 = vmul.f32 %v4225_v38, %v4183_v26 }
0x10b9   :  { %v4234_v10 = vpack.c.bf16 %v4231_v11, %v4230_v23 }
0x10bb   :  { %4621 = vmatmul.msk.bf16.gmra.mxu1 %vm2123_vm1, %v4234_v10 }
0x10d7   :  { %v4258_v47 = vpop.f32.mrf.mxu1 }
0x10d8   :  { %v4259_v57 = vadd.f32 %v4258_v47, %v4239_v3 }
0x10da   :  { %v4273_v55 = vadd.f32 %v4259_v57, %v7018_v50 }
0x10dc   :  { %v4279_v2 = vsel %vm41_vm0, %v4273_v55, 0.0 }
0x10dd   :  { %4280 = vadd.xlane.f32.xlu2 %v4279_v2 }
0x10df   :  { %v4260_v15 = vpop.f32.mrf.mxu1 }
0x10e0   :  { %v4261_v56 = vadd.f32 %v4260_v15, %v4239_v3 }
0x10e2   :  { %v4274_v49 = vadd.f32 %v4261_v56, %v7021_v22 }
0x10e4   :  { %v4282_v29 = vsel %vm41_vm0, %v4274_v49, 0.0 }
0x10e5   :  { %4283 = vadd.xlane.f32.xlu1 %v4282_v29 }
0x1100   :  { %v4263_v43 = vpop.f32.mrf.mxu1 }
0x1101   :  { %v4264_v53 = vadd.f32 %v4263_v43, %v4239_v3 }
0x1103   :  { %v4275_v33 = vadd.f32 %v4264_v53, %v7033_v8 }
0x1105   :  { %v4285_v60 = vsel %vm41_vm0, %v4275_v33, 0.0 }
0x1106   :  { %4286 = vadd.xlane.f32.xlu1 %v4285_v60 }
0x1108   :  { %v4265_v46 = vpop.f32.mrf.mxu1 }
0x1109   :  { %v4266_v36 = vadd.f32 %v4265_v46, %v4239_v3 }
0x110b   :  { %v4276_v50 = vadd.f32 %v4266_v36, %v7036_v61 }
0x110d   :  { %v4288_v62 = vsel %vm41_vm0, %v4276_v50, 0.0 }
0x110e   :  { %4289 = vadd.xlane.f32.xlu0 %v4288_v62 }
0x1138   :  { %v4268_v19 = vpop.f32.mrf.mxu1 }
0x1139   :  { %v4269_v24 = vadd.f32 %v4268_v19, %v4239_v3 }
0x113b   :  { %v4277_v22 = vadd.f32 %v4269_v24, %v7048_v4 }
0x113d   :  { %v4291_v52 = vsel %vm41_vm0, %v4277_v22, 0.0 }
0x113e   :  { %4292 = vadd.xlane.f32.xlu2 %v4291_v52 }
0x1140   :  { %v4270_v0 = vpop.f32.mrf.mxu1 }
0x1141   :  { %v4271_v13 = vadd.f32 %v4270_v0, %v4239_v3 }
0x1143   :  { %v4278_v8 = vadd.f32 %v4271_v13, %v7051_v40 }
0x1145   :  { %v4294_v12 = vsel %vm41_vm0, %v4278_v8, 0.0 }
0x1146   :  { %4295 = vadd.xlane.f32.xlu0 %v4294_v12 }
0x1150   :  { %v4281_v39 = vpop.xlane.xlu2 %4280 }
0x1151   :  { %v4297_v61 = vmul.f32 %v4281_v39, %v5210_v18 }
0x1153   :  { %v7108_v31 = vsub.f32 %v4273_v55, %v4297_v61 }
0x1155   :  { %v4309_v25 = vmul.f32 %v7108_v31, %v7108_v31 }
0x1157   :  { %v4315_v4 = vsel %vm41_vm0, %v4309_v25, 0.0 }
0x1158   :  { %v4284_v1 = vpop.xlane.xlu1 %4283  ;;  %4316 = vadd.xlane.f32.xlu2 %v4315_v4 }
0x1159   :  { %v4298_v45 = vmul.f32 %v4284_v1, %v5210_v18 }
0x115b   :  { %v7114_v41 = vsub.f32 %v4274_v49, %v4298_v45 }
0x115d   :  { %v4310_v40 = vmul.f32 %v7114_v41, %v7114_v41 }
0x115f   :  { %v4318_v21 = vsel %vm41_vm0, %v4310_v40, 0.0 }
0x1160   :  { %4319 = vadd.xlane.f32.xlu1 %v4318_v21 }
0x1179   :  { %v4287_v59 = vpop.xlane.xlu1 %4286 }
0x117a   :  { %v4299_v7 = vmul.f32 %v4287_v59, %v5210_v18 }
0x117c   :  { %v7120_v6 = vsub.f32 %v4275_v33, %v4299_v7 }
0x117e   :  { %v4311_v44 = vmul.f32 %v7120_v6, %v7120_v6 }
0x1180   :  { %v4321_v32 = vsel %vm41_vm0, %v4311_v44, 0.0  ;;  %v4411_v44 = vperm.slane %v6942_v14, 4 }
0x1181   :  { %v4290_v54 = vpop.xlane.xlu0 %4289  ;;  %4322 = vadd.xlane.f32.xlu1 %v4321_v32 }
0x1182   :  { %v4300_v16 = vmul.f32 %v4290_v54, %v5210_v18 }
0x1184   :  { %v7126_v35 = vsub.f32 %v4276_v50, %v4300_v16 }
0x1186   :  { %v4312_v30 = vmul.f32 %v7126_v35, %v7126_v35 }
0x1188   :  { %v4324_v9 = vsel %vm41_vm0, %v4312_v30, 0.0 }
0x1189   :  { %4325 = vadd.xlane.f32.xlu0 %v4324_v9 }
0x11b1   :  { %v4293_v20 = vpop.xlane.xlu2 %4292 }
0x11b2   :  { %v4301_v51 = vmul.f32 %v4293_v20, %v5210_v18 }
0x11b4   :  { %v7132_v37 = vsub.f32 %v4277_v22, %v4301_v51 }
0x11b6   :  { %v4313_v27 = vmul.f32 %v7132_v37, %v7132_v37 }
0x11b8   :  { %v4327_v63 = vsel %vm41_vm0, %v4313_v27, 0.0 }
0x11b9   :  { %v4296_v42 = vpop.xlane.xlu0 %4295  ;;  %4328 = vadd.xlane.f32.xlu2 %v4327_v63  ;;  %v4418_v63 = vperm.slane %v6942_v14, 5 }
0x11ba   :  { %v4302_v58 = vmul.f32 %v4296_v42, %v5210_v18 }
0x11bc   :  { %v7138_v17 = vsub.f32 %v4278_v8, %v4302_v58 }
0x11be   :  { %v4314_v28 = vmul.f32 %v7138_v17, %v7138_v17 }
0x11c0   :  { %v4330_v5 = vsel %vm41_vm0, %v4314_v28, 0.0 }
0x11c1   :  { %4331 = vadd.xlane.f32.xlu0 %v4330_v5 }
0x11cb   :  { %v4317_v48 = vpop.xlane.xlu2 %4316 }
0x11cc   :  { %v4333_v23 = vmul.f32 %v4317_v48, %v5210_v18 }
0x11ce   :  { %v4339_v3 = vadd.f32 1e-12, %v4333_v23 }
0x11d0   :  { %vm4351_vm3 = vweird.f32 %v4339_v3 }
0x11d3   :  { %v4320_v34 = vpop.xlane.xlu1 %4319 }
0x11d4   :  { %v4334_v38 = vmul.f32 %v4320_v34, %v5210_v18 }
0x11d6   :  { %v4340_v10 = vadd.f32 1e-12, %v4334_v38 }
0x11d8   :  { %5085 = vrsqrt.f32 %v4340_v10  ;;  %vm4361_vm15 = vweird.f32 %v4340_v10 }
0x11d9   :  { %5087 = vrsqrt.f32 %v4339_v3 }
0x11de   :  { %v5086_v55 = vpop.eup %5085 }
0x11df   :  { %v5088_v2 = vpop.eup %5087  ;;  %v4356_v49 = vmul.f32 %v5086_v55, %v4340_v10  ;;  %vm4362_vm1 = vweird.f32 %v5086_v55 }
0x11e0   :  { %v4346_v29 = vmul.f32 %v5088_v2, %v4339_v3  ;;  %vm4352_vm14 = vweird.f32 %v5088_v2  ;;  %vm4363_vm4 = vmor %vm4361_vm15, %vm4362_vm1 }
0x11e1   :  { %v4357_v33 = vmul.f32 %v5086_v55, %v4356_v49  ;;  %vm4353_vm9 = vmor %vm4351_vm3, %vm4352_vm14  ;;  %v5134_v49 = vmov 24.0   ;;  %vm4461_vm3 = vcmask 254976  }
0x11e2   :  { %v4347_v60 = vmul.f32 %v5088_v2, %v4346_v29 }
0x11e3   :  { %v4358_v36 = vmul.f32 0.5, %v4357_v33 }
0x11e4   :  { %v4348_v50 = vmul.f32 0.5, %v4347_v60 }
0x11e5   :  { %v4359_v19 = vsub.f32 1.5, %v4358_v36 }
0x11e6   :  { %v4349_v22 = vsub.f32 1.5, %v4348_v50 }
0x11e7   :  { %v4360_v0 = vmul.f32 %v5086_v55, %v4359_v19 }
0x11e8   :  { %v4350_v39 = vmul.f32 %v5088_v2, %v4349_v22 }
0x11e9   :  { %v4364_v4 = vsel %vm4363_vm4, %v5086_v55, %v4360_v0 }
0x11ea   :  { %v4354_v45 = vsel %vm4353_vm9, %v5088_v2, %v4350_v39  ;;  %v4406_v21 = vmul.f32 %v4364_v4, %v7114_v41 }
0x11eb   :  { %v4405_v32 = vmul.f32 %v4354_v45, %v7108_v31 }
0x11ec   :  { %v4413_v9 = vmul.f32 %v4411_v44, %v4406_v21 }
0x11ed   :  { %v4412_v42 = vmul.f32 %v4411_v44, %v4405_v32 }
0x11ee   :  { %v4420_v28 = vadd.f32 %v4418_v63, %v4413_v9 }
0x11f4   :  { %v4323_v26 = vpop.xlane.xlu1 %4322 }
0x11f5   :  { %v4335_v11 = vmul.f32 %v4323_v26, %v5210_v18  ;;  %v4426_v26 = vsel %vm41_vm0, %v4420_v28, 0.0 }
0x11f7   :  { %v4341_v47 = vadd.f32 1e-12, %v4335_v11 }
0x11f9   :  { %5089 = vrsqrt.f32 %v4341_v47  ;;  %vm4371_vm10 = vweird.f32 %v4341_v47 }
0x11fc   :  { %v4326_v57 = vpop.xlane.xlu0 %4325 }
0x11fd   :  { %v4336_v56 = vmul.f32 %v4326_v57, %v5210_v18 }
0x11ff   :  { %v5090_v15 = vpop.eup %5089  ;;  %v4342_v53 = vadd.f32 1e-12, %v4336_v56 }
0x1200   :  { %v4366_v43 = vmul.f32 %v5090_v15, %v4341_v47  ;;  %vm4372_vm2 = vweird.f32 %v5090_v15 }
0x1201   :  { %5091 = vrsqrt.f32 %v4342_v53  ;;  %vm4373_vm11 = vmor %vm4371_vm10, %vm4372_vm2  ;;  %vm4381_vm13 = vweird.f32 %v4342_v53 }
0x1202   :  { %v4367_v46 = vmul.f32 %v5090_v15, %v4366_v43 }
0x1204   :  { %v4368_v62 = vmul.f32 0.5, %v4367_v46 }
0x1206   :  { %v4369_v52 = vsub.f32 1.5, %v4368_v62 }
0x1207   :  { %v7147_v24 = vpop.eup %5091 }
0x1208   :  { %v4376_v13 = vmul.f32 %v7147_v24, %v4342_v53  ;;  %v4370_v61 = vmul.f32 %v5090_v15, %v4369_v52  ;;  %vm4382_vm12 = vweird.f32 %v7147_v24 }
0x1209   :  { %vm4383_vm6 = vmor %vm4381_vm13, %vm4382_vm12 }
0x120a   :  { %v4377_v1 = vmul.f32 %v7147_v24, %v4376_v13  ;;  %v4374_v40 = vsel %vm4373_vm11, %v5090_v15, %v4370_v61 }
0x120b   :  { %v4407_v54 = vmul.f32 %v4374_v40, %v7120_v6  ;;  %v4419_v6 = vadd.f32 %v4418_v63, %v4412_v42 }
0x120c   :  { %v4378_v59 = vmul.f32 0.5, %v4377_v1 }
0x120d   :  { %v4414_v58 = vmul.f32 %v4411_v44, %v4407_v54  ;;  %v4425_v11 = vsel %vm41_vm0, %v4419_v6, 0.0 }
0x120e   :  { %v4379_v51 = vsub.f32 1.5, %v4378_v59  ;;  %v4427_v3 = vadd.f32 %v4426_v26, %v4425_v11 }
0x120f   :  { %v4421_v34 = vadd.f32 %v4418_v63, %v4414_v58 }
0x1210   :  { %v4380_v5 = vmul.f32 %v7147_v24, %v4379_v51 }
0x1211   :  { %v4428_v10 = vsel %vm41_vm0, %v4421_v34, 0.0 }
0x1212   :  { %v4384_v14 = vsel %vm4383_vm6, %v7147_v24, %v4380_v5  ;;  %v4429_v15 = vadd.f32 %v4428_v10, %v4427_v3 }
0x1213   :  { %v4408_v55 = vmul.f32 %v4384_v14, %v7126_v35 }
0x1214   :  { %v4430_v60 = vrot.slane %v4429_v15, 4 }
0x1215   :  { %v4415_v53 = vmul.f32 %v4411_v44, %v4408_v55 }
0x1216   :  { %v4431_v19 = vadd.f32 %v4430_v60, %v4429_v15 }
0x1217   :  { %v4422_v62 = vadd.f32 %v4418_v63, %v4415_v53 }
0x1219   :  { %v4436_v52 = vsel %vm41_vm0, %v4422_v62, 0.0 }
0x122c   :  { %v4329_v8 = vpop.xlane.xlu2 %4328 }
0x122d   :  { %v4337_v12 = vmul.f32 %v4329_v8, %v5210_v18  ;;  %v4432_v8 = vrot.slane %v4431_v19, 2 }
0x122f   :  { %v4343_v25 = vadd.f32 1e-12, %v4337_v12 }
0x1231   :  { %5093 = vrsqrt.f32 %v4343_v25  ;;  %vm4391_vm7 = vweird.f32 %v4343_v25 }
0x1234   :  { %v4332_v7 = vpop.xlane.xlu0 %4331 }
0x1235   :  { %v4338_v16 = vmul.f32 %v4332_v7, %v5210_v18 }
0x1237   :  { %v5094_v30 = vpop.eup %5093  ;;  %v4344_v20 = vadd.f32 1e-12, %v4338_v16 }
0x1238   :  { %v4386_v27 = vmul.f32 %v5094_v30, %v4343_v25  ;;  %vm4392_vm5 = vweird.f32 %v5094_v30  ;;  %v4433_v25 = vadd.f32 %v4432_v8, %v4431_v19 }
0x1239   :  { %5095 = vrsqrt.f32 %v4344_v20  ;;  %vm4393_vm8 = vmor %vm4391_vm7, %vm4392_vm5  ;;  %vm4401_vm14 = vweird.f32 %v4344_v20 }
0x123a   :  { %v4387_v41 = vmul.f32 %v5094_v30, %v4386_v27  ;;  %5097 = vrcp.f32 %v5134_v49  ;;  %v4434_v40 = vrot.slane %v4433_v25, 1 }
0x123c   :  { %v4388_v31 = vmul.f32 0.5, %v4387_v41  ;;  %v4435_v7 = vadd.f32 %v4434_v40, %v4433_v25 }
0x123e   :  { %v4389_v18 = vsub.f32 1.5, %v4388_v31 }
0x123f   :  { %v5096_v48 = vpop.eup %5095 }
0x1240   :  { %v4390_v38 = vmul.f32 %v5094_v30, %v4389_v18  ;;  %v4396_v23 = vmul.f32 %v5096_v48, %v4344_v20  ;;  %vm4402_vm1 = vweird.f32 %v5096_v48  ;;  %v5098_v36 = vpop.eup %5097 }
0x1241   :  { %vm4403_vm15 = vmor %vm4401_vm14, %vm4402_vm1  ;;  %v4448_v22 = vmul.f32 24.0, %v5098_v36  ;;  %vm4452_vm2 = vweird.f32 %v5098_v36 }
0x1242   :  { %v4394_v47 = vsel %vm4393_vm8, %v5094_v30, %v4390_v38  ;;  %v4397_v57 = vmul.f32 %v5096_v48, %v4396_v23 }
0x1243   :  { %v4409_v2 = vmul.f32 %v4394_v47, %v7132_v37  ;;  %v4449_v39 = vsub.f32 1.0, %v4448_v22 }
0x1244   :  { %v4398_v56 = vmul.f32 0.5, %v4397_v57 }
0x1245   :  { %v4416_v29 = vmul.f32 %v4411_v44, %v4409_v2  ;;  %v4450_v1 = vmul.f32 %v5098_v36, %v4449_v39 }
0x1246   :  { %v4399_v43 = vsub.f32 1.5, %v4398_v56 }
0x1247   :  { %v4423_v46 = vadd.f32 %v4418_v63, %v4416_v29  ;;  %v4451_v21 = vadd.f32 %v5098_v36, %v4450_v1 }
0x1248   :  { %v4400_v33 = vmul.f32 %v5096_v48, %v4399_v43 }
0x1249   :  { %v4437_v37 = vsel %vm41_vm0, %v4423_v46, 0.0  ;;  %v4453_v32 = vsel %vm4452_vm2, %v5098_v36, %v4451_v21 }
0x124a   :  { %v4404_v50 = vsel %vm4403_vm15, %v5096_v48, %v4400_v33  ;;  %v4438_v13 = vadd.f32 %v4437_v37, %v4436_v52  ;;  %v4454_v16 = vmul.f32 %v4453_v32, %v4435_v7 }
0x124b   :  { %v4410_v35 = vmul.f32 %v4404_v50, %v7138_v17 }
0x124d   :  { %v4417_v24 = vmul.f32 %v4411_v44, %v4410_v35 }
0x124f   :  { %v4424_v0 = vadd.f32 %v4418_v63, %v4417_v24 }
0x1251   :  { %v4439_v12 = vsel %vm41_vm0, %v4424_v0, 0.0  ;;  %vm4458_vm0 = vcmask 1041409  }
0x1252   :  { %v4440_v61 = vadd.f32 %v4439_v12, %v4438_v13 }
0x1254   :  { %v4441_v4 = vrot.slane %v4440_v61, 4 }
0x1256   :  { %v4442_v45 = vadd.f32 %v4441_v4, %v4440_v61 }
0x1258   :  { %v4443_v17 = vrot.slane %v4442_v45, 2 }
0x125a   :  { %v4444_v59 = vadd.f32 %v4443_v17, %v4442_v45 }
0x125c   :  { %v4445_v44 = vrot.slane %v4444_v59, 1 }
0x125e   :  { %v4446_v54 = vadd.f32 %v4445_v44, %v4444_v59 }
0x1260   :  { %v4455_v30 = vmul.f32 %v4453_v32, %v4446_v54 }
0x1262   :  { %v4459_v9 = vsel %vm4458_vm0, %v4455_v30, %v4454_v16 }
0x1263   :  { %4462 = vst.msk [vmem:[#allocation2] sm:$0x3] %vm4461_vm3, %v4459_v9 }
0x1264   :  { %4473 = dma.vmem_to_hbm [thread:$0]  %s4469_s8, 32, %s4471_s5, [#allocation3]  }
0x1265   :  { %5123 = dma.done.wait [#allocation3], 32  }
0x1266   :  { %5124 = vsyncadd [#allocation3], 4294967264 }
0x1267   :  { %4478 = vsyncpa [#allocation3], 1 }

</bundles_post_ra>
